<compile_context>
chip_gen: v7x
topology: tpu7x:2x2x1
jax: 0.10.0
libtpu: 0.0.40
codegen_flags: <defaults>
</compile_context>

<pallas_src>
import functools

import jax
import jax.numpy as jnp
from jax.experimental import pallas as pl
from jax.experimental.pallas import tpu as pltpu


def _leaky_relu(x, slope):
    return jnp.where(x >= 0, x, slope * x)


def aggregator_kernel(adj_ref, emb_ref, h_ref, scale_ref, mask_ref,
                      ws_ref, bs_ref, wn_ref, bn_ref, wr_ref, br_ref,
                      out_ref, msg_acc, *, slope, tile_k, emb_resident):
    k = pl.program_id(1)

    @pl.when(k == 0)
    def _():
        msg_acc[...] = jnp.zeros_like(msg_acc)

    if emb_resident:
        # Whole bf16 emb lives in VMEM (constant block index -> fetched once);
        # take the aligned K-tile of source features in-kernel.
        start = pl.multiple_of(k * tile_k, tile_k)
        emb_k = emb_ref[pl.ds(start, tile_k), :]
    else:
        emb_k = emb_ref[...]

    # Streamed K-tile of A @ emb: bf16 MXU operands, f32 accumulation.
    msg_acc[...] += jnp.dot(adj_ref[...], emb_k,
                            preferred_element_type=jnp.float32)

    @pl.when(k == pl.num_programs(1) - 1)
    def _():
        h = h_ref[...]                               # (TN, F) original f32 embeddings
        # mean-divide + clamp(degree, 1e-6)-divide folded into one multiply:
        #   neigh_in = (A @ emb) / (max(deg, 1) * max(deg, 1e-6))
        neigh_in = msg_acc[...] * scale_ref[...]

        # TODO(synk): nn.Dropout is eval-mode identity (no stochastic masking).
        self_h = _leaky_relu(
            jnp.dot(h, ws_ref[...], preferred_element_type=jnp.float32)
            + bs_ref[...], slope)
        neigh_h = _leaky_relu(
            jnp.dot(neigh_in, wn_ref[...], preferred_element_type=jnp.float32)
            + bn_ref[...], slope)
        agg = _leaky_relu(
            jnp.dot(self_h + neigh_h, wr_ref[...],
                    preferred_element_type=jnp.float32)
            + br_ref[...], slope)

        # Nodes outside disease/mirna keep their original (exact f32) embedding.
        out_ref[...] = jnp.where(mask_ref[...] > 0, agg, h)


def aggregator_forward(adj, emb, degree, node_mask, params, *,
                       slope=0.2, tile_n=256, tile_k=256,
                       emb_resident_budget_bytes=8 * 1024 * 1024):
    N, F = emb.shape
    tile_n = min(tile_n, N)
    tile_k = min(tile_k, N)
    assert N % tile_n == 0 and N % tile_k == 0, "N must tile evenly"

    deg = degree.reshape(N, 1).astype(jnp.float32)
    # one combined per-node scale instead of two broadcast divides in-kernel
    scale = 1.0 / (jnp.maximum(deg, 1.0) * jnp.maximum(deg, 1e-6))
    mask2 = node_mask.reshape(N, 1).astype(jnp.float32)

    adj_bf = adj.astype(jnp.bfloat16)    # 0/1 values: exact in bf16, halves A traffic
    emb_bf = emb.astype(jnp.bfloat16)    # MXU operand for A @ emb (f32 accumulate)
    emb_f32 = emb.astype(jnp.float32)    # self path + untouched-node passthrough

    # nn.Linear: y = x @ W^T + b  ->  pre-transpose weights to (in, out)
    ws_t = params["W_self_w"].T.astype(jnp.float32)
    wn_t = params["W_neigh_w"].T.astype(jnp.float32)
    wr_t = params["residual_w"].T.astype(jnp.float32)
    bs = params["W_self_b"].reshape(1, F).astype(jnp.float32)
    bn = params["W_neigh_b"].reshape(1, F).astype(jnp.float32)
    br = params["residual_b"].reshape(1, F).astype(jnp.float32)

    # Hold emb resident in VMEM if it (double-buffered) fits a small budget,
    # eliminating the per-dst-tile re-stream of emb K-tiles from HBM.
    emb_resident = (2 * N * F * 2) <= emb_resident_budget_bytes
    if emb_resident:
        emb_spec = pl.BlockSpec((N, F), lambda i, k: (0, 0))
    else:
        emb_spec = pl.BlockSpec((tile_k, F), lambda i, k: (k, 0))

    kernel = functools.partial(aggregator_kernel, slope=slope,
                               tile_k=tile_k, emb_resident=emb_resident)

    return pl.pallas_call(
        kernel,
        out_shape=jax.ShapeDtypeStruct((N, F), jnp.float32),
        grid_spec=pltpu.PrefetchScalarGridSpec(
            num_scalar_prefetch=0,
            grid=(N // tile_n, N // tile_k),          # (dst tiles, contraction tiles)
            in_specs=[
                pl.BlockSpec((tile_n, tile_k), lambda i, k: (i, k)),  # A tile (bf16)
                emb_spec,                                             # emb (bf16)
                pl.BlockSpec((tile_n, F), lambda i, k: (i, 0)),       # self emb tile (f32)
                pl.BlockSpec((tile_n, 1), lambda i, k: (i, 0)),       # per-node scale
                pl.BlockSpec((tile_n, 1), lambda i, k: (i, 0)),       # node-type mask
                pl.BlockSpec((F, F), lambda i, k: (0, 0)),            # W_self^T
                pl.BlockSpec((1, F), lambda i, k: (0, 0)),            # b_self
                pl.BlockSpec((F, F), lambda i, k: (0, 0)),            # W_neigh^T
                pl.BlockSpec((1, F), lambda i, k: (0, 0)),            # b_neigh
                pl.BlockSpec((F, F), lambda i, k: (0, 0)),            # W_res^T
                pl.BlockSpec((1, F), lambda i, k: (0, 0)),            # b_res
            ],
            out_specs=pl.BlockSpec((tile_n, F), lambda i, k: (i, 0)),
            scratch_shapes=[pltpu.VMEM((tile_n, F), jnp.float32)],    # msg_sum accumulator
        ),
        compiler_params=pltpu.CompilerParams(
            dimension_semantics=("parallel", "arbitrary"),
            vmem_limit_bytes=64 * 1024 * 1024,
        ),
    )(adj_bf, emb_bf, emb_f32, scale, mask2, ws_t, bs, wn_t, bn, wr_t, br)


def aggregator_reference(adj, emb, degree, node_mask, params, slope=0.2):
    """Pure-JAX f32 reference mirroring the PyTorch forward (eval mode)."""
    lrelu = lambda x: jnp.where(x >= 0, x, slope * x)
    deg = degree.reshape(-1, 1)
    update = (adj @ emb) / jnp.maximum(deg, 1.0)
    neigh_in = update / jnp.maximum(deg, 1e-6)
    self_h = lrelu(emb @ params["W_self_w"].T + params["W_self_b"])
    neigh_h = lrelu(neigh_in @ params["W_neigh_w"].T + params["W_neigh_b"])
    agg = lrelu((self_h + neigh_h) @ params["residual_w"].T + params["residual_b"])
    m = node_mask.reshape(-1, 1) > 0
    return jnp.where(m, agg, emb)


if __name__ == "__main__":
    N = 512           # number of graph nodes
    F = 128           # feature_size (lane-dense output)
    SLOPE = 0.2       # LeakyReLU negative slope
    TILE_N = 256
    TILE_K = 256

    key = jax.random.PRNGKey(0)
    k_adj, k_emb, k1, k2, k3, k4, k5, k6 = jax.random.split(key, 8)

    # deterministic synthetic graph: dense adjacency A[dst, src]
    adj = (jax.random.uniform(k_adj, (N, N)) < 0.3).astype(jnp.float32)
    adj = adj * (1.0 - jnp.eye(N, dtype=jnp.float32))           # no self loops
    degree = adj.sum(axis=1)                                    # in-degrees

    emb = jax.random.normal(k_emb, (N, F), dtype=jnp.float32)

    # node types: disease = [0..199], mirna = [256..455]; remaining nodes untouched
    disease_nodes = jnp.arange(0, 200)
    mirna_nodes = jnp.arange(256, 456)
    node_mask = jnp.zeros((N,), jnp.float32)
    node_mask = node_mask.at[disease_nodes].set(1.0).at[mirna_nodes].set(1.0)

    # deterministic Linear(feature_size, feature_size) parameters
    bound = 1.0 / jnp.sqrt(F)
    params = {
        "W_self_w":  jax.random.uniform(k1, (F, F), minval=-bound, maxval=bound),
        "W_self_b":  jax.random.uniform(k2, (F,),   minval=-bound, maxval=bound),
        "W_neigh_w": jax.random.uniform(k3, (F, F), minval=-bound, maxval=bound),
        "W_neigh_b": jax.random.uniform(k4, (F,),   minval=-bound, maxval=bound),
        "residual_w": jax.random.uniform(k5, (F, F), minval=-bound, maxval=bound),
        "residual_b": jax.random.uniform(k6, (F,),   minval=-bound, maxval=bound),
    }

    out = aggregator_forward(adj, emb, degree, node_mask, params,
                             slope=SLOPE, tile_n=TILE_N, tile_k=TILE_K)
    out = jax.block_until_ready(out)

    ref = aggregator_reference(adj, emb, degree, node_mask, params, slope=SLOPE)
    assert out.shape == (N, F)
    # tolerance loosened vs pure-f32: A/emb are fed to the MXU in bf16
    # (f32 accumulation).
    assert jnp.allclose(out, ref, atol=2e-2, rtol=2e-2), "kernel != reference"

    print("KERNEL_OK")
</pallas_src>

<mosaic_0001>
module attributes {stable_mosaic.version = 11 : i64} {
  func.func @aggregator_kernel(%arg0: i32, %arg1: i32, %arg2: memref<256x256xbf16, #tpu.memory_space<vmem>>, %arg3: memref<512x128xbf16, #tpu.memory_space<vmem>>, %arg4: memref<256x128xf32, #tpu.memory_space<vmem>>, %arg5: memref<256x1xf32, #tpu.memory_space<vmem>>, %arg6: memref<256x1xf32, #tpu.memory_space<vmem>>, %arg7: memref<128x128xf32, #tpu.memory_space<vmem>>, %arg8: memref<1x128xf32, #tpu.memory_space<vmem>>, %arg9: memref<128x128xf32, #tpu.memory_space<vmem>>, %arg10: memref<1x128xf32, #tpu.memory_space<vmem>>, %arg11: memref<128x128xf32, #tpu.memory_space<vmem>>, %arg12: memref<1x128xf32, #tpu.memory_space<vmem>>, %arg13: memref<256x128xf32, #tpu.memory_space<vmem>>, %arg14: memref<256x128xf32, #tpu.memory_space<vmem>>) attributes {dimension_semantics = [#tpu.dimension_semantics<parallel>, #tpu.dimension_semantics<arbitrary>], iteration_bounds = array<i64: 2, 2>, scalar_prefetch = 0 : i64, scratch_operands = 1 : i64, tpu.core_type = #tpu.core_type<tc>, window_params = [{transform_indices = @transform_0, window_bounds = array<i64: 256, 256>}, {pipeline_mode = #tpu.pipeline_mode<synchronous>, transform_indices = @transform_1, window_bounds = array<i64: 512, 128>}, {transform_indices = @transform_2, window_bounds = array<i64: 256, 128>}, {transform_indices = @transform_3, window_bounds = array<i64: 256, 1>}, {transform_indices = @transform_4, window_bounds = array<i64: 256, 1>}, {pipeline_mode = #tpu.pipeline_mode<synchronous>, transform_indices = @transform_5, window_bounds = array<i64: 128, 128>}, {pipeline_mode = #tpu.pipeline_mode<synchronous>, transform_indices = @transform_6, window_bounds = array<i64: 1, 128>}, {pipeline_mode = #tpu.pipeline_mode<synchronous>, transform_indices = @transform_7, window_bounds = array<i64: 128, 128>}, {pipeline_mode = #tpu.pipeline_mode<synchronous>, transform_indices = @transform_8, window_bounds = array<i64: 1, 128>}, {pipeline_mode = #tpu.pipeline_mode<synchronous>, transform_indices = @transform_9, window_bounds = array<i64: 128, 128>}, {pipeline_mode = #tpu.pipeline_mode<synchronous>, transform_indices = @transform_10, window_bounds = array<i64: 1, 128>}, {transform_indices = @transform_11, window_bounds = array<i64: 256, 128>}]} {
    %c0_i32 = arith.constant 0 : i32
    %0 = arith.cmpi eq, %arg1, %c0_i32 : i32
    %1 = arith.extui %0 : i1 to i32
    %c0_i32_0 = arith.constant 0 : i32
    %2 = arith.cmpi ne, %1, %c0_i32_0 : i32
    scf.if %2 {
      %cst_8 = arith.constant 0.000000e+00 : f32
      %15 = vector.broadcast %cst_8 : f32 to vector<256x128xf32>
      %c0_9 = arith.constant 0 : index
      %c0_10 = arith.constant 0 : index
      %16 = vector.load %arg14[%c0_9, %c0_10] : memref<256x128xf32, #tpu.memory_space<vmem>>, vector<256x128xf32>
      tpu.vector_store %arg14[%c0_9, %c0_10], %15 {strides = array<i32>} : memref<256x128xf32, #tpu.memory_space<vmem>>, vector<256x128xf32>,
    } else {
    }
    %c256_i32 = arith.constant 256 : i32
    %3 = arith.muli %arg1, %c256_i32 : i32
    %4 = tpu.assume_multiple %3, 256 : i32
    %5 = arith.index_cast %4 : i32 to index
    %c0 = arith.constant 0 : index
    %6 = vector.load %arg3[%5, %c0] : memref<512x128xbf16, #tpu.memory_space<vmem>>, vector<256x128xbf16>
    %c0_1 = arith.constant 0 : index
    %c0_2 = arith.constant 0 : index
    %7 = vector.load %arg14[%c0_1, %c0_2] : memref<256x128xf32, #tpu.memory_space<vmem>>, vector<256x128xf32>
    %c0_3 = arith.constant 0 : index
    %c0_4 = arith.constant 0 : index
    %8 = vector.load %arg2[%c0_3, %c0_4] : memref<256x256xbf16, #tpu.memory_space<vmem>>, vector<256x256xbf16>
    %cst = arith.constant dense<0.000000e+00> : vector<256x128xf32>
    %9 = tpu.matmul %8, %6, %cst {dimension_numbers = #tpu.dot_dimension_numbers<[1], [0], [0], [1], [0, 0, 1, 1], [], []>} : vector<256x256xbf16>, vector<256x128xbf16>, vector<256x128xf32> -> vector<256x128xf32>
    %10 = arith.addf %7, %9 : vector<256x128xf32>
    %c0_5 = arith.constant 0 : index
    %c0_6 = arith.constant 0 : index
    %11 = vector.load %arg14[%c0_5, %c0_6] : memref<256x128xf32, #tpu.memory_space<vmem>>, vector<256x128xf32>
    tpu.vector_store %arg14[%c0_5, %c0_6], %10 {strides = array<i32>} : memref<256x128xf32, #tpu.memory_space<vmem>>, vector<256x128xf32>,
    %c1_i32 = arith.constant 1 : i32
    %12 = arith.cmpi eq, %arg1, %c1_i32 : i32
    %13 = arith.extui %12 : i1 to i32
    %c0_i32_7 = arith.constant 0 : i32
    %14 = arith.cmpi ne, %13, %c0_i32_7 : i32
    scf.if %14 {
      %c0_8 = arith.constant 0 : index
      %c0_9 = arith.constant 0 : index
      %15 = vector.load %arg4[%c0_8, %c0_9] : memref<256x128xf32, #tpu.memory_space<vmem>>, vector<256x128xf32>
      %c0_10 = arith.constant 0 : index
      %c0_11 = arith.constant 0 : index
      %16 = vector.load %arg14[%c0_10, %c0_11] : memref<256x128xf32, #tpu.memory_space<vmem>>, vector<256x128xf32>
      %c0_12 = arith.constant 0 : index
      %c0_13 = arith.constant 0 : index
      %17 = vector.load %arg5[%c0_12, %c0_13] : memref<256x1xf32, #tpu.memory_space<vmem>>, vector<256x1xf32>
      %18 = vector.broadcast %17 : vector<256x1xf32> to vector<256x128xf32>
      %19 = arith.mulf %16, %18 : vector<256x128xf32>
      %c0_14 = arith.constant 0 : index
      %c0_15 = arith.constant 0 : index
      %20 = vector.load %arg7[%c0_14, %c0_15] : memref<128x128xf32, #tpu.memory_space<vmem>>, vector<128x128xf32>
      %cst_16 = arith.constant dense<0.000000e+00> : vector<256x128xf32>
      %21 = tpu.matmul %15, %20, %cst_16 {dimension_numbers = #tpu.dot_dimension_numbers<[1], [0], [0], [1], [0, 0, 1, 1], [], []>} : vector<256x128xf32>, vector<128x128xf32>, vector<256x128xf32> -> vector<256x128xf32>
      %c0_17 = arith.constant 0 : index
      %c0_18 = arith.constant 0 : index
      %22 = vector.load %arg8[%c0_17, %c0_18] : memref<1x128xf32, #tpu.memory_space<vmem>>, vector<1x128xf32>
      %23 = vector.broadcast %22 : vector<1x128xf32> to vector<256x128xf32>
      %24 = arith.addf %21, %23 : vector<256x128xf32>
      %cst_19 = arith.constant 0.000000e+00 : f32
      %25 = vector.broadcast %cst_19 : f32 to vector<256x128xf32>
      %26 = arith.cmpf oge, %24, %25 : vector<256x128xf32>
      %cst_20 = arith.constant 2.000000e-01 : f32
      %27 = vector.broadcast %cst_20 : f32 to vector<256x128xf32>
      %28 = arith.mulf %27, %24 : vector<256x128xf32>
      %29 = arith.select %26, %24, %28 : vector<256x128xi1>, vector<256x128xf32>
      %c0_21 = arith.constant 0 : index
      %c0_22 = arith.constant 0 : index
      %30 = vector.load %arg9[%c0_21, %c0_22] : memref<128x128xf32, #tpu.memory_space<vmem>>, vector<128x128xf32>
      %cst_23 = arith.constant dense<0.000000e+00> : vector<256x128xf32>
      %31 = tpu.matmul %19, %30, %cst_23 {dimension_numbers = #tpu.dot_dimension_numbers<[1], [0], [0], [1], [0, 0, 1, 1], [], []>} : vector<256x128xf32>, vector<128x128xf32>, vector<256x128xf32> -> vector<256x128xf32>
      %c0_24 = arith.constant 0 : index
      %c0_25 = arith.constant 0 : index
      %32 = vector.load %arg10[%c0_24, %c0_25] : memref<1x128xf32, #tpu.memory_space<vmem>>, vector<1x128xf32>
      %33 = vector.broadcast %32 : vector<1x128xf32> to vector<256x128xf32>
      %34 = arith.addf %31, %33 : vector<256x128xf32>
      %cst_26 = arith.constant 0.000000e+00 : f32
      %35 = vector.broadcast %cst_26 : f32 to vector<256x128xf32>
      %36 = arith.cmpf oge, %34, %35 : vector<256x128xf32>
      %cst_27 = arith.constant 2.000000e-01 : f32
      %37 = vector.broadcast %cst_27 : f32 to vector<256x128xf32>
      %38 = arith.mulf %37, %34 : vector<256x128xf32>
      %39 = arith.select %36, %34, %38 : vector<256x128xi1>, vector<256x128xf32>
      %40 = arith.addf %29, %39 : vector<256x128xf32>
      %c0_28 = arith.constant 0 : index
      %c0_29 = arith.constant 0 : index
      %41 = vector.load %arg11[%c0_28, %c0_29] : memref<128x128xf32, #tpu.memory_space<vmem>>, vector<128x128xf32>
      %cst_30 = arith.constant dense<0.000000e+00> : vector<256x128xf32>
      %42 = tpu.matmul %40, %41, %cst_30 {dimension_numbers = #tpu.dot_dimension_numbers<[1], [0], [0], [1], [0, 0, 1, 1], [], []>} : vector<256x128xf32>, vector<128x128xf32>, vector<256x128xf32> -> vector<256x128xf32>
      %c0_31 = arith.constant 0 : index
      %c0_32 = arith.constant 0 : index
      %43 = vector.load %arg12[%c0_31, %c0_32] : memref<1x128xf32, #tpu.memory_space<vmem>>, vector<1x128xf32>
      %44 = vector.broadcast %43 : vector<1x128xf32> to vector<256x128xf32>
      %45 = arith.addf %42, %44 : vector<256x128xf32>
      %cst_33 = arith.constant 0.000000e+00 : f32
      %46 = vector.broadcast %cst_33 : f32 to vector<256x128xf32>
      %47 = arith.cmpf oge, %45, %46 : vector<256x128xf32>
      %cst_34 = arith.constant 2.000000e-01 : f32
      %48 = vector.broadcast %cst_34 : f32 to vector<256x128xf32>
      %49 = arith.mulf %48, %45 : vector<256x128xf32>
      %50 = arith.select %47, %45, %49 : vector<256x128xi1>, vector<256x128xf32>
      %c0_35 = arith.constant 0 : index
      %c0_36 = arith.constant 0 : index
      %51 = vector.load %arg6[%c0_35, %c0_36] : memref<256x1xf32, #tpu.memory_space<vmem>>, vector<256x1xf32>
      %cst_37 = arith.constant 0.000000e+00 : f32
      %52 = vector.broadcast %cst_37 : f32 to vector<256x1xf32>
      %53 = arith.cmpf ogt, %51, %52 : vector<256x1xf32>
      %54 = vector.shape_cast %53 : vector<256x1xi1> to vector<256x1xi1>
      %55 = vector.broadcast %54 : vector<256x1xi1> to vector<256x128xi1>
      %56 = arith.select %55, %50, %15 : vector<256x128xi1>, vector<256x128xf32>
      %c0_38 = arith.constant 0 : index
      %c0_39 = arith.constant 0 : index
      %57 = vector.load %arg13[%c0_38, %c0_39] : memref<256x128xf32, #tpu.memory_space<vmem>>, vector<256x128xf32>
      tpu.vector_store %arg13[%c0_38, %c0_39], %56 {strides = array<i32>} : memref<256x128xf32, #tpu.memory_space<vmem>>, vector<256x128xf32>,
    } else {
    }
    return
  }
  func.func @transform_0(%arg0: i32, %arg1: i32) -> (i32, i32) {
    %c0_i32 = arith.constant 0 : i32
    return %arg0, %arg1 : i32, i32
  }
  func.func @transform_1(%arg0: i32, %arg1: i32) -> (i32, i32) {
    %c0_i32 = arith.constant 0 : i32
    %c0_i32_0 = arith.constant 0 : i32
    %c0_i32_1 = arith.constant 0 : i32
    return %c0_i32, %c0_i32_0 : i32, i32
  }
  func.func @transform_2(%arg0: i32, %arg1: i32) -> (i32, i32) {
    %c0_i32 = arith.constant 0 : i32
    %c0_i32_0 = arith.constant 0 : i32
    return %arg0, %c0_i32 : i32, i32
  }
  func.func @transform_3(%arg0: i32, %arg1: i32) -> (i32, i32) {
    %c0_i32 = arith.constant 0 : i32
    %c0_i32_0 = arith.constant 0 : i32
    return %arg0, %c0_i32 : i32, i32
  }
  func.func @transform_4(%arg0: i32, %arg1: i32) -> (i32, i32) {
    %c0_i32 = arith.constant 0 : i32
    %c0_i32_0 = arith.constant 0 : i32
    return %arg0, %c0_i32 : i32, i32
  }
  func.func @transform_5(%arg0: i32, %arg1: i32) -> (i32, i32) {
    %c0_i32 = arith.constant 0 : i32
    %c0_i32_0 = arith.constant 0 : i32
    %c0_i32_1 = arith.constant 0 : i32
    return %c0_i32, %c0_i32_0 : i32, i32
  }
  func.func @transform_6(%arg0: i32, %arg1: i32) -> (i32, i32) {
    %c0_i32 = arith.constant 0 : i32
    %c0_i32_0 = arith.constant 0 : i32
    %c0_i32_1 = arith.constant 0 : i32
    return %c0_i32, %c0_i32_0 : i32, i32
  }
  func.func @transform_7(%arg0: i32, %arg1: i32) -> (i32, i32) {
    %c0_i32 = arith.constant 0 : i32
    %c0_i32_0 = arith.constant 0 : i32
    %c0_i32_1 = arith.constant 0 : i32
    return %c0_i32, %c0_i32_0 : i32, i32
  }
  func.func @transform_8(%arg0: i32, %arg1: i32) -> (i32, i32) {
    %c0_i32 = arith.constant 0 : i32
    %c0_i32_0 = arith.constant 0 : i32
    %c0_i32_1 = arith.constant 0 : i32
    return %c0_i32, %c0_i32_0 : i32, i32
  }
  func.func @transform_9(%arg0: i32, %arg1: i32) -> (i32, i32) {
    %c0_i32 = arith.constant 0 : i32
    %c0_i32_0 = arith.constant 0 : i32
    %c0_i32_1 = arith.constant 0 : i32
    return %c0_i32, %c0_i32_0 : i32, i32
  }
  func.func @transform_10(%arg0: i32, %arg1: i32) -> (i32, i32) {
    %c0_i32 = arith.constant 0 : i32
    %c0_i32_0 = arith.constant 0 : i32
    %c0_i32_1 = arith.constant 0 : i32
    return %c0_i32, %c0_i32_0 : i32, i32
  }
  func.func @transform_11(%arg0: i32, %arg1: i32) -> (i32, i32) {
    %c0_i32 = arith.constant 0 : i32
    %c0_i32_0 = arith.constant 0 : i32
    return %arg0, %c0_i32 : i32, i32
  }
}

</mosaic_0001>

<bundles_post_ra>
// kernel: tpu_custom_call.1
= control target key start
LH: loop header
LB: loop body
LE: loop exit
PB: predicated region body
PF: predicated region fallthrough
CT: control target
= control target key end

     0   :  { %s5814_s0 = inlined_call_operand.hbm [shape: bf16[512,512], index: 0, kind: input, shape index: {}]   ;;  %s5815_s1 = inlined_call_operand.hbm [shape: bf16[512,128], index: 1, kind: input, shape index: {}]   ;;  %s5816_s2 = inlined_call_operand.hbm [shape: f32[512,128], index: 2, kind: input, shape index: {}]   ;;  %s5817_s3 = inlined_call_operand.hbm [shape: f32[512,1], index: 3, kind: input, shape index: {}]   ;;  %s5818_s4 = inlined_call_operand.hbm [shape: f32[512,1], index: 4, kind: input, shape index: {}]   ;;  %s5819_s5 = inlined_call_operand.hbm [shape: f32[128,128], index: 5, kind: input, shape index: {}]   ;;  %s5820_s6 = inlined_call_operand.hbm [shape: f32[1,128], index: 6, kind: input, shape index: {}]   ;;  %s5821_s7 = inlined_call_operand.hbm [shape: f32[128,128], index: 7, kind: input, shape index: {}]   ;;  %s5822_s8 = inlined_call_operand.hbm [shape: f32[1,128], index: 8, kind: input, shape index: {}]   ;;  %s5823_s9 = inlined_call_operand.hbm [shape: f32[128,128], index: 9, kind: input, shape index: {}]   ;;  %s5824_s10 = inlined_call_operand.hbm [shape: f32[1,128], index: 10, kind: input, shape index: {}]   ;;  %s5825_s11 = inlined_call_operand.hbm [shape: f32[512,128], index: 11, kind: output, shape index: {}]  }
   0x1   :  { %5868 = sst [smem:[#allocation47_spill]] %s5814_s0 }
   0x2   :  { %5869 = sst [smem:[#allocation48_spill]] %s5816_s2 }
   0x3   :  { %5870 = sst [smem:[#allocation49_spill]] %s5818_s4 }
   0x4   :  { %5871 = sst [smem:[#allocation50_spill]] %s5823_s9 }
   0x5   :  { %5872 = sst [smem:[#allocation51_spill]] %s5824_s10 }
   0x6   :  { %5873 = sst [smem:[#allocation52_spill]] %s5825_s11 }
   0x7   :  { %16 = vsyncpa [#allocation4], 0 }
   0x8   :  { %18 = vsyncpa [#allocation4 + $0x1], 0 }
   0x9   :  { %19 = vsyncpa [#allocation7], 0 }
   0xa   :  { %20 = vsyncpa [#allocation13], 0 }
   0xb   :  { %21 = vsyncpa [#allocation16], 0 }
   0xc   :  { %22 = vsyncpa [#allocation19], 0 }
   0xd   :  { %23 = vsyncpa [#allocation5], 0 }
   0xe   :  { %25 = vsyncpa [#allocation5 + $0x1], 0  ;;  %s4695_s17 = smov 0   ;;  %s4697_s18 = smov 0  }
   0xf   :  { %s4699_s19 = smov 0   ;;  %s4701_s20 = smov 0  }
  0x10   :  { %s4703_s21 = smov 0   ;;  %s4705_s22 = smov 0  }
  0x11   :  { %s4707_s23 = smov 0   ;;  %s4709_s24 = smov 0  }
  0x12   :  { %s4711_s25 = smov 0   ;;  %s4713_s26 = smov 0  }
  0x13   :  { %s4715_s27 = smov 0  }
  0x14 LB: > { %5874 = sst [smem:[#allocation29_spill]] %s4572_s17  ;;  %s4749_s28 = sadd.s32 4294967295, %s4612_s27   ;;  %s4612_s27 = sphi %s4715_s27, %s31_s27   ;;  %s4608_s26 = sphi %s4713_s26, %s5959_s26   ;;  %s4604_s25 = sphi %s4711_s25, %s5958_s25   ;;  %s4600_s24 = sphi %s4709_s24, %s5957_s24   ;;  %s4596_s23 = sphi %s4707_s23, %s5956_s23   ;;  %s4592_s22 = sphi %s4705_s22, %s5955_s22   ;;  %s4588_s21 = sphi %s4703_s21, %s5954_s21   ;;  %s4584_s20 = sphi %s4701_s20, %s5953_s20   ;;  %s4580_s19 = sphi %s4699_s19, %s5952_s19   ;;  %s4576_s18 = sphi %s4697_s18, %s5951_s18   ;;  %s4572_s17 = sphi %s4695_s17, %s5950_s17  }
  0x15   : > { %5875 = sst [smem:[#allocation30_spill]] %s4576_s18  ;;  %s40_s29 = sadd.s32 1, %s4604_s25 }
  0x16   : > { %5876 = sst [smem:[#allocation31_spill]] %s4580_s19  ;;  %p41_p0 = scmp.ge.s32.totalorder %s40_s29, 2 }
  0x17   : > { %5877 = sst [smem:[#allocation32_spill]] %s4588_s21  ;;  %s43_s30 = sadd.s32 1, %s4608_s26 }
  0x18   : > { %5878 = sst [smem:[#allocation33_spill]] %s4592_s22  ;;  %s52_s12 = sadd.s32 1, %s4592_s22 }
  0x19   : > { %5879 = sst [smem:[#allocation34_spill]] %s4596_s23  ;;  %p59_p1 = scmp.ne.s32.totalorder %s4592_s22, %s4588_s21 }
  0x1a   : > { %5880 = sst [smem:[#allocation35_spill]] %s4600_s24  ;;  %s5961_s29 = smov (%p41_p0, %s40_s29), 0 }
  0x1b   : > { %5881 = sst [smem:[#allocation36_spill]] %s4604_s25  ;;  %s5963_s30 = smov (!%p41_p0, %s43_s30), %s4608_s26 }
  0x1c   : > { %5882 = sst [smem:[#allocation37_spill]] %s4608_s26  ;;  %s48_s13 = ssub.s32 %s4604_s25, %s5961_s29 }
  0x1d   : > { %5883 = sst [smem:[#allocation38_spill]] %s4612_s27  ;;  %p5838_p2 = scmp.eq.s32.totalorder %s4612_s27, 0 }
  0x1e   : > { %5884 = sst [smem:[#allocation39_spill]] %s5961_s29  ;;  %p45_p3 = scmp.ge.s32.totalorder %s5963_s30, 2 }
  0x1f   : > { %p65_p4 = scmp.ne.s32.totalorder %s4588_s21, %s4584_s20  ;;  %p4765_p5 = por %p5838_p2, %p59_p1 }
  0x20   : > { %p5837_p6 = scmp.eq.s32.totalorder %s4749_s28, 0  ;;  %s5965_s30 = smov (%p45_p3, %s5963_s30), 0 }
  0x21   : > { %5886 = sst [smem:[#allocation40_spill]] %s5965_s30  ;;  %s4780_s16 = ssub.s32 %s4608_s26, %s5965_s30 }
  0x22   : > { %p4774_p7 = por %p5837_p6, %p65_p4  ;;  %s49_s20 = sor.u32 %s48_s13, %s4780_s16 }
  0x23   : > { %p50_p9 = scmp.eq.s32.totalorder %s49_s20, 0  ;;  %p5836_p10 = scmp.lt.s32.totalorder %s4612_s27, 4 }
  0x24   : > { %s5887_s15 = scalar_select %p4774_p7, 1, 0 }
  0x25   : > { %s4786_s29 = scalar_select %p50_p9, %s4592_s22, %s52_s12  }
  0x26   : > { %5888 = sst [smem:[#allocation41_spill]] %s5887_s15  ;;  %s425_s11 = sand.u32 1, %s4612_s27  }
  0x27   : > { %5889 = sst [smem:[#allocation42_spill]] %s4786_s29  ;;  %s427_s24 = sand.u32 1, %s4592_s22  }
  0x28   : > { %s3139_s23 = sshll.u32 %s427_s24, 8  ;;  %s3141_s21 = sshll.u32 %s4604_s25, 1 }
  0x29   : > { %s3226_s4 = sshll.u32 %s4608_s26, 7  ;;  %s429_s10 = scalar_lea.vmem [#allocation3], %s3139_s23 }
  0x2a   : > { %s439_s9 = sshll.u32 %s429_s10, 4  ;;  %s436_s15 = sadd.s32 %s3226_s4, %s3141_s21  ;;  %s4792_s9 = int_to_ptr.vmem [resolvable:$true] %s439_s9 }
  0x2b   : > { %s3143_s30 = sshll.u32 %s436_s15, 6  ;;  %p4798_p11 = pnand %p5836_p10, %p4765_p5 }
  0x2c   : > { %s5891_s0 = sld [smem:[#allocation47_spill]]  ;;  %s4807_s4 = scalar_lea.sflag [#allocation4], %s425_s11 }
  0x2d   : > { %p4152_p13 = pneg %p4798_p11 }
  0x32   : > { %s4805_s24 = scalar_lea.hbm %s5891_s0, %s3143_s30  ;;  %s4155_s14 = scalar_lea.hbm %s5891_s0, 16384 }
  0x33   : > { %s4150_s10 = scalar_lea.hbm %s4805_s24, 4096  ;;  %p4156_p3 = scmp.lt.u32.totalorder %s4805_s24, %s5891_s0 }
  0x34   : > { %p4151_p12 = scmp.ne.s32.totalorder %s4805_s24, %s4150_s10  ;;  %p4157_p4 = scmp.lt.u32.totalorder %s4155_s14, %s4150_s10 }
  0x35   : > { %p4159_p9 = scmp.lt.u32.totalorder %s4150_s10, %s4805_s24 }
  0x36   : > { %p4153_p0 = pnand %p4152_p13, %p4151_p12  ;;  %p4158_p5 = por %p4157_p4, %p4156_p3 }
  0x38   : > { %p4154_p1 = pneg %p4153_p0  ;;  %p4160_p10 = por %p4159_p9, %p4158_p5 }
  0x3a   : > { %p4161_p6 = pnand %p4160_p10, %p4154_p1 }
  0x3c   : > { %4164 = shalt.err (!%p4161_p6)
}
  0x3d   : > { %s4165_s11 = scalar_lea.vmem %s4792_s9, 4096  ;;  %s4614_s20 = smov [#allocation3]  }
  0x3e   : > { %p4166_p12 = scmp.ne.s32.totalorder %s4792_s9, %s4165_s11  ;;  %s4170_s12 = sshll.u32 %s4614_s20, 4  ;;  %s4171_s12 = int_to_ptr.vmem [resolvable:$false] %s4170_s12 }
  0x3f   : > { %s4172_s21 = scalar_lea.vmem %s4171_s12, 8192  ;;  %p4173_p8 = scmp.lt.s32.totalorder %s4792_s9, %s4171_s12 }
  0x40   : > { %p4168_p0 = pnand %p4166_p12, %p4152_p13  ;;  %p4174_p3 = scmp.lt.s32.totalorder %s4172_s21, %s4165_s11 }
  0x42   : > { %p4169_p2 = pneg %p4168_p0  ;;  %p4175_p4 = por %p4174_p3, %p4173_p8 }
  0x44   : > { %p4176_p5 = pnand %p4175_p4, %p4169_p2 }
  0x46   : > { %4179 = shalt.err (!%p4176_p5)
}
  0x47   : > { %s4615_s10 = smov 256   ;;  %s5839_s23 = smov 128  }
  0x48   : > { %s5841_s14 = smov 8   ;;  %s3129_s30 = sadd.s32 4294967294, %s4612_s27  }
  0x49   : > { %3918 = dma.hbm_to_vmem [thread:$0]  (!%p4798_p11), %s4805_s24, 4096, %s4792_s9, %s4807_s4, %s4615_s10, %s5839_s23, %s5841_s14  }
  0x4a   : > { %s99_s15 = sadd.s32 1, %s4580_s19  ;;  %p106_p2 = scmp.ne.s32.totalorder %s4580_s19, %s4576_s18 }
  0x4b   : > { %p5892_p6 = scmp.eq.s32.totalorder %s4780_s16, 0  ;;  %p5894_p8 = scmp.eq.s32.totalorder %s4612_s27, 0 }
  0x4c   : > { %p112_p13 = scmp.ne.s32.totalorder %s4576_s18, %s4572_s17  ;;  %p314_p1 = scmp.eq.s32.totalorder %s4749_s28, 3 }
  0x4d   : > { %s4844_s11 = scalar_select %p5892_p6, %s4580_s19, %s99_s15  }
  0x4e   : > { %p4848_p10 = por %p106_p2, %p5894_p8  ;;  %p320_p9 = scmp.eq.s32.totalorder %s3129_s30, 3 }
  0x4f   : > { %5893 = sst [smem:[#allocation43_spill]] %s4844_s11  ;;  %p5896_p12 = scmp.eq.s32.totalorder %s4749_s28, 0 }
  0x50   : > { %s451_s9 = sand.u32 1, %s4580_s19   ;;  %p4862_p11 = por %p314_p1, %p106_p2 }
  0x51   : > { %p4857_p0 = por %p112_p13, %p5896_p12  ;;  %p4866_p3 = por %p320_p9, %p112_p13 }
  0x52   : > { %s5899_s24 = scalar_select %p4862_p11, 1, 0 }
  0x53   : > { %s5897_s13 = scalar_select %p4857_p0, 1, 0 }
  0x54   : > { %5900 = sst [smem:[#allocation45_spill]] %s5899_s24  ;;  %s4870_s12 = sshll.u32 %s451_s9, 8 }
  0x55   : > { %5898 = sst [smem:[#allocation44_spill]] %s5897_s13  ;;  %s4873_s21 = sshll.u32 %s4608_s26, 12 }
  0x56   : > { %s5901_s16 = scalar_select %p4866_p3, 1, 0 }
  0x57   : > { %s5903_s2 = sld [smem:[#allocation48_spill]]  ;;  %s453_s23 = scalar_lea.vmem [#allocation8], %s4870_s12 }
  0x58   : > { %5902 = sst [smem:[#allocation46_spill]] %s5901_s16  ;;  %s460_s14 = sshll.u32 %s453_s23, 4  ;;  %s4890_s14 = int_to_ptr.vmem [resolvable:$true] %s460_s14 }
  0x59   : > { %p5904_p4 = scmp.lt.s32.totalorder %s4612_s27, 4 }
  0x5b   : > { %p4886_p5 = pnand %p5904_p4, %p4848_p10 }
  0x5d   : > { %s4879_s15 = scalar_lea.hbm %s5903_s2, %s4873_s21  ;;  %p4896_p6 = pneg %p4886_p5 }
  0x5e   : > { %s5905_s9 = scalar_select %p4886_p5, 1, 0 }
  0x5f   : > { %s4180_s0 = scalar_lea.hbm %s4879_s15, 4096  ;;  %s4185_s30 = scalar_lea.hbm %s5903_s2, 8192 }
  0x60   : > { %p4181_p2 = scmp.ne.s32.totalorder %s4879_s15, %s4180_s0  ;;  %p4186_p10 = scmp.lt.u32.totalorder %s4879_s15, %s5903_s2 }
  0x61   : > { %s5906_s10 = scalar_select %p4896_p6, 1, 0 }
  0x62   : > { %p4183_p8 = pnand %p4896_p6, %p4181_p2  ;;  %p4187_p1 = scmp.lt.u32.totalorder %s4185_s30, %s4180_s0 }
  0x63   : > { %p4189_p12 = scmp.lt.u32.totalorder %s4180_s0, %s4879_s15 }
  0x64   : > { %p4184_p13 = pneg %p4183_p8  ;;  %p4188_p9 = por %p4187_p1, %p4186_p10 }
  0x66   : > { %p4190_p4 = por %p4189_p12, %p4188_p9 }
  0x68   : > { %p4191_p3 = pnand %p4190_p4, %p4184_p13 }
  0x6a   : > { %4194 = shalt.err (!%p4191_p3)
}
  0x6b   : > { %s4195_s29 = scalar_lea.vmem %s4890_s14, 4096  ;;  %s4618_s23 = smov [#allocation8]  }
  0x6c   : > { %p4196_p2 = scmp.ne.s32.totalorder %s4890_s14, %s4195_s29  ;;  %s4200_s20 = sshll.u32 %s4618_s23, 4  ;;  %s4201_s20 = int_to_ptr.vmem [resolvable:$false] %s4200_s20 }
  0x6d   : > { %s4202_s25 = scalar_lea.vmem %s4201_s20, 8192  ;;  %p4203_p0 = scmp.lt.s32.totalorder %s4890_s14, %s4201_s20 }
  0x6e   : > { %p4198_p8 = pnand %p4196_p2, %p4896_p6  ;;  %p4204_p7 = scmp.lt.s32.totalorder %s4202_s25, %s4195_s29 }
  0x70   : > { %p4199_p11 = pneg %p4198_p8  ;;  %p4205_p10 = por %p4204_p7, %p4203_p0 }
  0x72   : > { %p4206_p1 = pnand %p4205_p10, %p4199_p11 }
  0x74   : > { %4209 = shalt.err (!%p4206_p1)
}
  0x75   : > { %s5907_s0 = smov 8   ;;  %s5908_s26 = smov 128  }
  0x76   : > { %3921 = dma.hbm_to_vmem [thread:$0]  (!%p4886_p5), %s4879_s15, 4096, %s4890_s14, %s4807_s4, %s5908_s26, %s5908_s26, %s5907_s0  }
  0x77   : > { %p3130_p3 = scmp.ge.s32.totalorder %s4612_s27, 1  ;;  %p327_p13 = scmp.lt.s32.totalorder %s4612_s27, 5 }
  0x78   : > { %s4619_s29 = smov [#allocation6]   ;;  %s4620_s20 = smov [#allocation12]  }
  0x79   : > { %p4925_p9 = pnand %p3130_p3, %p327_p13  ;;  %s339_s23 = sshll.u32 %s4619_s29, 4  ;;  %s4929_s23 = int_to_ptr.vmem [resolvable:$true] %s339_s23 }
  0x7a   : > { %s366_s25 = sshll.u32 %s4620_s20, 4  ;;  %p5910_p0 = scmp.eq.s32.totalorder %s4749_s28, 0  ;;  %s4939_s25 = int_to_ptr.vmem [resolvable:$true] %s366_s25 }
  0x7b   : > { %s5909_s30 = scalar_select %p4925_p9, 1, 0 }
  0x7c   : > { %p3893_p7 = pneg %p4925_p9  ;;  %s4621_s14 = smov [#allocation15]  }
  0x7d   : > { %s390_s15 = sshll.u32 %s4621_s14, 4  ;;  %s4210_s11 = scalar_lea.hbm %s5815_s1, 4096  ;;  %s4941_s15 = int_to_ptr.vmem [resolvable:$true] %s390_s15 }
  0x7e   : > { %p4935_p11 = pnand %p3893_p7, %p5910_p0  ;;  %p4211_p12 = scmp.ne.s32.totalorder %s5815_s1, %s4210_s11 }
  0x7f   : > { %p4217_p10 = scmp.lt.u32.totalorder %s4210_s11, %s5815_s1 }
  0x80   : > { %s5911_s2 = scalar_select %p4935_p11, 1, 0 }
  0x81   : > { %p4951_p4 = pneg %p4935_p11 }
  0x83   : > { %s5912_s20 = scalar_select %p4951_p4, 1, 0 }
  0x84   : > { %p4213_p2 = pnand %p4951_p4, %p4211_p12 }
  0x86   : > { %p4214_p8 = pneg %p4213_p2 }
  0x88   : > { %p4219_p1 = pnand %p4217_p10, %p4214_p8 }
  0x8a   : > { %4222 = shalt.err (!%p4219_p1)
}
  0x8b   : > { %s4223_s19 = scalar_lea.vmem %s4929_s23, 4096  ;;  %p4231_p0 = scmp.lt.s32.totalorder %s4929_s23, %s4929_s23 }
  0x8c   : > { %p4224_p3 = scmp.ne.s32.totalorder %s4929_s23, %s4223_s19  ;;  %p4232_p9 = scmp.lt.s32.totalorder %s4223_s19, %s4223_s19 }
  0x8e   : > { %p4226_p13 = pnand %p4224_p3, %p4951_p4  ;;  %p4233_p12 = por %p4232_p9, %p4231_p0 }
  0x90   : > { %p4227_p7 = pneg %p4226_p13 }
  0x92   : > { %p4234_p2 = pnand %p4233_p12, %p4227_p7 }
  0x94   : > { %4237 = shalt.err (!%p4234_p2)
}
  0x95   : > { %s4622_s22 = smov 64   ;;  %s4623_s17 = smov 4  }
  0x96   : > { %3896 = dma.hbm_to_vmem [thread:$0]  (!%p4935_p11), %s5815_s1, 4096, %s4929_s23, [#allocation7], %s4622_s22, %s4622_s22, %s4623_s17  }
  0x97   : > { %s4238_s27 = scalar_lea.hbm %s5820_s6, 16 }
  0x98   : > { %p4239_p9 = scmp.ne.s32.totalorder %s5820_s6, %s4238_s27  ;;  %p4245_p1 = scmp.lt.u32.totalorder %s4238_s27, %s5820_s6 }
  0x9a   : > { %p4241_p8 = pnand %p4239_p9, %p4951_p4 }
  0x9c   : > { %p4242_p10 = pneg %p4241_p8 }
  0x9e   : > { %p4247_p3 = pnand %p4245_p1, %p4242_p10 }
  0xa0   : > { %4250 = shalt.err (!%p4247_p3)
}
  0xa1   : > { %s4251_s23 = scalar_lea.vmem %s4939_s25, 16  ;;  %s4258_s13 = scalar_lea.vmem %s4939_s25, 32 }
  0xa2   : > { %p4252_p13 = scmp.ne.s32.totalorder %s4939_s25, %s4251_s23  ;;  %p4259_p12 = scmp.lt.s32.totalorder %s4939_s25, %s4939_s25 }
  0xa3   : > { %p4260_p2 = scmp.lt.s32.totalorder %s4258_s13, %s4251_s23 }
  0xa4   : > { %p4254_p7 = pnand %p4252_p13, %p4951_p4 }
  0xa5   : > { %p4261_p9 = por %p4260_p2, %p4259_p12 }
  0xa6   : > { %p4255_p0 = pneg %p4254_p7 }
  0xa8   : > { %p4262_p8 = pnand %p4261_p9, %p4255_p0 }
  0xaa   : > { %4265 = shalt.err (!%p4262_p8)
}
  0xab   : > { %3902 = dma.hbm_to_vmem [thread:$0]  (!%p4935_p11), %s5820_s6, 16, %s4939_s25, [#allocation13]  }
  0xac   : > { %s4266_s17 = scalar_lea.hbm %s5822_s8, 16 }
  0xad   : > { %p4267_p10 = scmp.ne.s32.totalorder %s5822_s8, %s4266_s17  ;;  %p4273_p13 = scmp.lt.u32.totalorder %s4266_s17, %s5822_s8 }
  0xaf   : > { %p4269_p1 = pnand %p4267_p10, %p4951_p4 }
  0xb1   : > { %p4270_p3 = pneg %p4269_p1 }
  0xb3   : > { %p4275_p7 = pnand %p4273_p13, %p4270_p3 }
  0xb5   : > { %4278 = shalt.err (!%p4275_p7)
}
  0xb6   : > { %s4279_s25 = scalar_lea.vmem %s4941_s15, 16  ;;  %s4286_s19 = scalar_lea.vmem %s4941_s15, 32 }
  0xb7   : > { %p4280_p0 = scmp.ne.s32.totalorder %s4941_s15, %s4279_s25  ;;  %p4287_p9 = scmp.lt.s32.totalorder %s4941_s15, %s4941_s15 }
  0xb8   : > { %p4288_p8 = scmp.lt.s32.totalorder %s4286_s19, %s4279_s25 }
  0xb9   : > { %p4282_p12 = pnand %p4280_p0, %p4951_p4 }
  0xba   : > { %p4289_p10 = por %p4288_p8, %p4287_p9 }
  0xbb   : > { %p4283_p2 = pneg %p4282_p12 }
  0xbd   : > { %p4290_p1 = pnand %p4289_p10, %p4283_p2 }
  0xbf   : > { %4293 = shalt.err (!%p4290_p1)
}
  0xc0   : > { %3908 = dma.hbm_to_vmem [thread:$0]  (!%p4935_p11), %s5822_s8, 16, %s4941_s15, [#allocation16]  }
  0xc1   : > { %s5024_s24 = scalar_lea.hbm %s5817_s3, %s4873_s21  ;;  %s474_s22 = scalar_lea.vmem [#allocation9], %s4870_s12 }
  0xc2   : > { %s481_s17 = sshll.u32 %s474_s22, 4  ;;  %s4294_s11 = scalar_lea.hbm %s5024_s24, 4096  ;;  %s5027_s17 = int_to_ptr.vmem [resolvable:$true] %s481_s17 }
  0xc3   : > { %p4295_p3 = scmp.ne.s32.totalorder %s5024_s24, %s4294_s11  ;;  %s4299_s29 = scalar_lea.hbm %s5817_s3, 8192 }
  0xc4   : > { %p4300_p0 = scmp.lt.u32.totalorder %s5024_s24, %s5817_s3  ;;  %p4301_p12 = scmp.lt.u32.totalorder %s4299_s29, %s4294_s11 }
  0xc5   : > { %p4297_p13 = pnand %p4295_p3, %p4896_p6  ;;  %p4303_p9 = scmp.lt.u32.totalorder %s4294_s11, %s5024_s24 }
  0xc6   : > { %p4302_p2 = por %p4301_p12, %p4300_p0 }
  0xc7   : > { %p4298_p7 = pneg %p4297_p13 }
  0xc8   : > { %p4304_p8 = por %p4303_p9, %p4302_p2 }
  0xca   : > { %p4305_p10 = pnand %p4304_p8, %p4298_p7 }
  0xcc   : > { %4308 = shalt.err (!%p4305_p10)
}
  0xcd   : > { %s4309_s19 = scalar_lea.vmem %s5027_s17, 4096  ;;  %s4624_s23 = smov [#allocation9]  }
  0xce   : > { %p4310_p1 = scmp.ne.s32.totalorder %s5027_s17, %s4309_s19  ;;  %s4314_s13 = sshll.u32 %s4624_s23, 4  ;;  %s4315_s13 = int_to_ptr.vmem [resolvable:$false] %s4314_s13 }
  0xcf   : > { %s4316_s18 = scalar_lea.vmem %s4315_s13, 8192  ;;  %p4317_p11 = scmp.lt.s32.totalorder %s5027_s17, %s4315_s13 }
  0xd0   : > { %p4312_p3 = pnand %p4310_p1, %p4896_p6  ;;  %p4318_p4 = scmp.lt.s32.totalorder %s4316_s18, %s4309_s19 }
  0xd2   : > { %p4313_p13 = pneg %p4312_p3  ;;  %p4319_p0 = por %p4318_p4, %p4317_p11 }
  0xd4   : > { %p4320_p12 = pnand %p4319_p0, %p4313_p13 }
  0xd6   : > { %4323 = shalt.err (!%p4320_p12)
}
  0xd7   : > { %3924 = dma.hbm_to_vmem [thread:$0]  (!%p4886_p5), %s5024_s24, 4096, %s5027_s17, %s4807_s4, %s5908_s26, %s5908_s26, %s5907_s0  }
  0xd8   : > { %s4625_s27 = smov [#allocation11]   ;;  %s4626_s11 = smov [#allocation14]  }
  0xd9   : > { %s352_s22 = sshll.u32 %s4625_s27, 4  ;;  %s376_s16 = sshll.u32 %s4626_s11, 4  ;;  %s353_s22 = int_to_ptr.vmem [resolvable:$true] %s352_s22  ;;  %s377_s16 = int_to_ptr.vmem [resolvable:$true] %s376_s16 }
  0xda   : > { %s4324_s14 = scalar_lea.hbm %s5819_s5, 2048  ;;  %p5913_p4 = scmp.ne.s32.totalorder %s5912_s20, 0 }
  0xdb   : > { %p4325_p11 = scmp.ne.s32.totalorder %s5819_s5, %s4324_s14  ;;  %p4331_p9 = scmp.lt.u32.totalorder %s4324_s14, %s5819_s5 }
  0xdd   : > { %p4327_p7 = pnand %p4325_p11, %p5913_p4 }
  0xdf   : > { %p4328_p2 = pneg %p4327_p7 }
  0xe1   : > { %p4333_p8 = pnand %p4331_p9, %p4328_p2 }
  0xe3   : > { %4336 = shalt.err (!%p4333_p8)
}
  0xe4   : > { %s4337_s24 = scalar_lea.vmem %s353_s22, 2048  ;;  %p4345_p13 = scmp.lt.s32.totalorder %s353_s22, %s353_s22 }
  0xe5   : > { %p4338_p10 = scmp.ne.s32.totalorder %s353_s22, %s4337_s24  ;;  %p4346_p0 = scmp.lt.s32.totalorder %s4337_s24, %s4337_s24 }
  0xe7   : > { %p4340_p1 = pnand %p4338_p10, %p5913_p4  ;;  %p4347_p12 = por %p4346_p0, %p4345_p13 }
  0xe9   : > { %p4341_p3 = pneg %p4340_p1 }
  0xeb   : > { %p4348_p5 = pnand %p4347_p12, %p4341_p3 }
  0xed   : > { %4351 = shalt.err (!%p4348_p5)
}
  0xee   : > { %p5914_p11 = scmp.ne.s32.totalorder %s5911_s2, 0  ;;  %s4352_s15 = scalar_lea.hbm %s5821_s7, 2048 }
  0xef   : > { %p4353_p7 = scmp.ne.s32.totalorder %s5821_s7, %s4352_s15  ;;  %p4359_p9 = scmp.lt.u32.totalorder %s4352_s15, %s5821_s7 }
  0xf0   : > { %3899 = dma.hbm_to_vmem [thread:$0]  (!%p5914_p11), %s5819_s5, 2048, %s353_s22, [#allocation7], %s5908_s26, %s5908_s26, %s5907_s0  }
  0xf1   : > { %p4355_p5 = pnand %p4353_p7, %p5913_p4 }
  0xf3   : > { %p4356_p2 = pneg %p4355_p5 }
  0xf5   : > { %p4361_p8 = pnand %p4359_p9, %p4356_p2 }
  0xf7   : > { %4364 = shalt.err (!%p4361_p8)
}
  0xf8   : > { %s4365_s23 = scalar_lea.vmem %s377_s16, 2048  ;;  %p4373_p13 = scmp.lt.s32.totalorder %s377_s16, %s377_s16 }
  0xf9   : > { %p4366_p10 = scmp.ne.s32.totalorder %s377_s16, %s4365_s23  ;;  %p4374_p0 = scmp.lt.s32.totalorder %s4365_s23, %s4365_s23 }
  0xfb   : > { %p4368_p1 = pnand %p4366_p10, %p5913_p4  ;;  %p4375_p12 = por %p4374_p0, %p4373_p13 }
  0xfd   : > { %p4369_p3 = pneg %p4368_p1 }
  0xff   : > { %p4376_p6 = pnand %p4375_p12, %p4369_p3 }
 0x101   : > { %4379 = shalt.err (!%p4376_p6)
}
 0x102   : > { %3905 = dma.hbm_to_vmem [thread:$0]  (!%p5914_p11), %s5821_s7, 2048, %s377_s16, [#allocation13], %s5908_s26, %s5908_s26, %s5907_s0  }
 0x103   : > { %s4627_s24 = smov [#allocation17]   ;;  %s4628_s18 = smov [#allocation18]  }
 0x104   : > { %s400_s17 = sshll.u32 %s4627_s24, 4  ;;  %s414_s27 = sshll.u32 %s4628_s18, 4  ;;  %s401_s17 = int_to_ptr.vmem [resolvable:$true] %s400_s17  ;;  %s415_s27 = int_to_ptr.vmem [resolvable:$true] %s414_s27 }
 0x105   : > { %s5915_s29 = sld [smem:[#allocation50_spill]] }
 0x10b   : > { %s4380_s14 = scalar_lea.hbm %s5915_s29, 2048 }
 0x10c   : > { %p4381_p6 = scmp.ne.s32.totalorder %s5915_s29, %s4380_s14  ;;  %p4387_p2 = scmp.lt.u32.totalorder %s4380_s14, %s5915_s29 }
 0x10e   : > { %p4383_p7 = pnand %p4381_p6, %p5913_p4 }
 0x110   : > { %p4384_p5 = pneg %p4383_p7 }
 0x112   : > { %p4389_p9 = pnand %p4387_p2, %p4384_p5 }
 0x114   : > { %4392 = shalt.err (!%p4389_p9)
}
 0x115   : > { %s4393_s16 = scalar_lea.vmem %s401_s17, 2048  ;;  %p4401_p3 = scmp.lt.s32.totalorder %s401_s17, %s401_s17 }
 0x116   : > { %p4394_p8 = scmp.ne.s32.totalorder %s401_s17, %s4393_s16  ;;  %p4402_p13 = scmp.lt.s32.totalorder %s4393_s16, %s4393_s16 }
 0x118   : > { %p4396_p10 = pnand %p4394_p8, %p5913_p4  ;;  %p4403_p0 = por %p4402_p13, %p4401_p3 }
 0x11a   : > { %p4397_p1 = pneg %p4396_p10 }
 0x11c   : > { %p4404_p12 = pnand %p4403_p0, %p4397_p1 }
 0x11e   : > { %4407 = shalt.err (!%p4404_p12)
}
 0x11f   : > { %3911 = dma.hbm_to_vmem [thread:$0]  (!%p5914_p11), %s5915_s29, 2048, %s401_s17, [#allocation16], %s5908_s26, %s5908_s26, %s5907_s0  }
 0x120   : > { %s5916_s15 = sld [smem:[#allocation51_spill]] }
 0x126   : > { %s4408_s14 = scalar_lea.hbm %s5916_s15, 16 }
 0x127   : > { %p4409_p6 = scmp.ne.s32.totalorder %s5916_s15, %s4408_s14  ;;  %p4415_p2 = scmp.lt.u32.totalorder %s4408_s14, %s5916_s15 }
 0x129   : > { %p4411_p7 = pnand %p4409_p6, %p5913_p4 }
 0x12b   : > { %p4412_p5 = pneg %p4411_p7 }
 0x12d   : > { %p4417_p9 = pnand %p4415_p2, %p4412_p5 }
 0x12f   : > { %4420 = shalt.err (!%p4417_p9)
}
 0x130   : > { %s4421_s16 = scalar_lea.vmem %s415_s27, 16  ;;  %s4428_s17 = scalar_lea.vmem %s415_s27, 32 }
 0x131   : > { %p4422_p8 = scmp.ne.s32.totalorder %s415_s27, %s4421_s16  ;;  %p4429_p3 = scmp.lt.s32.totalorder %s415_s27, %s415_s27 }
 0x132   : > { %p4430_p13 = scmp.lt.s32.totalorder %s4428_s17, %s4421_s16 }
 0x133   : > { %p4424_p10 = pnand %p4422_p8, %p5913_p4 }
 0x134   : > { %p4431_p0 = por %p4430_p13, %p4429_p3 }
 0x135   : > { %p4425_p1 = pneg %p4424_p10 }
 0x137   : > { %p4432_p12 = pnand %p4431_p0, %p4425_p1 }
 0x139   : > { %4435 = shalt.err (!%p4432_p12)
}
 0x13a   : > { %3914 = dma.hbm_to_vmem [thread:$0]  (!%p5914_p11), %s5916_s15, 16, %s415_s27, [#allocation19]  }
 0x13b   : > { %s5917_s20 = sld [smem:[#allocation49_spill]]  ;;  %s495_s19 = scalar_lea.vmem [#allocation10], %s4870_s12 }
 0x13c   : > { %s502_s23 = sshll.u32 %s495_s19, 4  ;;  %p5919_p6 = scmp.ne.s32.totalorder %s5906_s10, 0  ;;  %s5142_s23 = int_to_ptr.vmem [resolvable:$true] %s502_s23 }
 0x141   : > { %s5918_s14 = smov %s5917_s20  ;;  %s5139_s25 = scalar_lea.hbm %s5917_s20, %s4873_s21 }
 0x142   : > { %s4436_s2 = scalar_lea.hbm %s5139_s25, 4096  ;;  %s4441_s16 = scalar_lea.hbm %s5918_s14, 8192 }
 0x143   : > { %p4437_p4 = scmp.ne.s32.totalorder %s5139_s25, %s4436_s2  ;;  %p4442_p11 = scmp.lt.u32.totalorder %s5139_s25, %s5918_s14 }
 0x144   : > { %p4443_p2 = scmp.lt.u32.totalorder %s4441_s16, %s4436_s2  ;;  %p4445_p8 = scmp.lt.u32.totalorder %s4436_s2, %s5139_s25 }
 0x145   : > { %p4439_p7 = pnand %p4437_p4, %p5919_p6 }
 0x146   : > { %p4444_p9 = por %p4443_p2, %p4442_p11 }
 0x147   : > { %p4440_p5 = pneg %p4439_p7 }
 0x148   : > { %p4446_p10 = por %p4445_p8, %p4444_p9 }
 0x14a   : > { %p4447_p1 = pnand %p4446_p10, %p4440_p5 }
 0x14c   : > { %4450 = shalt.err (!%p4447_p1)
}
 0x14d   : > { %s4451_s12 = scalar_lea.vmem %s5142_s23, 4096  ;;  %s4629_s13 = smov [#allocation10]  }
 0x14e   : > { %p4452_p3 = scmp.ne.s32.totalorder %s5142_s23, %s4451_s12  ;;  %s4456_s24 = sshll.u32 %s4629_s13, 4  ;;  %s4457_s24 = int_to_ptr.vmem [resolvable:$false] %s4456_s24 }
 0x14f   : > { %s4458_s18 = scalar_lea.vmem %s4457_s24, 8192  ;;  %p4459_p12 = scmp.lt.s32.totalorder %s5142_s23, %s4457_s24 }
 0x150   : > { %p4454_p13 = pnand %p4452_p3, %p5919_p6  ;;  %p4460_p4 = scmp.lt.s32.totalorder %s4458_s18, %s4451_s12 }
 0x152   : > { %p4455_p0 = pneg %p4454_p13  ;;  %p4461_p7 = por %p4460_p4, %p4459_p12 }
 0x154   : > { %p4462_p11 = pnand %p4461_p7, %p4455_p0 }
 0x156   : > { %4465 = shalt.err (!%p4462_p11)
}
 0x157   : > { %p5920_p5 = scmp.ne.s32.totalorder %s5905_s9, 0  ;;  %p5921_p6 = scmp.ne.s32.totalorder %s5909_s30, 0 }
 0x158   : > { %s5922_s10 = sld [smem:[#allocation32_spill]] (!%p5921_p6)  ;;  %s5923_s11 = sld [smem:[#allocation41_spill]] (!%p5921_p6) }
 0x159   : > { %3927 = dma.hbm_to_vmem [thread:$0]  (!%p5920_p5), %s5139_s25, 4096, %s5142_s23, %s4807_s4, %s5908_s26, %s5908_s26, %s5907_s0  }
 0x15a   : > { %514 = sbr.rel (%p5921_p6) target bundleno = 1364 (0x554), region = 64  ;;  %s516_s20 = sand.u32 (!%p5921_p6), 1, %s4749_s28  }
 0x15b   : > { %s517_s22 = scalar_lea.sflag (!%p5921_p6), [#allocation4], %s516_s20 }
 0x15e   : > { %s518_s19 = sand.u32 (!%p5921_p6), 1, %s5922_s10   ;;  %p5924_p2 = scmp.ne.s32.totalorder (!%p5921_p6), %s5923_s11, 0 }
 0x15f   : > { %s3154_s2 = sshll.u32 (!%p5921_p6), %s518_s19, 8 }
 0x160   : > { %s5173_s27 = scalar_lea.vmem (!%p5921_p6), [#allocation3], %s3154_s2 }
 0x161   : > { %4539 = dma.done.wait (%p5924_p2), %s517_s22, 4096  }
 0x162   : > { %4541 = vsyncadd (%p5924_p2), %s517_s22, 4294963200  ;;  %p5925_p9 = scmp.eq.s32.totalorder %s4749_s28, 0 }
 0x164   : > { %4543 = dma.done.wait (%p5925_p9), [#allocation7], 4096   ;;  %p5926_p8 = pmov %p5925_p9 }
 0x165   : > { %s5927_s4 = sld [smem:[#allocation30_spill]]  ;;  %s5928_s9 = sld [smem:[#allocation44_spill]] }
 0x166   : > { %4545 = vsyncadd (%p5926_p8), [#allocation7], 4294963200 }
 0x16b   : > { %s531_s0 = sand.u32 1, %s5927_s4   ;;  %p5929_p10 = scmp.ne.s32.totalorder %s5928_s9, 0 }
 0x16c   : > { %s3156_s26 = sshll.u32 %s531_s0, 8 }
 0x16d   : > { %s5186_s30 = scalar_lea.vmem [#allocation8], %s3156_s26 }
 0x16e   : > { %4547 = dma.done.wait (%p5929_p10), %s517_s22, 12288  }
 0x16f   : > { %4549 = vsyncadd (%p5929_p10), %s517_s22, 4294955008  ;;  %s5192_s25 = scalar_lea.vmem [#allocation9], %s3156_s26  ;;  %s5194_s23 = scalar_lea.vmem [#allocation10], %s3156_s26 }
 0x170   : > { %p5930_p1 = pmov %p5926_p8 }
 0x172   : > { %4551 = dma.done.wait (%p5930_p1), [#allocation7], 2048   ;;  %p5931_p3 = pmov %p5930_p1 }
 0x173   : > { %p5932_p13 = pmov %p5930_p1 }
 0x174   : > { %4553 = vsyncadd (%p5931_p3), [#allocation7], 4294965248 }
 0x175   : > { %4555 = dma.done.wait (%p5932_p13), [#allocation13], 2064   ;;  %p5933_p0 = pmov %p5930_p1 }
 0x177   : > { %4557 = vsyncadd (%p5933_p0), [#allocation13], 4294965232  ;;  %p5934_p12 = pmov %p5933_p0 }
 0x178   : > { %p5935_p4 = pmov %p5933_p0 }
 0x179   : > { %4559 = dma.done.wait (%p5934_p12), [#allocation16], 2064  }
 0x17a   : > { %4561 = vsyncadd (%p5935_p4), [#allocation16], 4294965232  ;;  %p5936_p7 = pmov %p5933_p0 }
 0x17b   : > { %p5937_p11 = pmov %p5933_p0 }
 0x17c   : > { %4563 = dma.done.wait (%p5936_p7), [#allocation19], 16  }
 0x17d   : > { %4565 = vsyncadd (%p5937_p11), [#allocation19], 4294967280  ;;  %s5212_s16 = scalar_lea.vmem [#allocation20], %s3156_s26  ;;  %s5938_s17 = sld [smem:[#allocation34_spill]] }
 0x183   : > { %p3166_p5 = scmp.ne.s32.totalorder %s5938_s17, 0 }
 0x184   : > { %v4630_v0 = vmov (!%p3166_p5), 0.0  }
 0x185   : > { %639 = sbr.rel (%p3166_p5) target bundleno = 405 (0x195), region = 112  ;;  %640 = vst [vmem:[#allocation2] sm:$0xff] (!%p3166_p5), %v4630_v0  ;;  %641 = vst [vmem:[#allocation2 + $0x8] sm:$0xff] (!%p3166_p5), %v4630_v0 }
 0x186   : > { %642 = vst [vmem:[#allocation2 + $0x10] sm:$0xff] (!%p3166_p5), %v4630_v0  ;;  %643 = vst [vmem:[#allocation2 + $0x18] sm:$0xff] (!%p3166_p5), %v4630_v0 }
 0x187   : > { %644 = vst [vmem:[#allocation2 + $0x20] sm:$0xff] (!%p3166_p5), %v4630_v0  ;;  %645 = vst [vmem:[#allocation2 + $0x28] sm:$0xff] (!%p3166_p5), %v4630_v0 }
 0x188   : > { %646 = vst [vmem:[#allocation2 + $0x30] sm:$0xff] (!%p3166_p5), %v4630_v0  ;;  %647 = vst [vmem:[#allocation2 + $0x38] sm:$0xff] (!%p3166_p5), %v4630_v0 }
 0x189   : > { %648 = vst [vmem:[#allocation2 + $0x40] sm:$0xff] (!%p3166_p5), %v4630_v0  ;;  %649 = vst [vmem:[#allocation2 + $0x48] sm:$0xff] (!%p3166_p5), %v4630_v0 }
 0x18a   : > { %650 = vst [vmem:[#allocation2 + $0x50] sm:$0xff] (!%p3166_p5), %v4630_v0  ;;  %651 = vst [vmem:[#allocation2 + $0x58] sm:$0xff] (!%p3166_p5), %v4630_v0 }
 0x18b   : > { %652 = vst [vmem:[#allocation2 + $0x60] sm:$0xff] (!%p3166_p5), %v4630_v0  ;;  %653 = vst [vmem:[#allocation2 + $0x68] sm:$0xff] (!%p3166_p5), %v4630_v0 }
 0x18c   : > { %654 = vst [vmem:[#allocation2 + $0x70] sm:$0xff] %v4630_v0  ;;  %655 = vst [vmem:[#allocation2 + $0x78] sm:$0xff] %v4630_v0 }
 0x18d   : > { %656 = vst [vmem:[#allocation2 + $0x80] sm:$0xff] %v4630_v0  ;;  %657 = vst [vmem:[#allocation2 + $0x88] sm:$0xff] %v4630_v0 }
 0x18e   : > { %658 = vst [vmem:[#allocation2 + $0x90] sm:$0xff] %v4630_v0  ;;  %659 = vst [vmem:[#allocation2 + $0x98] sm:$0xff] %v4630_v0 }
 0x18f   : > { %660 = vst [vmem:[#allocation2 + $0xa0] sm:$0xff] %v4630_v0  ;;  %661 = vst [vmem:[#allocation2 + $0xa8] sm:$0xff] %v4630_v0 }
 0x190   : > { %662 = vst [vmem:[#allocation2 + $0xb0] sm:$0xff] %v4630_v0  ;;  %663 = vst [vmem:[#allocation2 + $0xb8] sm:$0xff] %v4630_v0 }
 0x191   : > { %664 = vst [vmem:[#allocation2 + $0xc0] sm:$0xff] %v4630_v0  ;;  %665 = vst [vmem:[#allocation2 + $0xc8] sm:$0xff] %v4630_v0 }
 0x192   : > { %666 = vst [vmem:[#allocation2 + $0xd0] sm:$0xff] %v4630_v0  ;;  %667 = vst [vmem:[#allocation2 + $0xd8] sm:$0xff] %v4630_v0 }
 0x193   : > { %668 = vst [vmem:[#allocation2 + $0xe0] sm:$0xff] %v4630_v0  ;;  %669 = vst [vmem:[#allocation2 + $0xe8] sm:$0xff] %v4630_v0 }
 0x194   : > { %670 = vst [vmem:[#allocation2 + $0xf0] sm:$0xff] %v4630_v0  ;;  %671 = vst [vmem:[#allocation2 + $0xf8] sm:$0xff] %v4630_v0 }
 0x195 PF: > { %s5939_s28 = sld [smem:[#allocation34_spill]]  ;;  %v4070_v1 = vld [vmem:[%s5173_s27 + $0x4] ss:$8 sps:$4 sm:$0xff]   ;;  %v4068_v19 = vld [vmem:[%s5173_s27] ss:$8 sps:$4 sm:$0xff]  }
 0x196   : > { %v4073_v2 = vld [vmem:[%s5173_s27 + $0x84] ss:$8 sps:$4 sm:$0xff]   ;;  %1061 = vmatprep.mubr.bf16.mxu0 %v4070_v1  ;;  %v4071_v20 = vld [vmem:[%s5173_s27 + $0x80] ss:$8 sps:$4 sm:$0xff]   ;;  %v4074_v21 = vld [vmem:[%s5173_s27 + $0x14] ss:$8 sps:$4 sm:$0xff]  }
 0x197   : > { %1125 = vmatprep.mubr.bf16.mxu1 %v4073_v2  ;;  %v4076_v22 = vld [vmem:[%s5173_s27 + $0x94] ss:$8 sps:$4 sm:$0xff]   ;;  %v4078_v23 = vld [vmem:[%s5173_s27 + $0x10] ss:$8 sps:$4 sm:$0xff]   ;;  %v4080_v25 = vld [vmem:[%s5173_s27 + $0x24] ss:$8 sps:$4 sm:$0xff]  }
 0x198   : > { %v4079_v24 = vld [vmem:[%s5173_s27 + $0x90] ss:$8 sps:$4 sm:$0xff]   ;;  %v4082_v26 = vld [vmem:[%s5173_s27 + $0xa4] ss:$8 sps:$4 sm:$0xff]   ;;  %v4084_v27 = vld [vmem:[%s5173_s27 + $0x20] ss:$8 sps:$4 sm:$0xff]  }
 0x199   : > { %v4085_v28 = vld [vmem:[%s5173_s27 + $0xa0] ss:$8 sps:$4 sm:$0xff]   ;;  %v4086_v29 = vld [vmem:[%s5173_s27 + $0x34] ss:$8 sps:$4 sm:$0xff]   ;;  %v4090_v31 = vld [vmem:[%s5173_s27 + $0x30] ss:$8 sps:$4 sm:$0xff]  }
 0x19a   : > { %v4088_v30 = vld [vmem:[%s5173_s27 + $0xb4] ss:$8 sps:$4 sm:$0xff]   ;;  %v4091_v32 = vld [vmem:[%s5173_s27 + $0xb0] ss:$8 sps:$4 sm:$0xff]   ;;  %v4092_v33 = vld [vmem:[%s5173_s27 + $0x44] ss:$8 sps:$4 sm:$0xff]  }
 0x19b   : > { %s3167_s21 = sshll.u32 %s5939_s28, 8  ;;  %v4094_v34 = vld [vmem:[%s5173_s27 + $0xc4] ss:$8 sps:$4 sm:$0xff]   ;;  %v4096_v35 = vld [vmem:[%s5173_s27 + $0x40] ss:$8 sps:$4 sm:$0xff]   ;;  %p3217_p6 = scmp.ne.s32.totalorder %s5939_s28, 1 }
 0x19c   : > { %s673_s12 = sshra.s32 %s3167_s21, 3  ;;  %v4097_v36 = vld [vmem:[%s5173_s27 + $0xc0] ss:$8 sps:$4 sm:$0xff]   ;;  %v4098_v37 = vld [vmem:[%s5173_s27 + $0x54] ss:$8 sps:$4 sm:$0xff]  }
 0x19d   : > { %s3168_s13 = sshll.u32 %s673_s12, 2  ;;  %v4100_v38 = vld [vmem:[%s5173_s27 + $0xd4] ss:$8 sps:$4 sm:$0xff]   ;;  %v4102_v39 = vld [vmem:[%s5173_s27 + $0x50] ss:$8 sps:$4 sm:$0xff]   ;;  %v709_v51 = vld [vmem:[#allocation2] sm:$0xff] }
 0x19e   : > { %s5218_s24 = scalar_lea.vmem [#allocation6], %s3168_s13  ;;  %v4103_v40 = vld [vmem:[%s5173_s27 + $0xd0] ss:$8 sps:$4 sm:$0xff]   ;;  %v4104_v41 = vld [vmem:[%s5173_s27 + $0x64] ss:$8 sps:$4 sm:$0xff]  }
 0x19f   : > { %v4052_v3 = vld [vmem:[%s5218_s24 + $0x40] sm:$0xff]   ;;  %v4054_v5 = vld [vmem:[%s5218_s24 + $0x48] sm:$0xff]   ;;  %v4056_v7 = vld [vmem:[%s5218_s24 + $0x50] sm:$0xff]  }
 0x1a0   : > { %v4053_v4 = vld [vmem:[%s5218_s24] sm:$0xff]   ;;  %3231 = vmatprep.subr.bf16.mxu0 %v4052_v3  ;;  %3823 = vmatprep.subr.bf16.mxu1 %v4052_v3  ;;  %v4055_v6 = vld [vmem:[%s5218_s24 + $0x8] sm:$0xff]   ;;  %v4057_v8 = vld [vmem:[%s5218_s24 + $0x10] sm:$0xff]  }
 0x1a1   : > { %3232 = vmatpush3.bf16.msra.mxu0 %v4053_v4  ;;  %3831 = vmatpush3.bf16.msra.mxu1 %v4053_v4  ;;  %v4058_v9 = vld [vmem:[%s5218_s24 + $0x58] sm:$0xff]   ;;  %v4060_v11 = vld [vmem:[%s5218_s24 + $0x60] sm:$0xff]   ;;  %v4062_v13 = vld [vmem:[%s5218_s24 + $0x68] sm:$0xff]  }
 0x1a2   : > { %3233 = vmatprep.subr.bf16.mxu0 %v4054_v5  ;;  %3824 = vmatprep.subr.bf16.mxu1 %v4054_v5  ;;  %v4059_v10 = vld [vmem:[%s5218_s24 + $0x18] sm:$0xff]   ;;  %v4061_v12 = vld [vmem:[%s5218_s24 + $0x20] sm:$0xff]   ;;  %v4063_v14 = vld [vmem:[%s5218_s24 + $0x28] sm:$0xff]  }
 0x1a3   : > { %v4064_v15 = vld [vmem:[%s5218_s24 + $0x70] sm:$0xff]   ;;  %v4066_v17 = vld [vmem:[%s5218_s24 + $0x78] sm:$0xff]   ;;  %v4106_v42 = vld [vmem:[%s5173_s27 + $0xe4] ss:$8 sps:$4 sm:$0xff]  }
 0x1a4   : > { %v4065_v16 = vld [vmem:[%s5218_s24 + $0x30] sm:$0xff]   ;;  %v4067_v18 = vld [vmem:[%s5218_s24 + $0x38] sm:$0xff]   ;;  %v4108_v43 = vld [vmem:[%s5173_s27 + $0x60] ss:$8 sps:$4 sm:$0xff]  }
 0x1a5   : > { %3234 = vmatpush3.bf16.msra.mxu0 %v4055_v6  ;;  %3832 = vmatpush3.bf16.msra.mxu1 %v4055_v6  ;;  %v4109_v44 = vld [vmem:[%s5173_s27 + $0xe0] ss:$8 sps:$4 sm:$0xff]   ;;  %v4110_v45 = vld [vmem:[%s5173_s27 + $0x74] ss:$8 sps:$4 sm:$0xff]   ;;  %v4114_v47 = vld [vmem:[%s5173_s27 + $0x70] ss:$8 sps:$4 sm:$0xff]  }
 0x1a6   : > { %3235 = vmatprep.subr.bf16.mxu0 %v4056_v7  ;;  %3825 = vmatprep.subr.bf16.mxu1 %v4056_v7  ;;  %v4112_v46 = vld [vmem:[%s5173_s27 + $0xf4] ss:$8 sps:$4 sm:$0xff]   ;;  %v4115_v48 = vld [vmem:[%s5173_s27 + $0xf0] ss:$8 sps:$4 sm:$0xff]   ;;  %v725_v53 = vld [vmem:[#allocation2 + $0x80] sm:$0xff] }
 0x1a7   : > { %v710_v59 = vld [vmem:[#allocation2 + $0x8] sm:$0xff]  ;;  %v711_v7 = vld [vmem:[#allocation2 + $0x10] sm:$0xff] }
 0x1a8   : > { %v726_v61 = vld [vmem:[#allocation2 + $0x88] sm:$0xff] }
 0x1a9   : > { %3236 = vmatpush3.bf16.msra.mxu0 %v4057_v8  ;;  %3833 = vmatpush3.bf16.msra.mxu1 %v4057_v8 }
 0x1aa   : > { %3237 = vmatprep.subr.bf16.mxu0 %v4058_v9  ;;  %3826 = vmatprep.subr.bf16.mxu1 %v4058_v9  ;;  %v727_v9 = vld [vmem:[#allocation2 + $0x90] sm:$0xff] }
 0x1ad   : > { %3238 = vmatpush3.bf16.msra.mxu0 %v4059_v10  ;;  %3834 = vmatpush3.bf16.msra.mxu1 %v4059_v10 }
 0x1ae   : > { %3239 = vmatprep.subr.bf16.mxu0 %v4060_v11  ;;  %3827 = vmatprep.subr.bf16.mxu1 %v4060_v11 }
 0x1b1   : > { %3240 = vmatpush3.bf16.msra.mxu0 %v4061_v12  ;;  %3835 = vmatpush3.bf16.msra.mxu1 %v4061_v12 }
 0x1b2   : > { %3241 = vmatprep.subr.bf16.mxu0 %v4062_v13  ;;  %3828 = vmatprep.subr.bf16.mxu1 %v4062_v13 }
 0x1b5   : > { %3242 = vmatpush3.bf16.msra.mxu0 %v4063_v14  ;;  %3836 = vmatpush3.bf16.msra.mxu1 %v4063_v14 }
 0x1b6   : > { %3243 = vmatprep.subr.bf16.mxu0 %v4064_v15  ;;  %3829 = vmatprep.subr.bf16.mxu1 %v4064_v15  ;;  %v712_v15 = vld [vmem:[#allocation2 + $0x18] sm:$0xff] }
 0x1b9   : > { %3244 = vmatpush3.bf16.msra.mxu0 %v4065_v16  ;;  %3837 = vmatpush3.bf16.msra.mxu1 %v4065_v16 }
 0x1ba   : > { %3245 = vmatprep.subr.bf16.mxu0 %v4066_v17  ;;  %3830 = vmatprep.subr.bf16.mxu1 %v4066_v17  ;;  %v728_v17 = vld [vmem:[#allocation2 + $0x98] sm:$0xff] }
 0x1bd   : > { %3246 = vmatpush3.bf16.msra.mxu0 %v4067_v18  ;;  %3838 = vmatpush3.bf16.msra.mxu1 %v4067_v18 }
 0x1c0   : > { %1062 = vmatmul.mubr.bf16.vlgmr.msra.gmra.mrb[0].mxu0 %v4068_v19  ;;  %1126 = vmatmul.mubr.bf16.vlgmr.msra.gmra.mrb[0].mxu1 %v4071_v20 }
 0x1c1   : > { %1069 = vmatprep.mubr.bf16.mxu0 %v4074_v21  ;;  %1133 = vmatprep.mubr.bf16.mxu1 %v4076_v22 }
 0x1c8   : > { %1070 = vmatmul.mubr.bf16.gmra.mrb[4].mxu0 %v4078_v23  ;;  %1134 = vmatmul.mubr.bf16.gmra.mrb[4].mxu1 %v4079_v24 }
 0x1c9   : > { %1077 = vmatprep.mubr.bf16.mxu0 %v4080_v25  ;;  %1141 = vmatprep.mubr.bf16.mxu1 %v4082_v26 }
 0x1d0   : > { %1078 = vmatmul.mubr.bf16.gmra.mrb[8].mxu0 %v4084_v27  ;;  %1142 = vmatmul.mubr.bf16.gmra.mrb[8].mxu1 %v4085_v28  ;;  %v713_v27 = vld [vmem:[#allocation2 + $0x20] sm:$0xff] }
 0x1d1   : > { %1085 = vmatprep.mubr.bf16.mxu0 %v4086_v29  ;;  %1149 = vmatprep.mubr.bf16.mxu1 %v4088_v30  ;;  %v729_v29 = vld [vmem:[#allocation2 + $0xa0] sm:$0xff] }
 0x1d8   : > { %1086 = vmatmul.mubr.bf16.gmra.mrb[12].mxu0 %v4090_v31  ;;  %1150 = vmatmul.mubr.bf16.gmra.mrb[12].mxu1 %v4091_v32 }
 0x1d9   : > { %1093 = vmatprep.mubr.bf16.mxu0 %v4092_v33  ;;  %1157 = vmatprep.mubr.bf16.mxu1 %v4094_v34 }
 0x1e0   : > { %1094 = vmatmul.mubr.bf16.gmra.mrb[16].mxu0 %v4096_v35  ;;  %1158 = vmatmul.mubr.bf16.gmra.mrb[16].mxu1 %v4097_v36  ;;  %v714_v35 = vld [vmem:[#allocation2 + $0x28] sm:$0xff] }
 0x1e1   : > { %1101 = vmatprep.mubr.bf16.mxu0 %v4098_v37  ;;  %1165 = vmatprep.mubr.bf16.mxu1 %v4100_v38  ;;  %v730_v37 = vld [vmem:[#allocation2 + $0xa8] sm:$0xff] }
 0x1e8   : > { %1102 = vmatmul.mubr.bf16.gmra.mrb[20].mxu0 %v4102_v39  ;;  %1166 = vmatmul.mubr.bf16.gmra.mrb[20].mxu1 %v4103_v40 }
 0x1e9   : > { %1109 = vmatprep.mubr.bf16.mxu0 %v4104_v41  ;;  %1173 = vmatprep.mubr.bf16.mxu1 %v4106_v42 }
 0x1f0   : > { %1110 = vmatmul.mubr.bf16.gmra.mrb[24].mxu0 %v4108_v43  ;;  %1174 = vmatmul.mubr.bf16.gmra.mrb[24].mxu1 %v4109_v44 }
 0x1f1   : > { %1117 = vmatprep.mubr.bf16.mxu0 %v4110_v45  ;;  %1181 = vmatprep.mubr.bf16.mxu1 %v4112_v46 }
 0x1f8   : > { %1118 = vmatmul.mubr.bf16.gmra.mrb[28].mxu0 %v4114_v47  ;;  %1182 = vmatmul.mubr.bf16.gmra.mrb[28].mxu1 %v4115_v48  ;;  %v715_v47 = vld [vmem:[#allocation2 + $0x30] sm:$0xff] }
 0x293   : > { %v3247_v49 = vpop.f32.mrb[0].mxu0  ;;  %v3295_v50 = vpop.f32.mrb[0].mxu1 }
 0x294   : > { %v3248_v52 = vpop.f32.mrb[1].mxu0  ;;  %v3296_v54 = vpop.f32.mrb[1].mxu1 }
 0x295   : > { %v3249_v55 = vadd.f32 %v3248_v52, %v3247_v49  ;;  %v3297_v56 = vadd.f32 %v3296_v54, %v3295_v50  ;;  %v3250_v57 = vpop.f32.mrb[2].mxu0  ;;  %v3298_v58 = vpop.f32.mrb[2].mxu1  ;;  %v731_v49 = vld [vmem:[#allocation2 + $0xb0] sm:$0xff] }
 0x296   : > { %v3251_v60 = vpop.f32.mrb[3].mxu0  ;;  %v3299_v62 = vpop.f32.mrb[3].mxu1 }
 0x297   : > { %v1190_v63 = vadd.f32 %v3249_v55, %v709_v51  ;;  %v1206_v0 = vadd.f32 %v3297_v56, %v725_v53  ;;  %v3252_v1 = vadd.f32 %v3251_v60, %v3250_v57  ;;  %v3300_v2 = vadd.f32 %v3299_v62, %v3298_v58  ;;  %v716_v55 = vld [vmem:[#allocation2 + $0x38] sm:$0xff] }
 0x298   : > { %v732_v57 = vld [vmem:[#allocation2 + $0xb8] sm:$0xff] }
 0x299   : > { %1222 = vst [vmem:[#allocation2] sm:$0xff] %v1190_v63  ;;  %1238 = vst [vmem:[#allocation2 + $0x80] sm:$0xff] %v1206_v0  ;;  %v1191_v3 = vadd.f32 %v3252_v1, %v710_v59  ;;  %v1207_v4 = vadd.f32 %v3300_v2, %v726_v61 }
 0x29b   : > { %1223 = vst [vmem:[#allocation2 + $0x8] sm:$0xff] %v1191_v3  ;;  %1239 = vst [vmem:[#allocation2 + $0x88] sm:$0xff] %v1207_v4  ;;  %v3253_v5 = vpop.f32.mrb[4].mxu0  ;;  %v3301_v6 = vpop.f32.mrb[4].mxu1  ;;  %v717_v3 = vld [vmem:[#allocation2 + $0x40] sm:$0xff] }
 0x29c   : > { %v3254_v8 = vpop.f32.mrb[5].mxu0  ;;  %v3302_v10 = vpop.f32.mrb[5].mxu1 }
 0x29d   : > { %v3255_v11 = vadd.f32 %v3254_v8, %v3253_v5  ;;  %v3303_v12 = vadd.f32 %v3302_v10, %v3301_v6  ;;  %v3256_v13 = vpop.f32.mrb[6].mxu0  ;;  %v3304_v14 = vpop.f32.mrb[6].mxu1  ;;  %v733_v5 = vld [vmem:[#allocation2 + $0xc0] sm:$0xff] }
 0x29e   : > { %v3257_v16 = vpop.f32.mrb[7].mxu0  ;;  %v3305_v18 = vpop.f32.mrb[7].mxu1 }
 0x29f   : > { %v1192_v19 = vadd.f32 %v3255_v11, %v711_v7  ;;  %v1208_v20 = vadd.f32 %v3303_v12, %v727_v9  ;;  %v3258_v21 = vadd.f32 %v3257_v16, %v3256_v13  ;;  %v3306_v22 = vadd.f32 %v3305_v18, %v3304_v14  ;;  %v718_v11 = vld [vmem:[#allocation2 + $0x48] sm:$0xff] }
 0x2a0   : > { %v734_v13 = vld [vmem:[#allocation2 + $0xc8] sm:$0xff] }
 0x2a1   : > { %1224 = vst [vmem:[#allocation2 + $0x10] sm:$0xff] %v1192_v19  ;;  %1240 = vst [vmem:[#allocation2 + $0x90] sm:$0xff] %v1208_v20  ;;  %v1193_v23 = vadd.f32 %v3258_v21, %v712_v15  ;;  %v1209_v24 = vadd.f32 %v3306_v22, %v728_v17 }
 0x2a3   : > { %1225 = vst [vmem:[#allocation2 + $0x18] sm:$0xff] %v1193_v23  ;;  %1241 = vst [vmem:[#allocation2 + $0x98] sm:$0xff] %v1209_v24  ;;  %v3259_v25 = vpop.f32.mrb[8].mxu0  ;;  %v3307_v26 = vpop.f32.mrb[8].mxu1  ;;  %v719_v23 = vld [vmem:[#allocation2 + $0x50] sm:$0xff] }
 0x2a4   : > { %v3260_v28 = vpop.f32.mrb[9].mxu0  ;;  %v3308_v30 = vpop.f32.mrb[9].mxu1 }
 0x2a5   : > { %v3261_v31 = vadd.f32 %v3260_v28, %v3259_v25  ;;  %v3309_v32 = vadd.f32 %v3308_v30, %v3307_v26  ;;  %v3262_v33 = vpop.f32.mrb[10].mxu0  ;;  %v3310_v34 = vpop.f32.mrb[10].mxu1  ;;  %v735_v25 = vld [vmem:[#allocation2 + $0xd0] sm:$0xff] }
 0x2a6   : > { %v3263_v36 = vpop.f32.mrb[11].mxu0  ;;  %v3311_v38 = vpop.f32.mrb[11].mxu1 }
 0x2a7   : > { %v1194_v39 = vadd.f32 %v3261_v31, %v713_v27  ;;  %v1210_v40 = vadd.f32 %v3309_v32, %v729_v29  ;;  %v3264_v41 = vadd.f32 %v3263_v36, %v3262_v33  ;;  %v3312_v42 = vadd.f32 %v3311_v38, %v3310_v34  ;;  %v720_v31 = vld [vmem:[#allocation2 + $0x58] sm:$0xff] }
 0x2a8   : > { %v736_v33 = vld [vmem:[#allocation2 + $0xd8] sm:$0xff] }
 0x2a9   : > { %1226 = vst [vmem:[#allocation2 + $0x20] sm:$0xff] %v1194_v39  ;;  %1242 = vst [vmem:[#allocation2 + $0xa0] sm:$0xff] %v1210_v40  ;;  %v1195_v43 = vadd.f32 %v3264_v41, %v714_v35  ;;  %v1211_v44 = vadd.f32 %v3312_v42, %v730_v37 }
 0x2ab   : > { %1227 = vst [vmem:[#allocation2 + $0x28] sm:$0xff] %v1195_v43  ;;  %1243 = vst [vmem:[#allocation2 + $0xa8] sm:$0xff] %v1211_v44  ;;  %v3265_v45 = vpop.f32.mrb[12].mxu0  ;;  %v3313_v46 = vpop.f32.mrb[12].mxu1  ;;  %v721_v43 = vld [vmem:[#allocation2 + $0x60] sm:$0xff] }
 0x2ac   : > { %v3266_v48 = vpop.f32.mrb[13].mxu0  ;;  %v3314_v50 = vpop.f32.mrb[13].mxu1 }
 0x2ad   : > { %v3267_v51 = vadd.f32 %v3266_v48, %v3265_v45  ;;  %v3315_v52 = vadd.f32 %v3314_v50, %v3313_v46  ;;  %v3268_v53 = vpop.f32.mrb[14].mxu0  ;;  %v3316_v54 = vpop.f32.mrb[14].mxu1  ;;  %v737_v45 = vld [vmem:[#allocation2 + $0xe0] sm:$0xff] }
 0x2ae   : > { %v3269_v56 = vpop.f32.mrb[15].mxu0  ;;  %v3317_v58 = vpop.f32.mrb[15].mxu1 }
 0x2af   : > { %v1196_v59 = vadd.f32 %v3267_v51, %v715_v47  ;;  %v1212_v60 = vadd.f32 %v3315_v52, %v731_v49  ;;  %v3270_v61 = vadd.f32 %v3269_v56, %v3268_v53  ;;  %v3318_v62 = vadd.f32 %v3317_v58, %v3316_v54  ;;  %v722_v51 = vld [vmem:[#allocation2 + $0x68] sm:$0xff] }
 0x2b0   : > { %v738_v53 = vld [vmem:[#allocation2 + $0xe8] sm:$0xff] }
 0x2b1   : > { %1228 = vst [vmem:[#allocation2 + $0x30] sm:$0xff] %v1196_v59  ;;  %1244 = vst [vmem:[#allocation2 + $0xb0] sm:$0xff] %v1212_v60  ;;  %v1197_v63 = vadd.f32 %v3270_v61, %v716_v55  ;;  %v1213_v0 = vadd.f32 %v3318_v62, %v732_v57 }
 0x2b3   : > { %1229 = vst [vmem:[#allocation2 + $0x38] sm:$0xff] %v1197_v63  ;;  %1245 = vst [vmem:[#allocation2 + $0xb8] sm:$0xff] %v1213_v0  ;;  %v3271_v1 = vpop.f32.mrb[16].mxu0  ;;  %v3319_v2 = vpop.f32.mrb[16].mxu1  ;;  %v723_v63 = vld [vmem:[#allocation2 + $0x70] sm:$0xff] }
 0x2b4   : > { %v3272_v4 = vpop.f32.mrb[17].mxu0  ;;  %v3320_v6 = vpop.f32.mrb[17].mxu1 }
 0x2b5   : > { %v3273_v7 = vadd.f32 %v3272_v4, %v3271_v1  ;;  %v3321_v8 = vadd.f32 %v3320_v6, %v3319_v2  ;;  %v3274_v9 = vpop.f32.mrb[18].mxu0  ;;  %v3322_v10 = vpop.f32.mrb[18].mxu1  ;;  %v739_v1 = vld [vmem:[#allocation2 + $0xf0] sm:$0xff] }
 0x2b6   : > { %v3275_v12 = vpop.f32.mrb[19].mxu0  ;;  %v3323_v14 = vpop.f32.mrb[19].mxu1 }
 0x2b7   : > { %v1198_v15 = vadd.f32 %v3273_v7, %v717_v3  ;;  %v1214_v16 = vadd.f32 %v3321_v8, %v733_v5  ;;  %v3276_v17 = vadd.f32 %v3275_v12, %v3274_v9  ;;  %v3324_v18 = vadd.f32 %v3323_v14, %v3322_v10  ;;  %v724_v7 = vld [vmem:[#allocation2 + $0x78] sm:$0xff] }
 0x2b8   : > { %v740_v9 = vld [vmem:[#allocation2 + $0xf8] sm:$0xff] }
 0x2b9   : > { %1230 = vst [vmem:[#allocation2 + $0x40] sm:$0xff] %v1198_v15  ;;  %1246 = vst [vmem:[#allocation2 + $0xc0] sm:$0xff] %v1214_v16  ;;  %v1199_v19 = vadd.f32 %v3276_v17, %v718_v11  ;;  %v1215_v20 = vadd.f32 %v3324_v18, %v734_v13  ;;  %v1324_v17 = vld [vmem:[%s5192_s25 + $0x10] sm:$0xff] (!%p3217_p6)  ;;  %v1322_v18 = vld [vmem:[%s5192_s25] sm:$0xff] (!%p3217_p6) }
 0x2bb   : > { %1231 = vst [vmem:[#allocation2 + $0x48] sm:$0xff] %v1199_v19  ;;  %1247 = vst [vmem:[#allocation2 + $0xc8] sm:$0xff] %v1215_v20  ;;  %v3277_v21 = vpop.f32.mrb[20].mxu0  ;;  %v3325_v22 = vpop.f32.mrb[20].mxu1  ;;  %v4631_v19 = vmov (!%p3217_p6), 0   ;;  %v1325_v20 = vld [vmem:[%s5192_s25 + $0x18] sm:$0xff] (!%p3217_p6) }
 0x2bc   : > { %v3278_v24 = vpop.f32.mrb[21].mxu0  ;;  %v3326_v26 = vpop.f32.mrb[21].mxu1  ;;  %4117 = vset.pattern.permute.xlu1 (!%p3217_p6), %v4631_v19  ;;  %4116 = vset.pattern.permute.xlu0 (!%p3217_p6), %v4631_v19 }
 0x2bd   : > { %v3279_v27 = vadd.f32 %v3278_v24, %v3277_v21  ;;  %v3327_v28 = vadd.f32 %v3326_v26, %v3325_v22  ;;  %v3280_v29 = vpop.f32.mrb[22].mxu0  ;;  %v3328_v30 = vpop.f32.mrb[22].mxu1  ;;  %1366 = vperm.xlu1 (!%p3217_p6), %4117, %v1324_v17   ;;  %1356 = vperm.xlu0 (!%p3217_p6), %4116, %v1322_v18   ;;  %v1323_v21 = vld [vmem:[%s5192_s25 + $0x8] sm:$0xff] (!%p3217_p6)  ;;  %v1329_v24 = vld [vmem:[%s5192_s25 + $0x38] sm:$0xff] (!%p3217_p6)  ;;  %v1546_v26 = vld [vmem:[#allocation11] sm:$0xff] (!%p3217_p6) }
 0x2be   : > { %v3281_v32 = vpop.f32.mrb[23].mxu0  ;;  %v3329_v34 = vpop.f32.mrb[23].mxu1  ;;  %v1327_v22 = vld [vmem:[%s5192_s25 + $0x28] sm:$0xff] (!%p3217_p6)  ;;  %v1346_v17 = vld [vmem:[%s5192_s25 + $0xc0] sm:$0xff] (!%p3217_p6)  ;;  %v1277_v18 = vld [vmem:[%s5186_s30 + $0x98] sm:$0xff] (!%p3217_p6) }
 0x2bf   : > { %v1200_v35 = vadd.f32 %v3279_v27, %v719_v23  ;;  %v1216_v36 = vadd.f32 %v3327_v28, %v735_v25  ;;  %v3282_v37 = vadd.f32 %v3281_v32, %v3280_v29  ;;  %v3330_v38 = vadd.f32 %v3329_v34, %v3328_v30  ;;  %v1326_v23 = vld [vmem:[%s5192_s25 + $0x20] sm:$0xff] (!%p3217_p6)  ;;  %v1328_v25 = vld [vmem:[%s5192_s25 + $0x30] sm:$0xff] (!%p3217_p6)  ;;  %v1547_v27 = vld [vmem:[#allocation11 + $0x8] sm:$0xff] (!%p3217_p6) }
 0x2c0   : > { %v3727_v28 = vpack.c.bf16 (!%p3217_p6), %v1547_v27, %v1546_v26  ;;  %v1548_v29 = vld [vmem:[#allocation11 + $0x10] sm:$0xff] (!%p3217_p6)  ;;  %v1549_v30 = vld [vmem:[#allocation11 + $0x18] sm:$0xff] (!%p3217_p6)  ;;  %v1550_v32 = vld [vmem:[#allocation11 + $0x20] sm:$0xff] (!%p3217_p6) }
 0x2c1   : > { %1232 = vst [vmem:[#allocation2 + $0x50] sm:$0xff] %v1200_v35  ;;  %1248 = vst [vmem:[#allocation2 + $0xd0] sm:$0xff] %v1216_v36  ;;  %v1201_v39 = vadd.f32 %v3282_v37, %v720_v31  ;;  %v1217_v40 = vadd.f32 %v3330_v38, %v736_v33  ;;  %1371 = vperm.xlu1 (!%p3217_p6), %4117, %v1325_v20   ;;  %1361 = vperm.xlu0 (!%p3217_p6), %4116, %v1323_v21   ;;  %v1551_v33 = vld [vmem:[#allocation11 + $0x28] sm:$0xff] (!%p3217_p6)  ;;  %v1330_v35 = vld [vmem:[%s5192_s25 + $0x40] sm:$0xff] (!%p3217_p6) }
 0x2c2   : > { %v3731_v31 = vpack.c.bf16 (!%p3217_p6), %v1549_v30, %v1548_v29  ;;  %v1331_v34 = vld [vmem:[%s5192_s25 + $0x48] sm:$0xff] (!%p3217_p6)  ;;  %3839 = vmatprep.subr.bf16.mxu1 (!%p3217_p6), %v3727_v28  ;;  %3728 = vmatprep.subr.bf16.mxu0 (!%p3217_p6), %v3727_v28  ;;  %v3735_v36 = vpack.c.bf16 (!%p3217_p6), %v1551_v33, %v1550_v32  ;;  %v1552_v37 = vld [vmem:[#allocation11 + $0x30] sm:$0xff] (!%p3217_p6)  ;;  %v1553_v38 = vld [vmem:[#allocation11 + $0x38] sm:$0xff] (!%p3217_p6) }
 0x2c3   : > { %1233 = vst [vmem:[#allocation2 + $0x58] sm:$0xff] %v1201_v39  ;;  %1249 = vst [vmem:[#allocation2 + $0xd8] sm:$0xff] %v1217_v40  ;;  %v3283_v41 = vpop.f32.mrb[24].mxu0  ;;  %v3331_v42 = vpop.f32.mrb[24].mxu1  ;;  %3847 = vmatpush3.bf16.msra.mxu1 (!%p3217_p6), %v3727_v28  ;;  %3730 = vmatpush3.bf16.msra.mxu0 (!%p3217_p6), %v3727_v28  ;;  %v1333_v39 = vld [vmem:[%s5192_s25 + $0x58] sm:$0xff] (!%p3217_p6)  ;;  %v1332_v40 = vld [vmem:[%s5192_s25 + $0x50] sm:$0xff] (!%p3217_p6) }
 0x2c4   : > { %v3284_v44 = vpop.f32.mrb[25].mxu0  ;;  %v3332_v46 = vpop.f32.mrb[25].mxu1  ;;  %3840 = vmatprep.subr.bf16.mxu1 (!%p3217_p6), %v3731_v31  ;;  %3732 = vmatprep.subr.bf16.mxu0 (!%p3217_p6), %v3731_v31  ;;  %v1261_v20 = vld [vmem:[%s5186_s30 + $0x18] sm:$0xff] (!%p3217_p6)  ;;  %v1278_v21 = vld [vmem:[%s5186_s30 + $0xa0] sm:$0xff] (!%p3217_p6)  ;;  %v1348_v27 = vld [vmem:[%s5192_s25 + $0xd0] sm:$0xff] (!%p3217_p6) }
 0x2c5   : > { %v3285_v47 = vadd.f32 %v3284_v44, %v3283_v41  ;;  %v3333_v48 = vadd.f32 %v3332_v46, %v3331_v42  ;;  %v3286_v49 = vpop.f32.mrb[26].mxu0  ;;  %v3334_v50 = vpop.f32.mrb[26].mxu1  ;;  %1381 = vperm.xlu1 (!%p3217_p6), %4117, %v1327_v22   ;;  %1376 = vperm.xlu0 (!%p3217_p6), %4116, %v1326_v23   ;;  %v3739_v41 = vpack.c.bf16 (!%p3217_p6), %v1553_v38, %v1552_v37  ;;  %v1554_v42 = vld [vmem:[#allocation11 + $0x40] sm:$0xff] (!%p3217_p6)  ;;  %v1896_v23 = vld [vmem:[#allocation14 + $0x30] sm:$0xff] (!%p3217_p6)  ;;  %v1279_v28 = vld [vmem:[%s5186_s30 + $0xa8] sm:$0xff] (!%p3217_p6) }
 0x2c6   : > { %v3287_v52 = vpop.f32.mrb[27].mxu0  ;;  %v3335_v54 = vpop.f32.mrb[27].mxu1  ;;  %v1274_v44 = vld [vmem:[%s5186_s30 + $0x80] sm:$0xff] (!%p3217_p6)  ;;  %v1349_v26 = vld [vmem:[%s5192_s25 + $0xd8] sm:$0xff] (!%p3217_p6)  ;;  %v1263_v29 = vld [vmem:[%s5186_s30 + $0x28] sm:$0xff] (!%p3217_p6) }
 0x2c7   : > { %v1202_v55 = vadd.f32 %v3285_v47, %v721_v43  ;;  %v1218_v56 = vadd.f32 %v3333_v48, %v737_v45  ;;  %v3288_v57 = vadd.f32 %v3287_v52, %v3286_v49  ;;  %v3336_v58 = vadd.f32 %v3335_v54, %v3334_v50  ;;  %3848 = vmatpush3.bf16.msra.mxu1 (!%p3217_p6), %v3731_v31  ;;  %v1555_v43 = vld [vmem:[#allocation11 + $0x48] sm:$0xff] (!%p3217_p6)  ;;  %v1334_v46 = vld [vmem:[%s5192_s25 + $0x60] sm:$0xff] (!%p3217_p6)  ;;  %v1556_v48 = vld [vmem:[#allocation11 + $0x50] sm:$0xff] (!%p3217_p6) }
 0x2c8   : > { %3734 = vmatpush3.bf16.msra.mxu0 (!%p3217_p6), %v3731_v31  ;;  %3841 = vmatprep.subr.bf16.mxu1 (!%p3217_p6), %v3735_v36  ;;  %v1335_v45 = vld [vmem:[%s5192_s25 + $0x68] sm:$0xff] (!%p3217_p6)  ;;  %v3743_v47 = vpack.c.bf16 (!%p3217_p6), %v1555_v43, %v1554_v42  ;;  %v1557_v49 = vld [vmem:[#allocation11 + $0x58] sm:$0xff] (!%p3217_p6)  ;;  %v1280_v30 = vld [vmem:[%s5186_s30 + $0xb0] sm:$0xff] (!%p3217_p6) }
 0x2c9   : > { %1234 = vst [vmem:[#allocation2 + $0x60] sm:$0xff] %v1202_v55  ;;  %1250 = vst [vmem:[#allocation2 + $0xe0] sm:$0xff] %v1218_v56  ;;  %v1203_v59 = vadd.f32 %v3288_v57, %v722_v51  ;;  %v1219_v60 = vadd.f32 %v3336_v58, %v738_v53  ;;  %1391 = vperm.xlu1 (!%p3217_p6), %4117, %v1329_v24   ;;  %1386 = vperm.xlu0 (!%p3217_p6), %4116, %v1328_v25   ;;  %v1337_v50 = vld [vmem:[%s5192_s25 + $0x78] sm:$0xff] (!%p3217_p6)  ;;  %v1336_v51 = vld [vmem:[%s5192_s25 + $0x70] sm:$0xff] (!%p3217_p6) }
 0x2ca   : > { %3736 = vmatprep.subr.bf16.mxu0 (!%p3217_p6), %v3735_v36  ;;  %3543 = vmatprep.mubr.f32.mxu1 (!%p3217_p6), %v1274_v44  ;;  %v3747_v52 = vpack.c.bf16 (!%p3217_p6), %v1557_v49, %v1556_v48  ;;  %v1558_v53 = vld [vmem:[#allocation11 + $0x60] sm:$0xff] (!%p3217_p6)  ;;  %v1559_v54 = vld [vmem:[#allocation11 + $0x68] sm:$0xff] (!%p3217_p6)  ;;  %v1560_v58 = vld [vmem:[#allocation11 + $0x70] sm:$0xff] (!%p3217_p6) }
 0x2cb   : > { %1235 = vst [vmem:[#allocation2 + $0x68] sm:$0xff] %v1203_v59  ;;  %1251 = vst [vmem:[#allocation2 + $0xe8] sm:$0xff] %v1219_v60  ;;  %v3289_v61 = vpop.f32.mrb[28].mxu0  ;;  %v3337_v62 = vpop.f32.mrb[28].mxu1  ;;  %3849 = vmatpush3.bf16.msra.mxu1 (!%p3217_p6), %v3735_v36  ;;  %v1339_v55 = vld [vmem:[%s5192_s25 + $0x88] sm:$0xff] (!%p3217_p6)  ;;  %v1338_v56 = vld [vmem:[%s5192_s25 + $0x80] sm:$0xff] (!%p3217_p6)  ;;  %v3751_v57 = vpack.c.bf16 (!%p3217_p6), %v1559_v54, %v1558_v53 }
 0x2cc   : > { %v3290_v0 = vpop.f32.mrb[29].mxu0  ;;  %v3338_v2 = vpop.f32.mrb[29].mxu1  ;;  %3738 = vmatpush3.bf16.msra.mxu0 (!%p3217_p6), %v3735_v36  ;;  %3842 = vmatprep.subr.bf16.mxu1 (!%p3217_p6), %v3739_v41  ;;  %v1561_v59 = vld [vmem:[#allocation11 + $0x78] sm:$0xff] (!%p3217_p6)  ;;  %v1262_v25 = vld [vmem:[%s5186_s30 + $0x20] sm:$0xff] (!%p3217_p6)  ;;  %v1899_v33 = vld [vmem:[#allocation14 + $0x48] sm:$0xff] (!%p3217_p6) }
 0x2cd   : > { %v3291_v3 = vadd.f32 %v3290_v0, %v3289_v61  ;;  %v3339_v4 = vadd.f32 %v3338_v2, %v3337_v62  ;;  %v3292_v5 = vpop.f32.mrb[30].mxu0  ;;  %v3340_v6 = vpop.f32.mrb[30].mxu1  ;;  %1257 = sbr.rel (%p3217_p6) target bundleno = 1336 (0x538), region = 116  ;;  %1401 = vperm.xlu1 (!%p3217_p6), %4117, %v1331_v34   ;;  %1396 = vperm.xlu0 (!%p3217_p6), %4116, %v1330_v35   ;;  %v1341_v60 = vld [vmem:[%s5192_s25 + $0x98] sm:$0xff] (!%p3217_p6)  ;;  %v1340_v61 = vld [vmem:[%s5192_s25 + $0x90] sm:$0xff] (!%p3217_p6)  ;;  %v3755_v62 = vpack.c.bf16 (!%p3217_p6), %v1561_v59, %v1560_v58  ;;  %v1343_v2 = vld [vmem:[%s5192_s25 + $0xa8] sm:$0xff] (!%p3217_p6) }
 0x2ce   : > { %v3293_v8 = vpop.f32.mrb[31].mxu0  ;;  %v3341_v10 = vpop.f32.mrb[31].mxu1  ;;  %3740 = vmatprep.subr.bf16.mxu0 (!%p3217_p6), %v3739_v41  ;;  %v1891_v0 = vld [vmem:[#allocation14 + $0x8] sm:$0xff] (!%p3217_p6)  ;;  %v1897_v24 = vld [vmem:[#allocation14 + $0x38] sm:$0xff] (!%p3217_p6)  ;;  %v1898_v32 = vld [vmem:[#allocation14 + $0x40] sm:$0xff] (!%p3217_p6) }
 0x2cf   : > { %v1204_v11 = vadd.f32 %v3291_v3, %v723_v63  ;;  %v1220_v12 = vadd.f32 %v3339_v4, %v739_v1  ;;  %v3294_v13 = vadd.f32 %v3293_v8, %v3292_v5  ;;  %v3342_v14 = vadd.f32 %v3341_v10, %v3340_v6  ;;  %3850 = vmatpush3.bf16.msra.mxu1 (!%p3217_p6), %v3739_v41  ;;  %v1890_v63 = vld [vmem:[#allocation14] sm:$0xff] (!%p3217_p6)  ;;  %v1892_v5 = vld [vmem:[#allocation14 + $0x10] sm:$0xff] (!%p3217_p6)  ;;  %v1893_v6 = vld [vmem:[#allocation14 + $0x18] sm:$0xff] (!%p3217_p6) }
 0x2d0   : > { %3742 = vmatpush3.bf16.msra.mxu0 (!%p3217_p6), %v3739_v41  ;;  %3843 = vmatprep.subr.bf16.mxu1 (!%p3217_p6), %v3743_v47  ;;  %v1258_v1 = vld [vmem:[%s5186_s30] sm:$0xff] (!%p3217_p6)  ;;  %v3759_v4 = vpack.c.bf16 (!%p3217_p6), %v1891_v0, %v1890_v63  ;;  %v1344_v8 = vld [vmem:[%s5192_s25 + $0xb0] sm:$0xff] (!%p3217_p6)  ;;  %v1259_v10 = vld [vmem:[%s5186_s30 + $0x8] sm:$0xff] (!%p3217_p6)  ;;  %v3771_v31 = vpack.c.bf16 (!%p3217_p6), %v1897_v24, %v1896_v23  ;;  %v3775_v42 = vpack.c.bf16 (!%p3217_p6), %v1899_v33, %v1898_v32 }
 0x2d1   : > { %1236 = vst [vmem:[#allocation2 + $0x70] sm:$0xff] %v1204_v11  ;;  %1252 = vst [vmem:[#allocation2 + $0xf0] sm:$0xff] %v1220_v12  ;;  %v1205_v15 = vadd.f32 %v3294_v13, %v724_v7  ;;  %v1221_v16 = vadd.f32 %v3342_v14, %v740_v9  ;;  %1411 = vperm.xlu1 (!%p3217_p6), %4117, %v1333_v39   ;;  %1406 = vperm.xlu0 (!%p3217_p6), %4116, %v1332_v40   ;;  %v1342_v3 = vld [vmem:[%s5192_s25 + $0xa0] sm:$0xff] (!%p3217_p6)  ;;  %v1345_v7 = vld [vmem:[%s5192_s25 + $0xb8] sm:$0xff] (!%p3217_p6) }
 0x2d2   : > { %3744 = vmatprep.subr.bf16.mxu0 (!%p3217_p6), %v3743_v47  ;;  %3519 = vmatprep.mubr.f32.mxu0 (!%p3217_p6), %v1258_v1  ;;  %v1275_v9 = vld [vmem:[%s5186_s30 + $0x88] sm:$0xff] (!%p3217_p6)  ;;  %v1276_v11 = vld [vmem:[%s5186_s30 + $0x90] sm:$0xff] (!%p3217_p6)  ;;  %v3763_v12 = vpack.c.bf16 (!%p3217_p6), %v1893_v6, %v1892_v5  ;;  %v1350_v36 = vld [vmem:[%s5192_s25 + $0xe0] sm:$0xff] (!%p3217_p6) }
 0x2d3   : > { %1237 = vst [vmem:[#allocation2 + $0x78] sm:$0xff] %v1205_v15  ;;  %1253 = vst [vmem:[#allocation2 + $0xf8] sm:$0xff] %v1221_v16  ;;  %3851 = vmatpush3.bf16.msra.mxu1 (!%p3217_p6), %v3743_v47  ;;  %v1894_v13 = vld [vmem:[#allocation14 + $0x20] sm:$0xff] (!%p3217_p6)  ;;  %v1895_v14 = vld [vmem:[#allocation14 + $0x28] sm:$0xff] (!%p3217_p6) }
 0x2d4   : > { %3746 = vmatpush3.bf16.msra.mxu0 %v3743_v47  ;;  %3844 = vmatprep.subr.bf16.mxu1 %v3747_v52  ;;  %v1260_v15 = vld [vmem:[%s5186_s30 + $0x10] sm:$0xff]  ;;  %v1347_v16 = vld [vmem:[%s5192_s25 + $0xc8] sm:$0xff]  ;;  %v3767_v22 = vpack.c.bf16 %v1895_v14, %v1894_v13  ;;  %v1281_v37 = vld [vmem:[%s5186_s30 + $0xb8] sm:$0xff] }
 0x2d5   : > { %1421 = vperm.xlu1 %4117, %v1335_v45   ;;  %1416 = vperm.xlu0 %4116, %v1334_v46   ;;  %v1264_v34 = vld [vmem:[%s5186_s30 + $0x30] sm:$0xff]  ;;  %v1351_v35 = vld [vmem:[%s5192_s25 + $0xe8] sm:$0xff]  ;;  %v1265_v38 = vld [vmem:[%s5186_s30 + $0x38] sm:$0xff] }
 0x2d6   : > { %3748 = vmatprep.subr.bf16.mxu0 %v3747_v52  ;;  %v2611_v39 = vld [vmem:[%s5194_s23 + $0x8] sm:$0xff]  ;;  %v2610_v40 = vld [vmem:[%s5194_s23] sm:$0xff]  ;;  %v1900_v43 = vld [vmem:[#allocation14 + $0x50] sm:$0xff] }
 0x2d7   : > { %3852 = vmatpush3.bf16.msra.mxu1 %v3747_v52  ;;  %v1282_v41 = vld [vmem:[%s5186_s30 + $0xc0] sm:$0xff]  ;;  %v1353_v46 = vld [vmem:[%s5192_s25 + $0xf8] sm:$0xff]  ;;  %v1352_v47 = vld [vmem:[%s5192_s25 + $0xf0] sm:$0xff]  ;;  %vm2643_vm0 = vcmp.gt.f32.partialorder %v2611_v39, 0.0  ;;  %vm2642_vm1 = vcmp.gt.f32.partialorder %v2610_v40, 0.0 }
 0x2d8   : > { %3750 = vmatpush3.bf16.msra.mxu0 %v3747_v52  ;;  %3845 = vmatprep.subr.bf16.mxu1 %v3751_v57  ;;  %v1901_v44 = vld [vmem:[#allocation14 + $0x58] sm:$0xff]  ;;  %v1283_v48 = vld [vmem:[%s5186_s30 + $0xc8] sm:$0xff]  ;;  %v1284_v52 = vld [vmem:[%s5186_s30 + $0xd0] sm:$0xff]  ;;  %v2674_v58 = vsel %vm2642_vm1, 1, %v4631_v19 }
 0x2d9   : > { %1431 = vperm.xlu1 %4117, %v1337_v50   ;;  %1426 = vperm.xlu0 %4116, %v1336_v51   ;;  %v1266_v45 = vld [vmem:[%s5186_s30 + $0x40] sm:$0xff]  ;;  %v1267_v49 = vld [vmem:[%s5186_s30 + $0x48] sm:$0xff]  ;;  %v2613_v50 = vld [vmem:[%s5194_s23 + $0x18] sm:$0xff]  ;;  %v3779_v53 = vpack.c.bf16 %v1901_v44, %v1900_v43 }
 0x2da   : > { %3752 = vmatprep.subr.bf16.mxu0 %v3751_v57  ;;  %v2612_v51 = vld [vmem:[%s5194_s23 + $0x10] sm:$0xff]  ;;  %v1902_v54 = vld [vmem:[#allocation14 + $0x60] sm:$0xff]  ;;  %vm2645_vm2 = vcmp.gt.f32.partialorder %v2613_v50, 0.0  ;;  %v1285_v59 = vld [vmem:[%s5186_s30 + $0xd8] sm:$0xff] }
 0x2db   : > { %3853 = vmatpush3.bf16.msra.mxu1 %v3751_v57  ;;  %vm2644_vm3 = vcmp.gt.f32.partialorder %v2612_v51, 0.0  ;;  %v1286_v63 = vld [vmem:[%s5186_s30 + $0xe0] sm:$0xff]  ;;  %v1904_v1 = vld [vmem:[#allocation14 + $0x70] sm:$0xff]  ;;  %v1287_v6 = vld [vmem:[%s5186_s30 + $0xe8] sm:$0xff] }
 0x2dc   : > { %3754 = vmatpush3.bf16.msra.mxu0 %v3751_v57  ;;  %3846 = vmatprep.subr.bf16.mxu1 %v3755_v62  ;;  %v2675_v57 = vsel %vm2643_vm0, 1, %v4631_v19  ;;  %v2676_v5 = vsel %vm2644_vm3, 1, %v4631_v19  ;;  %v2620_v23 = vld [vmem:[%s5194_s23 + $0x50] sm:$0xff]  ;;  %v2630_v43 = vld [vmem:[%s5194_s23 + $0xa0] sm:$0xff]  ;;  %v2635_v50 = vld [vmem:[%s5194_s23 + $0xc8] sm:$0xff] }
 0x2dd   : > { %1441 = vperm.xlu1 %4117, %v1339_v55   ;;  %1436 = vperm.xlu0 %4116, %v1338_v56   ;;  %v1903_v55 = vld [vmem:[#allocation14 + $0x68] sm:$0xff]  ;;  %vm2652_vm11 = vcmp.gt.f32.partialorder %v2620_v23, 0.0  ;;  %v2634_v51 = vld [vmem:[%s5194_s23 + $0xc0] sm:$0xff] }
 0x2de   : > { %3756 = vmatprep.subr.bf16.mxu0 %v3755_v62  ;;  %v1268_v56 = vld [vmem:[%s5186_s30 + $0x50] sm:$0xff]  ;;  %v3783_v0 = vpack.c.bf16 %v1903_v55, %v1902_v54  ;;  %v2637_v54 = vld [vmem:[%s5194_s23 + $0xd8] sm:$0xff] }
 0x2df   : > { %3854 = vmatpush3.bf16.msra.mxu1 %v3755_v62  ;;  %v2628_v39 = vld [vmem:[%s5194_s23 + $0x90] sm:$0xff] }
 0x2e0   : > { %3758 = vmatpush3.bf16.msra.mxu0 %v3755_v62  ;;  %3760 = vmatprep.subr.bf16.mxu1 %v3759_v4  ;;  %v2614_v62 = vld [vmem:[%s5194_s23 + $0x20] sm:$0xff]  ;;  %vm2660_vm3 = vcmp.gt.f32.partialorder %v2628_v39, 0.0  ;;  %v2636_v55 = vld [vmem:[%s5194_s23 + $0xd0] sm:$0xff] }
 0x2e1   : > { %1451 = vperm.xlu1 %4117, %v1341_v60   ;;  %1446 = vperm.xlu0 %4116, %v1340_v61   ;;  %v1269_v60 = vld [vmem:[%s5186_s30 + $0x58] sm:$0xff]  ;;  %v2615_v61 = vld [vmem:[%s5194_s23 + $0x28] sm:$0xff]  ;;  %vm2646_vm5 = vcmp.gt.f32.partialorder %v2614_v62, 0.0 }
 0x2e2   : > { %3544 = vmatmul.mubr.f32.vlgmr.msra.gmra.mrb[0].mxu1 %v1275_v9  ;;  %vm2647_vm4 = vcmp.gt.f32.partialorder %v2615_v61, 0.0  ;;  %v2616_v9 = vld [vmem:[%s5194_s23 + $0x30] sm:$0xff]  ;;  %v2678_v14 = vsel %vm2646_vm5, 1, %v4631_v19  ;;  %vm2662_vm5 = vcmp.gt.f32.partialorder %v2630_v43, 0.0  ;;  %v2641_v62 = vld [vmem:[%s5194_s23 + $0xf8] sm:$0xff] }
 0x2e3   : > { %3520 = vmatmul.mubr.f32.vlgmr.msra.gmra.mrb[0].mxu0 %v1259_v10  ;;  %3546 = vmatprep.mubr.f32.mxu1 %v1276_v11  ;;  %v1288_v10 = vld [vmem:[%s5186_s30 + $0xf0] sm:$0xff]  ;;  %v2679_v13 = vsel %vm2647_vm4, 1, %v4631_v19  ;;  %vm2648_vm7 = vcmp.gt.f32.partialorder %v2616_v9, 0.0  ;;  %v1291_v9 = vld [vmem:[#allocation2 + $0x8] sm:$0xff] }
 0x2e4   : > { %3762 = vmatpush3.bf16.msra.mxu1 %v3759_v4  ;;  %3522 = vmatprep.mubr.f32.mxu0 %v1260_v15  ;;  %v2677_v4 = vsel %vm2645_vm2, 1, %v4631_v19  ;;  %v1289_v15 = vld [vmem:[%s5186_s30 + $0xf8] sm:$0xff] }
 0x2e5   : > { %1461 = vperm.xlu1 %4117, %v1343_v2   ;;  %1456 = vperm.xlu0 %4116, %v1342_v3   ;;  %v1905_v2 = vld [vmem:[#allocation14 + $0x78] sm:$0xff] }
 0x2e6   : > { %3764 = vmatprep.subr.bf16.mxu1 %v3763_v12  ;;  %3547 = vmatmul.mubr.f32.gmra.mrb[2].mxu1 %v1277_v18  ;;  %v1270_v3 = vld [vmem:[%s5186_s30 + $0x60] sm:$0xff]  ;;  %v3787_v11 = vpack.c.bf16 %v1905_v2, %v1904_v1  ;;  %v2268_v39 = vld [vmem:[#allocation17 + $0x10] sm:$0xff] }
 0x2e7   : > { %3523 = vmatmul.mubr.f32.gmra.mrb[2].mxu0 %v1261_v20  ;;  %3549 = vmatprep.mubr.f32.mxu1 %v1278_v21  ;;  %v2618_v18 = vld [vmem:[%s5194_s23 + $0x40] sm:$0xff]  ;;  %v2680_v21 = vsel %vm2648_vm7, 1, %v4631_v19 }
 0x2e8   : > { %3766 = vmatpush3.bf16.msra.mxu1 %v3763_v12  ;;  %3525 = vmatprep.mubr.f32.mxu0 %v1262_v25  ;;  %v1272_v12 = vld [vmem:[%s5186_s30 + $0x70] sm:$0xff]  ;;  %vm2650_vm9 = vcmp.gt.f32.partialorder %v2618_v18, 0.0 }
 0x2e9   : > { %1471 = vperm.xlu1 %4117, %v1345_v7   ;;  %1466 = vperm.xlu0 %4116, %v1344_v8   ;;  %v1271_v7 = vld [vmem:[%s5186_s30 + $0x68] sm:$0xff]  ;;  %v2617_v8 = vld [vmem:[%s5194_s23 + $0x38] sm:$0xff]  ;;  %v2682_v25 = vsel %vm2650_vm9, 1, %v4631_v19  ;;  %vm2666_vm9 = vcmp.gt.f32.partialorder %v2634_v51, 0.0 }
 0x2ea   : > { %3768 = vmatprep.subr.bf16.mxu1 %v3767_v22  ;;  %3550 = vmatmul.mubr.f32.gmra.mrb[4].mxu1 %v1279_v28  ;;  %vm2649_vm6 = vcmp.gt.f32.partialorder %v2617_v8, 0.0 }
 0x2eb   : > { %3526 = vmatmul.mubr.f32.gmra.mrb[4].mxu0 %v1263_v29  ;;  %3552 = vmatprep.mubr.f32.mxu1 %v1280_v30  ;;  %v2681_v20 = vsel %vm2649_vm6, 1, %v4631_v19  ;;  %v2684_v29 = vsel %vm2652_vm11, 1, %v4631_v19  ;;  %v2625_v30 = vld [vmem:[%s5194_s23 + $0x78] sm:$0xff]  ;;  %vm2668_vm11 = vcmp.gt.f32.partialorder %v2636_v55, 0.0 }
 0x2ec   : > { %3770 = vmatpush3.bf16.msra.mxu1 %v3767_v22  ;;  %3528 = vmatprep.mubr.f32.mxu0 %v1264_v34  ;;  %v2621_v22 = vld [vmem:[%s5194_s23 + $0x58] sm:$0xff]  ;;  %vm2657_vm14 = vcmp.gt.f32.partialorder %v2625_v30, 0.0  ;;  %v2627_v34 = vld [vmem:[%s5194_s23 + $0x88] sm:$0xff]  ;;  %v2700_v61 = vsel %vm2668_vm11, 1, %v4631_v19 }
 0x2ed   : > { %1481 = vperm.xlu1 %4117, %v1347_v16   ;;  %1476 = vperm.xlu0 %4116, %v1346_v17   ;;  %v1273_v16 = vld [vmem:[%s5186_s30 + $0x78] sm:$0xff]  ;;  %v2619_v17 = vld [vmem:[%s5194_s23 + $0x48] sm:$0xff]  ;;  %vm2653_vm10 = vcmp.gt.f32.partialorder %v2621_v22, 0.0  ;;  %vm2659_vm0 = vcmp.gt.f32.partialorder %v2627_v34, 0.0 }
 0x2ee   : > { %3772 = vmatprep.subr.bf16.mxu1 %v3771_v31  ;;  %3553 = vmatmul.mubr.f32.gmra.mrb[6].mxu1 %v1281_v37  ;;  %vm2651_vm8 = vcmp.gt.f32.partialorder %v2619_v17, 0.0  ;;  %v2685_v28 = vsel %vm2653_vm10, 1, %v4631_v19  ;;  %v2691_v40 = vsel %vm2659_vm0, 1, %v4631_v19  ;;  %vm2669_vm10 = vcmp.gt.f32.partialorder %v2637_v54, 0.0  ;;  %v2266_v30 = vld [vmem:[#allocation17] sm:$0xff]  ;;  %v1304_v54 = vld [vmem:[#allocation2 + $0x70] sm:$0xff] }
 0x2ef   : > { %3529 = vmatmul.mubr.f32.gmra.mrb[6].mxu0 %v1265_v38  ;;  %3555 = vmatprep.mubr.f32.mxu1 %v1282_v41  ;;  %v2683_v24 = vsel %vm2651_vm8, 1, %v4631_v19  ;;  %v2629_v38 = vld [vmem:[%s5194_s23 + $0x98] sm:$0xff]  ;;  %vm2667_vm8 = vcmp.gt.f32.partialorder %v2635_v50, 0.0 }
 0x2f0   : > { %3774 = vmatpush3.bf16.msra.mxu1 %v3771_v31  ;;  %3531 = vmatprep.mubr.f32.mxu0 %v1266_v45  ;;  %v2624_v31 = vld [vmem:[%s5194_s23 + $0x70] sm:$0xff]  ;;  %vm2661_vm2 = vcmp.gt.f32.partialorder %v2629_v38, 0.0  ;;  %v2692_v45 = vsel %vm2660_vm3, 1, %v4631_v19 }
 0x2f1   : > { %1491 = vperm.xlu1 %4117, %v1349_v26   ;;  %1486 = vperm.xlu0 %4116, %v1348_v27   ;;  %v2623_v26 = vld [vmem:[%s5194_s23 + $0x68] sm:$0xff]  ;;  %v2622_v27 = vld [vmem:[%s5194_s23 + $0x60] sm:$0xff]  ;;  %vm2656_vm15 = vcmp.gt.f32.partialorder %v2624_v31, 0.0  ;;  %v2693_v44 = vsel %vm2661_vm2, 1, %v4631_v19 }
 0x2f2   : > { %3776 = vmatprep.subr.bf16.mxu1 %v3775_v42  ;;  %3556 = vmatmul.mubr.f32.gmra.mrb[8].mxu1 %v1283_v48  ;;  %vm2655_vm12 = vcmp.gt.f32.partialorder %v2623_v26, 0.0  ;;  %vm2654_vm13 = vcmp.gt.f32.partialorder %v2622_v27, 0.0  ;;  %v2688_v37 = vsel %vm2656_vm15, 1, %v4631_v19  ;;  %v1297_v26 = vld [vmem:[#allocation2 + $0x38] sm:$0xff]  ;;  %v1298_v27 = vld [vmem:[#allocation2 + $0x40] sm:$0xff]  ;;  %v2267_v31 = vld [vmem:[#allocation17 + $0x8] sm:$0xff] }
 0x2f3   : > { %3532 = vmatmul.mubr.f32.gmra.mrb[8].mxu0 %v1267_v49  ;;  %3558 = vmatprep.mubr.f32.mxu1 %v1284_v52  ;;  %v2687_v32 = vsel %vm2655_vm12, 1, %v4631_v19  ;;  %v2686_v33 = vsel %vm2654_vm13, 1, %v4631_v19  ;;  %v2694_v49 = vsel %vm2662_vm5, 1, %v4631_v19  ;;  %v3791_v34 = vpack.c.bf16 %v2267_v31, %v2266_v30 }
 0x2f4   : > { %3778 = vmatpush3.bf16.msra.mxu1 %v3775_v42  ;;  %3534 = vmatprep.mubr.f32.mxu0 %v1268_v56  ;;  %v2631_v42 = vld [vmem:[%s5194_s23 + $0xa8] sm:$0xff]  ;;  %v2699_v56 = vsel %vm2667_vm8, 1, %v4631_v19 }
 0x2f5   : > { %1501 = vperm.xlu1 %4117, %v1351_v35   ;;  %1496 = vperm.xlu0 %4116, %v1350_v36   ;;  %v2626_v35 = vld [vmem:[%s5194_s23 + $0x80] sm:$0xff]  ;;  %v2689_v36 = vsel %vm2657_vm14, 1, %v4631_v19  ;;  %vm2663_vm4 = vcmp.gt.f32.partialorder %v2631_v42, 0.0  ;;  %vm2673_vm14 = vcmp.gt.f32.partialorder %v2641_v62, 0.0  ;;  %v1305_v62 = vld [vmem:[#allocation2 + $0x78] sm:$0xff] }
 0x2f6   : > { %3780 = vmatprep.subr.bf16.mxu1 %v3779_v53  ;;  %3559 = vmatmul.mubr.f32.gmra.mrb[10].mxu1 %v1285_v59  ;;  %vm2658_vm1 = vcmp.gt.f32.partialorder %v2626_v35, 0.0  ;;  %v2695_v48 = vsel %vm2663_vm4, 1, %v4631_v19  ;;  %v2638_v59 = vld [vmem:[%s5194_s23 + $0xe0] sm:$0xff]  ;;  %v2705_v2 = vsel %vm2673_vm14, 1, %v4631_v19  ;;  %v1299_v35 = vld [vmem:[#allocation2 + $0x48] sm:$0xff] }
 0x2f7   : > { %3535 = vmatmul.mubr.f32.gmra.mrb[10].mxu0 %v1269_v60  ;;  %3561 = vmatprep.mubr.f32.mxu1 %v1286_v63  ;;  %v2690_v41 = vsel %vm2658_vm1, 1, %v4631_v19  ;;  %v2701_v60 = vsel %vm2669_vm10, 1, %v4631_v19  ;;  %vm2670_vm13 = vcmp.gt.f32.partialorder %v2638_v59, 0.0  ;;  %v2640_v63 = vld [vmem:[%s5194_s23 + $0xf0] sm:$0xff] }
 0x2f8   : > { %3782 = vmatpush3.bf16.msra.mxu1 %v3779_v53  ;;  %3537 = vmatprep.mubr.f32.mxu0 %v1270_v3  ;;  %v2702_v1 = vsel %vm2670_vm13, 1, %v4631_v19  ;;  %vm2672_vm15 = vcmp.gt.f32.partialorder %v2640_v63, 0.0  ;;  %v1306_v63 = vld [vmem:[#allocation2 + $0x80] sm:$0xff] }
 0x2f9   : > { %1511 = vperm.xlu1 %4117, %v1353_v46   ;;  %1506 = vperm.xlu0 %4116, %v1352_v47   ;;  %v2633_v46 = vld [vmem:[%s5194_s23 + $0xb8] sm:$0xff]  ;;  %v2632_v47 = vld [vmem:[%s5194_s23 + $0xb0] sm:$0xff]  ;;  %v2704_v3 = vsel %vm2672_vm15, 1, %v4631_v19 }
 0x2fa   : > { %3784 = vmatprep.subr.bf16.mxu1 %v3783_v0  ;;  %3562 = vmatmul.mubr.f32.gmra.mrb[12].mxu1 %v1287_v6  ;;  %vm2665_vm6 = vcmp.gt.f32.partialorder %v2633_v46, 0.0  ;;  %vm2664_vm7 = vcmp.gt.f32.partialorder %v2632_v47, 0.0 }
 0x2fb   : > { %3538 = vmatmul.mubr.f32.gmra.mrb[12].mxu0 %v1271_v7  ;;  %3564 = vmatprep.mubr.f32.mxu1 %v1288_v10  ;;  %v2697_v52 = vsel %vm2665_vm6, 1, %v4631_v19  ;;  %v2696_v53 = vsel %vm2664_vm7, 1, %v4631_v19  ;;  %v1292_v7 = vld [vmem:[#allocation2 + $0x10] sm:$0xff] }
 0x2fc   : > { %3786 = vmatpush3.bf16.msra.mxu1 %v3783_v0  ;;  %3540 = vmatprep.mubr.f32.mxu0 %v1272_v12 }
 0x2fd   : > { %2710 = vperm.xlu1 %4117, %v2675_v57   ;;  %2707 = vperm.xlu0 %4116, %v2674_v58   ;;  %v2698_v57 = vsel %vm2666_vm9, 1, %v4631_v19  ;;  %v2639_v58 = vld [vmem:[%s5194_s23 + $0xe8] sm:$0xff] }
 0x2fe   : > { %3788 = vmatprep.subr.bf16.mxu1 %v3787_v11  ;;  %3565 = vmatmul.mubr.f32.gmra.mrb[14].mxu1 %v1289_v15  ;;  %vm2671_vm12 = vcmp.gt.f32.partialorder %v2639_v58, 0.0  ;;  %v1294_v15 = vld [vmem:[#allocation2 + $0x20] sm:$0xff] }
 0x2ff   : > { %3541 = vmatmul.mubr.f32.gmra.mrb[14].mxu0 %v1273_v16  ;;  %v2703_v0 = vsel %vm2671_vm12, 1, %v4631_v19  ;;  %3792 = vmatprep.subr.bf16.mxu0 %v3791_v34  ;;  %v2273_v58 = vld [vmem:[#allocation17 + $0x38] sm:$0xff] }
 0x300   : > { %3790 = vmatpush3.bf16.msra.mxu1 %v3787_v11  ;;  %3794 = vmatpush3.bf16.msra.mxu0 %v3791_v34  ;;  %v1315_v34 = vld [vmem:[#allocation2 + $0xc8] sm:$0xff] }
 0x301   : > { %2716 = vperm.xlu1 %4117, %v2677_v4   ;;  %2713 = vperm.xlu0 %4116, %v2676_v5   ;;  %v1290_v4 = vld [vmem:[#allocation2] sm:$0xff] }
 0x305   : > { %2722 = vperm.xlu1 %4117, %v2679_v13   ;;  %2719 = vperm.xlu0 %4116, %v2678_v14   ;;  %v1293_v14 = vld [vmem:[#allocation2 + $0x18] sm:$0xff] }
 0x309   : > { %2728 = vperm.xlu1 %4117, %v2681_v20   ;;  %2725 = vperm.xlu0 %4116, %v2680_v21   ;;  %v1295_v20 = vld [vmem:[#allocation2 + $0x28] sm:$0xff]  ;;  %v1296_v21 = vld [vmem:[#allocation2 + $0x30] sm:$0xff] }
 0x30d   : > { %2734 = vperm.xlu1 %4117, %v2683_v24   ;;  %2731 = vperm.xlu0 %4116, %v2682_v25  }
 0x311   : > { %2740 = vperm.xlu1 %4117, %v2685_v28   ;;  %2737 = vperm.xlu0 %4116, %v2684_v29  }
 0x315   : > { %2746 = vperm.xlu1 %4117, %v2687_v32   ;;  %2743 = vperm.xlu0 %4116, %v2686_v33  }
 0x319   : > { %2752 = vperm.xlu1 %4117, %v2689_v36   ;;  %2749 = vperm.xlu0 %4116, %v2688_v37   ;;  %v1300_v36 = vld [vmem:[#allocation2 + $0x50] sm:$0xff] }
 0x31d   : > { %2758 = vperm.xlu1 %4117, %v2691_v40   ;;  %2755 = vperm.xlu0 %4116, %v2690_v41   ;;  %v2269_v40 = vld [vmem:[#allocation17 + $0x18] sm:$0xff] }
 0x31e   : > { %v3795_v43 = vpack.c.bf16 %v2269_v40, %v2268_v39  ;;  %v1317_v40 = vld [vmem:[#allocation2 + $0xd8] sm:$0xff] }
 0x320   : > { %3796 = vmatprep.subr.bf16.mxu0 %v3795_v43 }
 0x321   : > { %2764 = vperm.xlu1 %4117, %v2693_v44   ;;  %2761 = vperm.xlu0 %4116, %v2692_v45   ;;  %v1301_v44 = vld [vmem:[#allocation2 + $0x58] sm:$0xff]  ;;  %v1302_v45 = vld [vmem:[#allocation2 + $0x60] sm:$0xff] }
 0x322   : > { %3798 = vmatpush3.bf16.msra.mxu0 %v3795_v43 }
 0x325   : > { %2770 = vperm.xlu1 %4117, %v2695_v48   ;;  %2767 = vperm.xlu0 %4116, %v2694_v49   ;;  %v2270_v48 = vld [vmem:[#allocation17 + $0x20] sm:$0xff]  ;;  %v2271_v49 = vld [vmem:[#allocation17 + $0x28] sm:$0xff] }
 0x329   : > { %2776 = vperm.xlu1 %4117, %v2697_v52   ;;  %2773 = vperm.xlu0 %4116, %v2696_v53   ;;  %v3799_v52 = vpack.c.bf16 %v2271_v49, %v2270_v48  ;;  %v1303_v53 = vld [vmem:[#allocation2 + $0x68] sm:$0xff] }
 0x32b   : > { %3800 = vmatprep.subr.bf16.mxu0 %v3799_v52 }
 0x32c   : > { %3802 = vmatpush3.bf16.msra.mxu0 %v3799_v52  ;;  %v1321_v52 = vld [vmem:[#allocation2 + $0xf8] sm:$0xff] }
 0x32d   : > { %2782 = vperm.xlu1 %4117, %v2699_v56   ;;  %2779 = vperm.xlu0 %4116, %v2698_v57   ;;  %v2272_v57 = vld [vmem:[#allocation17 + $0x30] sm:$0xff] }
 0x331   : > { %2788 = vperm.xlu1 %4117, %v2701_v60   ;;  %2785 = vperm.xlu0 %4116, %v2700_v61   ;;  %v3803_v61 = vpack.c.bf16 %v2273_v58, %v2272_v57  ;;  %v2280_v57 = vld [vmem:[#allocation17 + $0x70] sm:$0xff]  ;;  %v2281_v58 = vld [vmem:[#allocation17 + $0x78] sm:$0xff] }
 0x333   : > { %3804 = vmatprep.subr.bf16.mxu0 %v3803_v61 }
 0x334   : > { %3806 = vmatpush3.bf16.msra.mxu0 %v3803_v61 }
 0x335   : > { %2794 = vperm.xlu1 %4117, %v2703_v0   ;;  %2791 = vperm.xlu0 %4116, %v2702_v1  }
 0x339   : > { %2800 = vperm.xlu1 %4117, %v2705_v2   ;;  %2797 = vperm.xlu0 %4116, %v2704_v3   ;;  %v2274_v2 = vld [vmem:[#allocation17 + $0x40] sm:$0xff]  ;;  %v2275_v3 = vld [vmem:[#allocation17 + $0x48] sm:$0xff] }
 0x33c   : > { %v1367_v5 = vpop.permute.xlu1 %1366  ;;  %v1357_v6 = vpop.permute.xlu0 %1356 }
 0x33d   : > { %v1514_v8 = vmul.f32 %v1357_v6, %v1290_v4  ;;  %v1516_v10 = vmul.f32 %v1367_v5, %v1292_v7  ;;  %v3807_v6 = vpack.c.bf16 %v2275_v3, %v2274_v2  ;;  %v2276_v7 = vld [vmem:[#allocation17 + $0x50] sm:$0xff] }
 0x33f   : > { %3599 = vmatprep.mubr.f32.mxu1 %v1514_v8  ;;  %v2277_v8 = vld [vmem:[#allocation17 + $0x58] sm:$0xff]  ;;  %3808 = vmatprep.subr.bf16.mxu0 %v3807_v6 }
 0x340   : > { %v1372_v11 = vpop.permute.xlu1 %1371  ;;  %v1362_v12 = vpop.permute.xlu0 %1361  ;;  %3810 = vmatpush3.bf16.msra.mxu0 %v3807_v6 }
 0x341   : > { %v1515_v13 = vmul.f32 %v1362_v12, %v1291_v9  ;;  %v1517_v19 = vmul.f32 %v1372_v11, %v1293_v14  ;;  %v1307_v9 = vld [vmem:[#allocation2 + $0x88] sm:$0xff]  ;;  %v3811_v11 = vpack.c.bf16 %v2277_v8, %v2276_v7 }
 0x343   : > { %3600 = vmatmul.mubr.f32.vlgmr.msra.gmra.mrb[16].mxu1 %v1515_v13  ;;  %3812 = vmatprep.subr.bf16.mxu0 %v3811_v11 }
 0x344   : > { %v1382_v16 = vpop.permute.xlu1 %1381  ;;  %v1377_v17 = vpop.permute.xlu0 %1376  ;;  %3602 = vmatprep.mubr.f32.mxu1 %v1516_v10  ;;  %v1308_v10 = vld [vmem:[#allocation2 + $0x90] sm:$0xff]  ;;  %3814 = vmatpush3.bf16.msra.mxu0 %v3811_v11 }
 0x345   : > { %v1518_v18 = vmul.f32 %v1377_v17, %v1294_v15  ;;  %v1519_v24 = vmul.f32 %v1382_v16, %v1295_v20  ;;  %v1309_v16 = vld [vmem:[#allocation2 + $0x98] sm:$0xff]  ;;  %v1310_v17 = vld [vmem:[#allocation2 + $0xa0] sm:$0xff] }
 0x347   : > { %3603 = vmatmul.mubr.f32.gmra.mrb[18].mxu1 %v1517_v19 }
 0x348   : > { %v1392_v22 = vpop.permute.xlu1 %1391  ;;  %v1387_v23 = vpop.permute.xlu0 %1386  ;;  %3605 = vmatprep.mubr.f32.mxu1 %v1518_v18 }
 0x349   : > { %v1520_v25 = vmul.f32 %v1387_v23, %v1296_v21  ;;  %v1521_v32 = vmul.f32 %v1392_v22, %v1297_v26  ;;  %v1311_v22 = vld [vmem:[#allocation2 + $0xa8] sm:$0xff]  ;;  %v1312_v23 = vld [vmem:[#allocation2 + $0xb0] sm:$0xff] }
 0x34b   : > { %3606 = vmatmul.mubr.f32.gmra.mrb[20].mxu1 %v1519_v24 }
 0x34c   : > { %v1402_v28 = vpop.permute.xlu1 %1401  ;;  %v1397_v29 = vpop.permute.xlu0 %1396  ;;  %3608 = vmatprep.mubr.f32.mxu1 %v1520_v25 }
 0x34d   : > { %v1522_v33 = vmul.f32 %v1397_v29, %v1298_v27  ;;  %v1523_v41 = vmul.f32 %v1402_v28, %v1299_v35  ;;  %v1313_v28 = vld [vmem:[#allocation2 + $0xb8] sm:$0xff]  ;;  %v1314_v29 = vld [vmem:[#allocation2 + $0xc0] sm:$0xff]  ;;  %v1316_v35 = vld [vmem:[#allocation2 + $0xd0] sm:$0xff] }
 0x34f   : > { %3609 = vmatmul.mubr.f32.gmra.mrb[22].mxu1 %v1521_v32 }
 0x350   : > { %v1412_v37 = vpop.permute.xlu1 %1411  ;;  %v1407_v38 = vpop.permute.xlu0 %1406  ;;  %3611 = vmatprep.mubr.f32.mxu1 %v1522_v33 }
 0x351   : > { %v1524_v42 = vmul.f32 %v1407_v38, %v1300_v36  ;;  %v1525_v50 = vmul.f32 %v1412_v37, %v1301_v44 }
 0x353   : > { %3612 = vmatmul.mubr.f32.gmra.mrb[24].mxu1 %v1523_v41  ;;  %v1318_v41 = vld [vmem:[#allocation2 + $0xe0] sm:$0xff] }
 0x354   : > { %v1422_v46 = vpop.permute.xlu1 %1421  ;;  %v1417_v47 = vpop.permute.xlu0 %1416  ;;  %3614 = vmatprep.mubr.f32.mxu1 %v1524_v42 }
 0x355   : > { %v1526_v51 = vmul.f32 %v1417_v47, %v1302_v45  ;;  %v1527_v59 = vmul.f32 %v1422_v46, %v1303_v53  ;;  %v1319_v46 = vld [vmem:[#allocation2 + $0xe8] sm:$0xff]  ;;  %v1320_v47 = vld [vmem:[#allocation2 + $0xf0] sm:$0xff] }
 0x357   : > { %3615 = vmatmul.mubr.f32.gmra.mrb[26].mxu1 %v1525_v50 }
 0x358   : > { %v1432_v55 = vpop.permute.xlu1 %1431  ;;  %v1427_v56 = vpop.permute.xlu0 %1426  ;;  %3617 = vmatprep.mubr.f32.mxu1 %v1526_v51 }
 0x359   : > { %v1528_v60 = vmul.f32 %v1427_v56, %v1304_v54  ;;  %v1529_v4 = vmul.f32 %v1432_v55, %v1305_v62  ;;  %v2278_v54 = vld [vmem:[#allocation17 + $0x60] sm:$0xff]  ;;  %v2279_v55 = vld [vmem:[#allocation17 + $0x68] sm:$0xff] }
 0x35a   : > { %v3815_v56 = vpack.c.bf16 %v2279_v55, %v2278_v54 }
 0x35b   : > { %3618 = vmatmul.mubr.f32.gmra.mrb[28].mxu1 %v1527_v59  ;;  %v3819_v59 = vpack.c.bf16 %v2281_v58, %v2280_v57 }
 0x35c   : > { %v1442_v0 = vpop.permute.xlu1 %1441  ;;  %v1437_v1 = vpop.permute.xlu0 %1436  ;;  %3620 = vmatprep.mubr.f32.mxu1 %v1528_v60  ;;  %3816 = vmatprep.subr.bf16.mxu0 %v3815_v56 }
 0x35d   : > { %v1530_v5 = vmul.f32 %v1437_v1, %v1306_v63  ;;  %v1531_v14 = vmul.f32 %v1442_v0, %v1307_v9  ;;  %3818 = vmatpush3.bf16.msra.mxu0 %v3815_v56 }
 0x35e   : > { %3820 = vmatprep.subr.bf16.mxu0 %v3819_v59 }
 0x35f   : > { %3621 = vmatmul.mubr.f32.gmra.mrb[30].mxu1 %v1529_v4 }
 0x360   : > { %v1452_v12 = vpop.permute.xlu1 %1451  ;;  %v1447_v13 = vpop.permute.xlu0 %1446  ;;  %3623 = vmatprep.mubr.f32.mxu1 %v1530_v5 }
 0x361   : > { %v1532_v15 = vmul.f32 %v1447_v13, %v1308_v10  ;;  %v1533_v20 = vmul.f32 %v1452_v12, %v1309_v16  ;;  %3822 = vmatpush3.bf16.msra.mxu0 %v3819_v59 }
 0x363   : > { %3624 = vmatmul.mubr.f32.gmra.mrb[32].mxu1 %v1531_v14 }
 0x364   : > { %v1462_v19 = vpop.permute.xlu1 %1461  ;;  %v1457_v18 = vpop.permute.xlu0 %1456  ;;  %3626 = vmatprep.mubr.f32.mxu1 %v1532_v15 }
 0x365   : > { %v1534_v21 = vmul.f32 %v1457_v18, %v1310_v17  ;;  %v1535_v26 = vmul.f32 %v1462_v19, %v1311_v22 }
 0x367   : > { %3627 = vmatmul.mubr.f32.gmra.mrb[34].mxu1 %v1533_v20 }
 0x368   : > { %v1472_v24 = vpop.permute.xlu1 %1471  ;;  %v1467_v25 = vpop.permute.xlu0 %1466  ;;  %3629 = vmatprep.mubr.f32.mxu1 %v1534_v21 }
 0x369   : > { %v1536_v27 = vmul.f32 %v1467_v25, %v1312_v23  ;;  %v1537_v32 = vmul.f32 %v1472_v24, %v1313_v28  ;;  %v5439_v28 = vld [vmem:[#allocation12] ss:$0 sm:$0xff] }
 0x36b   : > { %3630 = vmatmul.mubr.f32.gmra.mrb[36].mxu1 %v1535_v26 }
 0x36c   : > { %v1482_v30 = vpop.permute.xlu1 %1481  ;;  %v1477_v31 = vpop.permute.xlu0 %1476  ;;  %3632 = vmatprep.mubr.f32.mxu1 %v1536_v27 }
 0x36d   : > { %v1538_v33 = vmul.f32 %v1477_v31, %v1314_v29  ;;  %v1539_v38 = vmul.f32 %v1482_v30, %v1315_v34 }
 0x36f   : > { %3633 = vmatmul.mubr.f32.gmra.mrb[38].mxu1 %v1537_v32 }
 0x370   : > { %v1492_v36 = vpop.permute.xlu1 %1491  ;;  %v1487_v37 = vpop.permute.xlu0 %1486  ;;  %3635 = vmatprep.mubr.f32.mxu1 %v1538_v33 }
 0x371   : > { %v1540_v39 = vmul.f32 %v1487_v37, %v1316_v35  ;;  %v1541_v44 = vmul.f32 %v1492_v36, %v1317_v40 }
 0x373   : > { %3636 = vmatmul.mubr.f32.gmra.mrb[40].mxu1 %v1539_v38 }
 0x374   : > { %v1502_v42 = vpop.permute.xlu1 %1501  ;;  %v1497_v43 = vpop.permute.xlu0 %1496  ;;  %3638 = vmatprep.mubr.f32.mxu1 %v1540_v39 }
 0x375   : > { %v1542_v45 = vmul.f32 %v1497_v43, %v1318_v41  ;;  %v1543_v49 = vmul.f32 %v1502_v42, %v1319_v46  ;;  %v5453_v41 = vld [vmem:[#allocation15] ss:$0 sm:$0xff] }
 0x377   : > { %3639 = vmatmul.mubr.f32.gmra.mrb[42].mxu1 %v1541_v44 }
 0x378   : > { %v1507_v48 = vpop.permute.xlu0 %1506  ;;  %3641 = vmatprep.mubr.f32.mxu1 %v1542_v45  ;;  %v1512_v51 = vpop.permute.xlu1 %1511 }
 0x379   : > { %v1544_v50 = vmul.f32 %v1507_v48, %v1320_v47  ;;  %v1545_v53 = vmul.f32 %v1512_v51, %v1321_v52 }
 0x37b   : > { %3642 = vmatmul.mubr.f32.gmra.mrb[44].mxu1 %v1543_v49 }
 0x37c   : > { %3644 = vmatprep.mubr.f32.mxu1 %v1544_v50 }
 0x37f   : > { %3645 = vmatmul.mubr.f32.gmra.mrb[46].mxu1 %v1545_v53 }
 0x3b5   : > { %v3545_v60 = vpop.f32.mrb[0].mxu1 }
 0x3b6   : > { %v3521_v61 = vpop.f32.mrb[0].mxu0  ;;  %v1715_v62 = vpop.f32.mrb[1].mxu1  ;;  %v1721_v29 = vadd.f32 %v3545_v60, %v5439_v28 }
 0x3b7   : > { %v1635_v63 = vpop.f32.mrb[1].mxu0  ;;  %v1716_v30 = vadd.f32 %v5439_v28, %v1715_v62  ;;  %v1641_v31 = vadd.f32 %v3521_v61, %v5439_v28 }
 0x3b8   : > { %v1636_v32 = vadd.f32 %v5439_v28, %v1635_v63  ;;  %v1843_v34 = vmul.f32 0.2, %v1721_v29  ;;  %vm1811_vm2 = vcmp.ge.f32.partialorder %v1721_v29, 0.0 }
 0x3b9   : > { %v3548_v0 = vpop.f32.mrb[2].mxu1  ;;  %v1842_v35 = vmul.f32 0.2, %v1716_v30  ;;  %v1827_v37 = vmul.f32 0.2, %v1641_v31  ;;  %vm1810_vm0 = vcmp.ge.f32.partialorder %v1716_v30, 0.0 }
 0x3ba   : > { %v3524_v1 = vpop.f32.mrb[2].mxu0  ;;  %v1725_v2 = vpop.f32.mrb[3].mxu1  ;;  %v5447_v36 = vadd.f32 %v3548_v0, %v5439_v28  ;;  %vm1795_vm1 = vcmp.ge.f32.partialorder %v1641_v31, 0.0  ;;  %v1826_v40 = vmul.f32 0.2, %v1636_v32  ;;  %vm1794_vm3 = vcmp.ge.f32.partialorder %v1636_v32, 0.0 }
 0x3bb   : > { %v1645_v3 = vpop.f32.mrb[3].mxu0  ;;  %v1651_v33 = vadd.f32 %v3524_v1, %v5439_v28  ;;  %v5450_v38 = vadd.f32 %v5439_v28, %v1725_v2  ;;  %v1859_v45 = vsel %vm1795_vm1, %v1641_v31, %v1827_v37  ;;  %v5459_v46 = vsel %vm1810_vm0, %v1716_v30, %v1842_v35 }
 0x3bc   : > { %v1646_v39 = vadd.f32 %v5439_v28, %v1645_v3  ;;  %v5457_v44 = vmul.f32 0.2, %v5447_v36  ;;  %v5465_v51 = vsel %vm1811_vm2, %v1721_v29, %v1843_v34  ;;  %v1858_v55 = vsel %vm1794_vm3, %v1636_v32, %v1826_v40 }
 0x3bd   : > { %v3551_v4 = vpop.f32.mrb[4].mxu1  ;;  %v1829_v42 = vmul.f32 0.2, %v1651_v33  ;;  %vm1797_vm4 = vcmp.ge.f32.partialorder %v1651_v33, 0.0  ;;  %v5462_v47 = vmul.f32 0.2, %v5450_v38 }
 0x3be   : > { %v3527_v5 = vpop.f32.mrb[4].mxu0  ;;  %v1735_v6 = vpop.f32.mrb[5].mxu1  ;;  %v1828_v49 = vmul.f32 0.2, %v1646_v39  ;;  %v5468_v52 = vadd.f32 %v3551_v4, %v5439_v28  ;;  %vm1796_vm5 = vcmp.ge.f32.partialorder %v1646_v39, 0.0 }
 0x3bf   : > { %v1655_v7 = vpop.f32.mrb[5].mxu0  ;;  %v1661_v43 = vadd.f32 %v3527_v5, %v5439_v28  ;;  %v5473_v56 = vadd.f32 %v5439_v28, %v1735_v6  ;;  %v1861_v59 = vsel %vm1797_vm4, %v1651_v33, %v1829_v42 }
 0x3c0   : > { %v1656_v50 = vadd.f32 %v5439_v28, %v1655_v7  ;;  %v1860_v0 = vsel %vm1796_vm5, %v1646_v39, %v1828_v49 }
 0x3c1   : > { %v5401_v8 = vpop.f32.mrb[6].mxu1  ;;  %v1831_v58 = vmul.f32 0.2, %v1661_v43  ;;  %vm1799_vm7 = vcmp.ge.f32.partialorder %v1661_v43, 0.0 }
 0x3c2   : > { %v3530_v9 = vpop.f32.mrb[6].mxu0  ;;  %v5403_v10 = vpop.f32.mrb[7].mxu1  ;;  %vm1798_vm9 = vcmp.ge.f32.partialorder %v1656_v50, 0.0  ;;  %v1830_v4 = vmul.f32 0.2, %v1656_v50 }
 0x3c3   : > { %v5405_v11 = vpop.f32.mrb[7].mxu0  ;;  %v1671_v61 = vadd.f32 %v3530_v9, %v5439_v28  ;;  %v1863_v30 = vsel %vm1799_vm7, %v1661_v43, %v1831_v58 }
 0x3c4   : > { %v1666_v5 = vadd.f32 %v5439_v28, %v5405_v11  ;;  %v1862_v40 = vsel %vm1798_vm9, %v1656_v50, %v1830_v4 }
 0x3c5   : > { %v5407_v12 = vpop.f32.mrb[8].mxu1  ;;  %vm1801_vm11 = vcmp.ge.f32.partialorder %v1671_v61, 0.0  ;;  %v1833_v34 = vmul.f32 0.2, %v1671_v61 }
 0x3c6   : > { %v5409_v13 = vpop.f32.mrb[8].mxu0  ;;  %v5411_v14 = vpop.f32.mrb[9].mxu1  ;;  %vm1800_vm13 = vcmp.ge.f32.partialorder %v1666_v5, 0.0 }
 0x3c7   : > { %v5413_v15 = vpop.f32.mrb[9].mxu0  ;;  %v1681_v35 = vadd.f32 %v5409_v13, %v5439_v28 }
 0x3c9   : > { %v5415_v16 = vpop.f32.mrb[10].mxu1  ;;  %vm1803_vm0 = vcmp.ge.f32.partialorder %v1681_v35, 0.0  ;;  %v1835_v58 = vmul.f32 0.2, %v1681_v35 }
 0x3ca   : > { %v5417_v17 = vpop.f32.mrb[10].mxu0  ;;  %v5419_v19 = vpop.f32.mrb[11].mxu1 }
 0x3cb   : > { %v5421_v18 = vpop.f32.mrb[11].mxu0 }
 0x3cd   : > { %v5423_v20 = vpop.f32.mrb[12].mxu1 }
 0x3ce   : > { %v5425_v21 = vpop.f32.mrb[12].mxu0  ;;  %v5427_v22 = vpop.f32.mrb[13].mxu1 }
 0x3cf   : > { %v5429_v23 = vpop.f32.mrb[13].mxu0 }
 0x3d1   : > { %v5431_v24 = vpop.f32.mrb[14].mxu1 }
 0x3d2   : > { %v5433_v25 = vpop.f32.mrb[14].mxu0  ;;  %v5435_v26 = vpop.f32.mrb[15].mxu1 }
 0x3d3   : > { %v5437_v27 = vpop.f32.mrb[15].mxu0 }
 0x416   : > { %v3601_v48 = vpop.f32.mrb[16].mxu1 }
 0x417   : > { %v1985_v53 = vadd.f32 %v3601_v48, %v5453_v41  ;;  %v1979_v54 = vpop.f32.mrb[17].mxu1 }
 0x418   : > { %v1980_v57 = vadd.f32 %v5453_v41, %v1979_v54 }
 0x419   : > { %vm2139_vm6 = vcmp.ge.f32.partialorder %v1985_v53, 0.0  ;;  %v2171_v60 = vmul.f32 0.2, %v1985_v53 }
 0x41a   : > { %vm2138_vm8 = vcmp.ge.f32.partialorder %v1980_v57, 0.0  ;;  %v2170_v62 = vmul.f32 0.2, %v1980_v57  ;;  %v3604_v63 = vpop.f32.mrb[18].mxu1 }
 0x41b   : > { %v2203_v1 = vsel %vm2139_vm6, %v1985_v53, %v2171_v60  ;;  %v1995_v2 = vadd.f32 %v3604_v63, %v5453_v41  ;;  %v1989_v3 = vpop.f32.mrb[19].mxu1  ;;  %v1832_v53 = vmul.f32 0.2, %v1666_v5 }
 0x41c   : > { %v2235_v6 = vadd.f32 %v2203_v1, %v1859_v45  ;;  %v1990_v7 = vadd.f32 %v5453_v41, %v1989_v3  ;;  %v2202_v29 = vsel %vm2138_vm8, %v1980_v57, %v2170_v62  ;;  %v1676_v45 = vadd.f32 %v5439_v28, %v5413_v15 }
 0x41d   : > { %vm2141_vm10 = vcmp.ge.f32.partialorder %v1995_v2, 0.0  ;;  %v2173_v9 = vmul.f32 0.2, %v1995_v2  ;;  %v2234_v31 = vadd.f32 %v2202_v29, %v1858_v55  ;;  %v1865_v57 = vsel %vm1801_vm11, %v1671_v61, %v1833_v34 }
 0x41e   : > { %vm2140_vm12 = vcmp.ge.f32.partialorder %v1990_v7, 0.0  ;;  %v2172_v32 = vmul.f32 0.2, %v1990_v7  ;;  %v3607_v33 = vpop.f32.mrb[20].mxu1  ;;  %v1691_v62 = vadd.f32 %v5417_v17, %v5439_v28  ;;  %vm1802_vm1 = vcmp.ge.f32.partialorder %v1676_v45, 0.0 }
 0x41f   : > { %v2005_v37 = vadd.f32 %v3607_v33, %v5453_v41  ;;  %v1999_v39 = vpop.f32.mrb[21].mxu1  ;;  %3679 = vmatprep.mubr.f32.mxu0 %v2234_v31  ;;  %v2205_v11 = vsel %vm2141_vm10, %v1995_v2, %v2173_v9  ;;  %v1864_v61 = vsel %vm1800_vm13, %v1666_v5, %v1832_v53  ;;  %v1834_v4 = vmul.f32 0.2, %v1676_v45 }
 0x420   : > { %v2000_v42 = vadd.f32 %v5453_v41, %v1999_v39  ;;  %3680 = vmatmul.mubr.f32.vlgmr.msra.gmra.mrb[16].mxu0 %v2235_v6  ;;  %v2204_v43 = vsel %vm2140_vm12, %v1990_v7, %v2172_v32  ;;  %v2237_v48 = vadd.f32 %v2205_v11, %v1861_v59  ;;  %v1686_v7 = vadd.f32 %v5439_v28, %v5421_v18 }
 0x421   : > { %vm2143_vm14 = vcmp.ge.f32.partialorder %v2005_v37, 0.0  ;;  %v2175_v49 = vmul.f32 0.2, %v2005_v37  ;;  %v2236_v13 = vadd.f32 %v2204_v43, %v1860_v0  ;;  %v1837_v29 = vmul.f32 0.2, %v1691_v62 }
 0x422   : > { %vm2142_vm15 = vcmp.ge.f32.partialorder %v2000_v42, 0.0  ;;  %v2174_v54 = vmul.f32 0.2, %v2000_v42  ;;  %v3610_v55 = vpop.f32.mrb[22].mxu1  ;;  %vm1805_vm4 = vcmp.ge.f32.partialorder %v1691_v62, 0.0  ;;  %vm1804_vm7 = vcmp.ge.f32.partialorder %v1686_v7, 0.0 }
 0x423   : > { %v2015_v50 = vadd.f32 %v3610_v55, %v5453_v41  ;;  %v2009_v60 = vpop.f32.mrb[23].mxu1  ;;  %3682 = vmatprep.mubr.f32.mxu0 %v2236_v13  ;;  %v2207_v15 = vsel %vm2143_vm14, %v2005_v37, %v2175_v49  ;;  %v1701_v37 = vadd.f32 %v5425_v21, %v5439_v28  ;;  %vm1812_vm8 = vcmp.ge.f32.partialorder %v5450_v38, 0.0 }
 0x424   : > { %v2010_v59 = vadd.f32 %v5453_v41, %v2009_v60  ;;  %3683 = vmatmul.mubr.f32.gmra.mrb[18].mxu0 %v2237_v48  ;;  %v2206_v63 = vsel %vm2142_vm15, %v2000_v42, %v2174_v54  ;;  %v2239_v0 = vadd.f32 %v2207_v15, %v1863_v30  ;;  %v1867_v30 = vsel %vm1803_vm0, %v1681_v35, %v1835_v58 }
 0x425   : > { %vm2145_vm2 = vcmp.ge.f32.partialorder %v2015_v50, 0.0  ;;  %v2177_v1 = vmul.f32 0.2, %v2015_v50  ;;  %v2238_v2 = vadd.f32 %v2206_v63, %v1862_v40  ;;  %v1866_v40 = vsel %vm1802_vm1, %v1676_v45, %v1834_v4 }
 0x426   : > { %vm2144_vm3 = vcmp.ge.f32.partialorder %v2010_v59, 0.0  ;;  %v2176_v3 = vmul.f32 0.2, %v2010_v59  ;;  %v3613_v6 = vpop.f32.mrb[24].mxu1  ;;  %v1836_v35 = vmul.f32 0.2, %v1686_v7  ;;  %v1869_v49 = vsel %vm1805_vm4, %v1691_v62, %v1837_v29 }
 0x427   : > { %v2025_v17 = vadd.f32 %v3613_v6, %v5453_v41  ;;  %v2019_v9 = vpop.f32.mrb[25].mxu1  ;;  %3685 = vmatprep.mubr.f32.mxu0 %v2238_v2  ;;  %v2209_v31 = vsel %vm2145_vm2, %v2015_v50, %v2177_v1  ;;  %v1696_v21 = vadd.f32 %v5439_v28, %v5429_v23  ;;  %vm1807_vm10 = vcmp.ge.f32.partialorder %v1701_v37, 0.0 }
 0x428   : > { %v2020_v32 = vadd.f32 %v5453_v41, %v2019_v9  ;;  %3686 = vmatmul.mubr.f32.gmra.mrb[20].mxu0 %v2239_v0  ;;  %v2208_v5 = vsel %vm2144_vm3, %v2010_v59, %v2176_v3  ;;  %v2241_v33 = vadd.f32 %v2209_v31, %v1865_v57  ;;  %v1839_v57 = vmul.f32 0.2, %v1701_v37 }
 0x429   : > { %vm2147_vm5 = vcmp.ge.f32.partialorder %v2025_v17, 0.0  ;;  %v2179_v34 = vmul.f32 0.2, %v2025_v17  ;;  %v2240_v18 = vadd.f32 %v2208_v5, %v1864_v61  ;;  %v1711_v60 = vadd.f32 %v5433_v25, %v5439_v28 }
 0x42a   : > { %vm2146_vm6 = vcmp.ge.f32.partialorder %v2020_v32, 0.0  ;;  %v2178_v39 = vmul.f32 0.2, %v2020_v32  ;;  %v3616_v11 = vpop.f32.mrb[26].mxu1  ;;  %vm1813_vm12 = vcmp.ge.f32.partialorder %v5447_v36, 0.0  ;;  %v1706_v23 = vadd.f32 %v5439_v28, %v5437_v27 }
 0x42b   : > { %v2035_v42 = vadd.f32 %v3616_v11, %v5453_v41  ;;  %v2029_v43 = vpop.f32.mrb[27].mxu1  ;;  %3688 = vmatprep.mubr.f32.mxu0 %v2240_v18  ;;  %v2211_v48 = vsel %vm2147_vm5, %v2025_v17, %v2179_v34  ;;  %v1868_v59 = vsel %vm1804_vm7, %v1686_v7, %v1836_v35  ;;  %vm1814_vm13 = vcmp.ge.f32.partialorder %v5473_v56, 0.0 }
 0x42c   : > { %v2030_v53 = vadd.f32 %v5453_v41, %v2029_v43  ;;  %3689 = vmatmul.mubr.f32.gmra.mrb[22].mxu0 %v2241_v33  ;;  %v2210_v13 = vsel %vm2146_vm6, %v2020_v32, %v2178_v39  ;;  %v2243_v54 = vadd.f32 %v2211_v48, %v1867_v30  ;;  %v1838_v0 = vmul.f32 0.2, %v1696_v21 }
 0x42d   : > { %vm2149_vm9 = vcmp.ge.f32.partialorder %v2035_v42, 0.0  ;;  %v2181_v45 = vmul.f32 0.2, %v2035_v42  ;;  %v2242_v55 = vadd.f32 %v2210_v13, %v1866_v40  ;;  %vm1806_vm14 = vcmp.ge.f32.partialorder %v1696_v21, 0.0 }
 0x42e   : > { %vm2148_vm11 = vcmp.ge.f32.partialorder %v2030_v53, 0.0  ;;  %v2180_v50 = vmul.f32 0.2, %v2030_v53  ;;  %v3619_v58 = vpop.f32.mrb[28].mxu1  ;;  %vm1809_vm0 = vcmp.ge.f32.partialorder %v1711_v60, 0.0  ;;  %v1871_v27 = vsel %vm1807_vm10, %v1701_v37, %v1839_v57 }
 0x42f   : > { %v2045_v62 = vadd.f32 %v3619_v58, %v5453_v41  ;;  %v2039_v15 = vpop.f32.mrb[29].mxu1  ;;  %3691 = vmatprep.mubr.f32.mxu0 %v2242_v55  ;;  %v2213_v63 = vsel %vm2149_vm9, %v2035_v42, %v2181_v45  ;;  %v1841_v7 = vmul.f32 0.2, %v1711_v60  ;;  %v1840_v17 = vmul.f32 0.2, %v1706_v23 }
 0x430   : > { %v2040_v1 = vadd.f32 %v5453_v41, %v2039_v15  ;;  %3692 = vmatmul.mubr.f32.gmra.mrb[24].mxu0 %v2243_v54  ;;  %v2212_v2 = vsel %vm2148_vm11, %v2030_v53, %v2180_v50  ;;  %v2245_v25 = vadd.f32 %v2213_v63, %v1869_v49  ;;  %v1870_v32 = vsel %vm1806_vm14, %v1696_v21, %v1838_v0 }
 0x431   : > { %vm2151_vm15 = vcmp.ge.f32.partialorder %v2045_v62, 0.0  ;;  %v2183_v61 = vmul.f32 0.2, %v2045_v62  ;;  %v2244_v3 = vadd.f32 %v2212_v2, %v1868_v59  ;;  %vm1808_vm2 = vcmp.ge.f32.partialorder %v1706_v23, 0.0 }
 0x432   : > { %vm2150_vm1 = vcmp.ge.f32.partialorder %v2040_v1, 0.0  ;;  %v2182_v4 = vmul.f32 0.2, %v2040_v1  ;;  %v3622_v6 = vpop.f32.mrb[30].mxu1  ;;  %v1846_v37 = vmul.f32 0.2, %v5473_v56  ;;  %v1876_v40 = vsel %vm1812_vm8, %v5450_v38, %v5462_v47 }
 0x433   : > { %v2055_v29 = vadd.f32 %v3622_v6, %v5453_v41  ;;  %v2049_v9 = vpop.f32.mrb[31].mxu1  ;;  %3694 = vmatprep.mubr.f32.mxu0 %v2244_v3  ;;  %v2215_v31 = vsel %vm2151_vm15, %v2045_v62, %v2183_v61  ;;  %v1751_v35 = vadd.f32 %v5401_v8, %v5439_v28  ;;  %v1873_v48 = vsel %vm1809_vm0, %v1711_v60, %v1841_v7 }
 0x434   : > { %v2050_v30 = vadd.f32 %v5453_v41, %v2049_v9  ;;  %3695 = vmatmul.mubr.f32.gmra.mrb[26].mxu0 %v2245_v25  ;;  %v2214_v5 = vsel %vm2150_vm1, %v2040_v1, %v2182_v4  ;;  %v2247_v33 = vadd.f32 %v2215_v31, %v1871_v27  ;;  %v1872_v21 = vsel %vm1808_vm2, %v1706_v23, %v1840_v17 }
 0x435   : > { %vm2153_vm3 = vcmp.ge.f32.partialorder %v2055_v29, 0.0  ;;  %v2185_v34 = vmul.f32 0.2, %v2055_v29  ;;  %v2246_v18 = vadd.f32 %v2214_v5, %v1870_v32  ;;  %v1746_v38 = vadd.f32 %v5439_v28, %v5403_v10 }
 0x436   : > { %vm2152_vm4 = vcmp.ge.f32.partialorder %v2050_v30, 0.0  ;;  %v2184_v39 = vmul.f32 0.2, %v2050_v30  ;;  %v3625_v11 = vpop.f32.mrb[32].mxu1  ;;  %vm1815_vm6 = vcmp.ge.f32.partialorder %v5468_v52, 0.0  ;;  %v1877_v57 = vsel %vm1813_vm12, %v5447_v36, %v5457_v44 }
 0x437   : > { %v2065_v42 = vadd.f32 %v3625_v11, %v5453_v41  ;;  %v2059_v43 = vpop.f32.mrb[33].mxu1  ;;  %3697 = vmatprep.mubr.f32.mxu0 %v2246_v18  ;;  %v2217_v49 = vsel %vm2153_vm3, %v2055_v29, %v2185_v34  ;;  %v1847_v50 = vmul.f32 0.2, %v5468_v52  ;;  %v1878_v62 = vsel %vm1814_vm13, %v5473_v56, %v1846_v37 }
 0x438   : > { %v2060_v53 = vadd.f32 %v5453_v41, %v2059_v43  ;;  %3698 = vmatmul.mubr.f32.gmra.mrb[28].mxu0 %v2247_v33  ;;  %v2216_v13 = vsel %vm2152_vm4, %v2050_v30, %v2184_v39  ;;  %v2249_v54 = vadd.f32 %v2217_v49, %v1873_v48  ;;  %v1849_v15 = vmul.f32 0.2, %v1751_v35 }
 0x439   : > { %vm2155_vm5 = vcmp.ge.f32.partialorder %v2065_v42, 0.0  ;;  %v2187_v47 = vmul.f32 0.2, %v2065_v42  ;;  %v2248_v8 = vadd.f32 %v2216_v13, %v1872_v21  ;;  %v1848_v0 = vmul.f32 0.2, %v1746_v38 }
 0x43a   : > { %vm2154_vm7 = vcmp.ge.f32.partialorder %v2060_v53, 0.0  ;;  %v2186_v45 = vmul.f32 0.2, %v2060_v53  ;;  %v3628_v55 = vpop.f32.mrb[34].mxu1  ;;  %vm1816_vm9 = vcmp.ge.f32.partialorder %v1746_v38, 0.0  ;;  %v1756_v1 = vadd.f32 %v5439_v28, %v5411_v14 }
 0x43b   : > { %v2075_v58 = vadd.f32 %v3628_v55, %v5453_v41  ;;  %v2069_v60 = vpop.f32.mrb[35].mxu1  ;;  %3700 = vmatprep.mubr.f32.mxu0 %v2248_v8  ;;  %v2219_v10 = vsel %vm2155_vm5, %v2065_v42, %v2187_v47  ;;  %vm1817_vm11 = vcmp.ge.f32.partialorder %v1751_v35, 0.0  ;;  %v1880_v17 = vsel %vm1816_vm9, %v1746_v38, %v1848_v0 }
 0x43c   : > { %v2070_v23 = vadd.f32 %v5453_v41, %v2069_v60  ;;  %3701 = vmatmul.mubr.f32.gmra.mrb[30].mxu0 %v2249_v54  ;;  %v2218_v59 = vsel %vm2154_vm7, %v2060_v53, %v2186_v45  ;;  %v2251_v63 = vadd.f32 %v2219_v10, %v5465_v51  ;;  %v1879_v51 = vsel %vm1815_vm6, %v5468_v52, %v1847_v50 }
 0x43d   : > { %vm2157_vm8 = vcmp.ge.f32.partialorder %v2075_v58, 0.0  ;;  %v2189_v36 = vmul.f32 0.2, %v2075_v58  ;;  %v2250_v44 = vadd.f32 %v2218_v59, %v5459_v46  ;;  %v1761_v46 = vadd.f32 %v5407_v12, %v5439_v28 }
 0x43e   : > { %vm2156_vm10 = vcmp.ge.f32.partialorder %v2070_v23, 0.0  ;;  %v2188_v2 = vmul.f32 0.2, %v2070_v23  ;;  %v3631_v25 = vpop.f32.mrb[36].mxu1  ;;  %v1850_v29 = vmul.f32 0.2, %v1756_v1  ;;  %v1881_v30 = vsel %vm1817_vm11, %v1751_v35, %v1849_v15 }
 0x43f   : > { %v2085_v56 = vadd.f32 %v3631_v25, %v5453_v41  ;;  %v2079_v61 = vpop.f32.mrb[37].mxu1  ;;  %3703 = vmatprep.mubr.f32.mxu0 %v2250_v44  ;;  %v2221_v3 = vsel %vm2157_vm8, %v2075_v58, %v2189_v36  ;;  %vm1818_vm14 = vcmp.ge.f32.partialorder %v1756_v1, 0.0  ;;  %v1766_v12 = vadd.f32 %v5439_v28, %v5419_v19 }
 0x440   : > { %v2080_v4 = vadd.f32 %v5453_v41, %v2079_v61  ;;  %3704 = vmatmul.mubr.f32.gmra.mrb[32].mxu0 %v2251_v63  ;;  %v2220_v14 = vsel %vm2156_vm10, %v2070_v23, %v2188_v2  ;;  %v2253_v6 = vadd.f32 %v2221_v3, %v1877_v57  ;;  %vm1819_vm15 = vcmp.ge.f32.partialorder %v1761_v46, 0.0 }
 0x441   : > { %vm2159_vm12 = vcmp.ge.f32.partialorder %v2085_v56, 0.0  ;;  %v2191_v27 = vmul.f32 0.2, %v2085_v56  ;;  %v2252_v7 = vadd.f32 %v2220_v14, %v1876_v40  ;;  %v1851_v37 = vmul.f32 0.2, %v1761_v46 }
 0x442   : > { %vm2158_vm13 = vcmp.ge.f32.partialorder %v2080_v4, 0.0  ;;  %v2190_v9 = vmul.f32 0.2, %v2080_v4  ;;  %v3634_v31 = vpop.f32.mrb[38].mxu1  ;;  %v1771_v40 = vadd.f32 %v5415_v16, %v5439_v28  ;;  %v1882_v42 = vsel %vm1818_vm14, %v1756_v1, %v1850_v29 }
 0x443   : > { %v2095_v52 = vadd.f32 %v3634_v31, %v5453_v41  ;;  %v2089_v32 = vpop.f32.mrb[39].mxu1  ;;  %3706 = vmatprep.mubr.f32.mxu0 %v2252_v7  ;;  %v2223_v5 = vsel %vm2159_vm12, %v2085_v56, %v2191_v27  ;;  %vm1820_vm2 = vcmp.ge.f32.partialorder %v1766_v12, 0.0  ;;  %v1852_v43 = vmul.f32 0.2, %v1766_v12 }
 0x444   : > { %v2090_v33 = vadd.f32 %v5453_v41, %v2089_v32  ;;  %3707 = vmatmul.mubr.f32.gmra.mrb[34].mxu0 %v2253_v6  ;;  %v2222_v34 = vsel %vm2158_vm13, %v2080_v4, %v2190_v9  ;;  %v2255_v18 = vadd.f32 %v2223_v5, %v1879_v51  ;;  %v1781_v21 = vadd.f32 %v5423_v20, %v5439_v28 }
 0x445   : > { %vm2161_vm0 = vcmp.ge.f32.partialorder %v2095_v52, 0.0  ;;  %v2193_v39 = vmul.f32 0.2, %v2095_v52  ;;  %v2254_v11 = vadd.f32 %v2222_v34, %v1878_v62  ;;  %v1883_v8 = vsel %vm1819_vm15, %v1761_v46, %v1851_v37 }
 0x446   : > { %vm2160_vm1 = vcmp.ge.f32.partialorder %v2090_v33, 0.0  ;;  %v2192_v19 = vmul.f32 0.2, %v2090_v33  ;;  %v3637_v35 = vpop.f32.mrb[40].mxu1  ;;  %v1853_v45 = vmul.f32 0.2, %v1771_v40  ;;  %v1776_v55 = vadd.f32 %v5439_v28, %v5427_v22 }
 0x447   : > { %v2105_v48 = vadd.f32 %v3637_v35, %v5453_v41  ;;  %v2099_v49 = vpop.f32.mrb[41].mxu1  ;;  %3709 = vmatprep.mubr.f32.mxu0 %v2254_v11  ;;  %v2225_v53 = vsel %vm2161_vm0, %v2095_v52, %v2193_v39  ;;  %vm1821_vm5 = vcmp.ge.f32.partialorder %v1771_v40, 0.0  ;;  %v1884_v10 = vsel %vm1820_vm2, %v1766_v12, %v1852_v43 }
 0x448   : > { %v2100_v13 = vadd.f32 %v5453_v41, %v2099_v49  ;;  %3710 = vmatmul.mubr.f32.gmra.mrb[36].mxu0 %v2255_v18  ;;  %v2224_v54 = vsel %vm2160_vm1, %v2090_v33, %v2192_v19  ;;  %v2257_v16 = vadd.f32 %v2225_v53, %v1881_v30  ;;  %vm1823_vm6 = vcmp.ge.f32.partialorder %v1781_v21, 0.0  ;;  %v2708_v19 = vpop.permute.xlu0 %2707 }
 0x449   : > { %vm2163_vm3 = vcmp.ge.f32.partialorder %v2105_v48, 0.0  ;;  %v2195_v38 = vmul.f32 0.2, %v2105_v48  ;;  %v2256_v47 = vadd.f32 %v2224_v54, %v1880_v17  ;;  %v1855_v59 = vmul.f32 0.2, %v1781_v21 }
 0x44a   : > { %vm2162_vm4 = vcmp.ge.f32.partialorder %v2100_v13, 0.0  ;;  %v2194_v57 = vmul.f32 0.2, %v2100_v13  ;;  %v3640_v50 = vpop.f32.mrb[42].mxu1  ;;  %v1854_v0 = vmul.f32 0.2, %v1776_v55  ;;  %v1885_v1 = vsel %vm1821_vm5, %v1771_v40, %v1853_v45 }
 0x44b   : > { %v2115_v20 = vadd.f32 %v3640_v50, %v5453_v41  ;;  %v2109_v58 = vpop.f32.mrb[43].mxu1  ;;  %3712 = vmatprep.mubr.f32.mxu0 %v2256_v47  ;;  %v2227_v60 = vsel %vm2163_vm3, %v2105_v48, %v2195_v38  ;;  %vm1822_vm9 = vcmp.ge.f32.partialorder %v1776_v55, 0.0  ;;  %v1791_v2 = vadd.f32 %v5431_v24, %v5439_v28  ;;  %v5599_v54 = vld [vmem:[#allocation18] ss:$0 sm:$0xff] }
 0x44c   : > { %v2110_v62 = vadd.f32 %v5453_v41, %v2109_v58  ;;  %3713 = vmatmul.mubr.f32.gmra.mrb[38].mxu0 %v2257_v16  ;;  %v2226_v15 = vsel %vm2162_vm4, %v2100_v13, %v2194_v57  ;;  %v2259_v23 = vadd.f32 %v2227_v60, %v1883_v8  ;;  %v1786_v3 = vadd.f32 %v5439_v28, %v5435_v26 }
 0x44d   : > { %vm2165_vm7 = vcmp.ge.f32.partialorder %v2115_v20, 0.0  ;;  %v2197_v22 = vmul.f32 0.2, %v2115_v20  ;;  %v2258_v63 = vadd.f32 %v2226_v15, %v1882_v42  ;;  %v1886_v24 = vsel %vm1822_vm9, %v1776_v55, %v1854_v0  ;;  %v2714_v42 = vpop.permute.xlu0 %2713 }
 0x44e   : > { %vm2164_vm8 = vcmp.ge.f32.partialorder %v2110_v62, 0.0  ;;  %v2196_v36 = vmul.f32 0.2, %v2110_v62  ;;  %v3643_v44 = vpop.f32.mrb[44].mxu1  ;;  %v1887_v17 = vsel %vm1823_vm6, %v1781_v21, %v1855_v59  ;;  %vm1825_vm12 = vcmp.ge.f32.partialorder %v1791_v2, 0.0 }
 0x44f   : > { %v2125_v25 = vadd.f32 %v3643_v44, %v5453_v41  ;;  %v2119_v56 = vpop.f32.mrb[45].mxu1  ;;  %3715 = vmatprep.mubr.f32.mxu0 %v2258_v63  ;;  %v2229_v61 = vsel %vm2165_vm7, %v2115_v20, %v2197_v22  ;;  %v1857_v29 = vmul.f32 0.2, %v1791_v2  ;;  %v1856_v31 = vmul.f32 0.2, %v1786_v3  ;;  %v4119_v22 = vld [vmem:[%s5186_s30] sm:$0xff] }
 0x450   : > { %v2120_v51 = vadd.f32 %v5453_v41, %v2119_v56  ;;  %3716 = vmatmul.mubr.f32.gmra.mrb[40].mxu0 %v2259_v23  ;;  %v2228_v46 = vsel %vm2164_vm8, %v2110_v62, %v2196_v36  ;;  %v2261_v4 = vadd.f32 %v2229_v61, %v1885_v1  ;;  %vm1824_vm13 = vcmp.ge.f32.partialorder %v1786_v3, 0.0  ;;  %v4118_v62 = vld [vmem:[%s5186_s30 + $0x8] sm:$0xff] }
 0x451   : > { %vm2167_vm10 = vcmp.ge.f32.partialorder %v2125_v25, 0.0  ;;  %v2199_v14 = vmul.f32 0.2, %v2125_v25  ;;  %v2260_v6 = vadd.f32 %v2228_v46, %v1884_v10  ;;  %v1889_v34 = vsel %vm1825_vm12, %v1791_v2, %v1857_v29  ;;  %v5589_v48 = vpop.permute.xlu0 %2719 }
 0x452   : > { %vm2166_vm11 = vcmp.ge.f32.partialorder %v2120_v51, 0.0  ;;  %v2198_v27 = vmul.f32 0.2, %v2120_v51  ;;  %v3646_v7 = vpop.f32.mrb[46].mxu1  ;;  %v1888_v37 = vsel %vm1824_vm13, %v1786_v3, %v1856_v31  ;;  %vm2802_vm3 = vcmp.eq.s32.totalorder %v2708_v19, 1  ;;  %v4120_v3 = vld [vmem:[%s5186_s30 + $0x18] sm:$0xff] }
 0x453   : > { %v2135_v9 = vadd.f32 %v3646_v7, %v5453_v41  ;;  %v2129_v26 = vpop.f32.mrb[47].mxu1  ;;  %3718 = vmatprep.mubr.f32.mxu0 %v2260_v6  ;;  %v2231_v28 = vsel %vm2167_vm10, %v2125_v25, %v2199_v14  ;;  %vm2804_vm7 = vcmp.eq.s32.totalorder %v2714_v42, 1  ;;  %v4121_v14 = vld [vmem:[%s5186_s30 + $0x10] sm:$0xff] }
 0x454   : > { %v2130_v30 = vadd.f32 %v5453_v41, %v2129_v26  ;;  %3719 = vmatmul.mubr.f32.gmra.mrb[42].mxu0 %v2261_v4  ;;  %v2230_v12 = vsel %vm2166_vm11, %v2120_v51, %v2198_v27  ;;  %v2263_v52 = vadd.f32 %v2231_v28, %v1887_v17  ;;  %v2711_v41 = vpop.permute.xlu1 %2710  ;;  %vm2806_vm11 = vcmp.eq.s32.totalorder %v5589_v48, 1  ;;  %v4122_v28 = vld [vmem:[%s5186_s30 + $0x28] sm:$0xff]  ;;  %v4125_v42 = vld [vmem:[%s5186_s30 + $0x30] sm:$0xff] }
 0x455   : > { %vm2169_vm14 = vcmp.ge.f32.partialorder %v2135_v9, 0.0  ;;  %v2201_v32 = vmul.f32 0.2, %v2135_v9  ;;  %v2262_v5 = vadd.f32 %v2230_v12, %v1886_v24  ;;  %v5593_v53 = vpop.permute.xlu0 %2725  ;;  %vm2803_vm2 = vcmp.eq.s32.totalorder %v2711_v41, 1 }
 0x456   : > { %vm2168_vm15 = vcmp.ge.f32.partialorder %v2130_v30, 0.0  ;;  %v2200_v33 = vmul.f32 0.2, %v2130_v30 }
 0x457   : > { %3721 = vmatprep.mubr.f32.mxu0 %v2262_v5  ;;  %v2233_v18 = vsel %vm2169_vm14, %v2135_v9, %v2201_v32  ;;  %v4123_v32 = vld [vmem:[%s5186_s30 + $0x20] sm:$0xff] }
 0x458   : > { %3722 = vmatmul.mubr.f32.gmra.mrb[44].mxu0 %v2263_v52  ;;  %v2232_v39 = vsel %vm2168_vm15, %v2130_v30, %v2200_v33  ;;  %v2265_v11 = vadd.f32 %v2233_v18, %v1889_v34  ;;  %v2717_v35 = vpop.permute.xlu1 %2716  ;;  %vm2808_vm15 = vcmp.eq.s32.totalorder %v5593_v53, 1 }
 0x459   : > { %v2264_v40 = vadd.f32 %v2232_v39, %v1888_v37  ;;  %v5597_v13 = vpop.permute.xlu0 %2731  ;;  %vm2805_vm6 = vcmp.eq.s32.totalorder %v2717_v35, 1 }
 0x45b   : > { %3724 = vmatprep.mubr.f32.mxu0 %v2264_v40  ;;  %v4124_v40 = vld [vmem:[%s5186_s30 + $0x38] sm:$0xff] }
 0x45c   : > { %3725 = vmatmul.mubr.f32.gmra.mrb[46].mxu0 %v2265_v11  ;;  %v5587_v43 = vpop.permute.xlu1 %2722 }
 0x45d   : > { %v5605_v55 = vpop.permute.xlu0 %2737  ;;  %vm2807_vm10 = vcmp.eq.s32.totalorder %v5587_v43, 1 }
 0x460   : > { %v5591_v49 = vpop.permute.xlu1 %2728 }
 0x461   : > { %v5615_v2 = vpop.permute.xlu0 %2743  ;;  %vm2809_vm14 = vcmp.eq.s32.totalorder %v5591_v49, 1 }
 0x464   : > { %v5595_v21 = vpop.permute.xlu1 %2734 }
 0x465   : > { %v5630_v52 = vpop.permute.xlu0 %2749 }
 0x468   : > { %v5602_v8 = vpop.permute.xlu1 %2740 }
 0x469   : > { %v5646_v53 = vpop.permute.xlu0 %2755 }
 0x46c   : > { %v5612_v36 = vpop.permute.xlu1 %2746 }
 0x470   : > { %v5626_v26 = vpop.permute.xlu1 %2752 }
 0x4f3   : > { %v3681_v16 = vpop.f32.mrb[16].mxu0 }
 0x4f4   : > { %v2361_v38 = vadd.f32 %v3681_v16, %v5599_v54  ;;  %v2355_v47 = vpop.f32.mrb[17].mxu0  ;;  %v5642_v16 = vpop.permute.xlu1 %2758 }
 0x4f5   : > { %v2356_v45 = vadd.f32 %v5599_v54, %v2355_v47 }
 0x4f6   : > { %vm2515_vm0 = vcmp.ge.f32.partialorder %v2361_v38, 0.0  ;;  %v2547_v57 = vmul.f32 0.2, %v2361_v38 }
 0x4f7   : > { %vm2514_vm1 = vcmp.ge.f32.partialorder %v2356_v45, 0.0  ;;  %v2546_v50 = vmul.f32 0.2, %v2356_v45  ;;  %v3684_v20 = vpop.f32.mrb[18].mxu0 }
 0x4f8   : > { %v2579_v58 = vsel %vm2515_vm0, %v2361_v38, %v2547_v57  ;;  %v2371_v60 = vadd.f32 %v3684_v20, %v5599_v54  ;;  %v2365_v10 = vpop.f32.mrb[19].mxu0 }
 0x4f9   : > { %v2835_v15 = vsel %vm2803_vm2, %v2579_v58, %v4118_v62  ;;  %v2578_v23 = vsel %vm2514_vm1, %v2356_v45, %v2546_v50  ;;  %v2366_v59 = vadd.f32 %v5599_v54, %v2365_v10  ;;  %vm2811_vm2 = vcmp.eq.s32.totalorder %v5595_v21, 1  ;;  %v4126_v50 = vld [vmem:[%s5186_s30 + $0x48] sm:$0xff]  ;;  %v4127_v10 = vld [vmem:[%s5186_s30 + $0x40] sm:$0xff] }
 0x4fa   : > { %2867 = vst [vmem:[%s5212_s16 + $0x8] sm:$0xff] %v2835_v15  ;;  %v2834_v63 = vsel %vm2802_vm3, %v2578_v23, %v4119_v22  ;;  %vm2517_vm4 = vcmp.ge.f32.partialorder %v2371_v60, 0.0  ;;  %v2549_v0 = vmul.f32 0.2, %v2371_v60  ;;  %vm2810_vm3 = vcmp.eq.s32.totalorder %v5597_v13, 1 }
 0x4fb   : > { %2866 = vst [vmem:[%s5212_s16] sm:$0xff] %v2834_v63  ;;  %vm2516_vm5 = vcmp.ge.f32.partialorder %v2366_v59, 0.0  ;;  %v2548_v44 = vmul.f32 0.2, %v2366_v59  ;;  %v3687_v1 = vpop.f32.mrb[20].mxu0  ;;  %v5658_v63 = vpop.permute.xlu1 %2764 }
 0x4fc   : > { %v2581_v25 = vsel %vm2517_vm4, %v2371_v60, %v2549_v0  ;;  %v2381_v56 = vadd.f32 %v3687_v1, %v5599_v54  ;;  %v2375_v61 = vpop.f32.mrb[21].mxu0  ;;  %v4128_v0 = vld [vmem:[%s5186_s30 + $0x58] sm:$0xff] }
 0x4fd   : > { %v2837_v51 = vsel %vm2805_vm6, %v2581_v25, %v4120_v3  ;;  %v2580_v46 = vsel %vm2516_vm5, %v2366_v59, %v2548_v44  ;;  %v2376_v4 = vadd.f32 %v5599_v54, %v2375_v61  ;;  %vm2813_vm6 = vcmp.eq.s32.totalorder %v5602_v8, 1  ;;  %v4129_v61 = vld [vmem:[%s5186_s30 + $0x50] sm:$0xff] }
 0x4fe   : > { %2869 = vst [vmem:[%s5212_s16 + $0x18] sm:$0xff] %v2837_v51  ;;  %v2836_v6 = vsel %vm2804_vm7, %v2580_v46, %v4121_v14  ;;  %vm2519_vm8 = vcmp.ge.f32.partialorder %v2381_v56, 0.0  ;;  %v2551_v27 = vmul.f32 0.2, %v2381_v56  ;;  %vm2812_vm7 = vcmp.eq.s32.totalorder %v5605_v55, 1 }
 0x4ff   : > { %2868 = vst [vmem:[%s5212_s16 + $0x10] sm:$0xff] %v2836_v6  ;;  %vm2518_vm9 = vcmp.ge.f32.partialorder %v2376_v4, 0.0  ;;  %v2550_v7 = vmul.f32 0.2, %v2376_v4  ;;  %v3690_v24 = vpop.f32.mrb[22].mxu0  ;;  %v4130_v6 = vld [vmem:[%s5186_s30 + $0x68] sm:$0xff] }
 0x500   : > { %v2583_v17 = vsel %vm2519_vm8, %v2381_v56, %v2551_v27  ;;  %v2391_v29 = vadd.f32 %v3690_v24, %v5599_v54  ;;  %v2385_v9 = vpop.f32.mrb[23].mxu0  ;;  %v5662_v56 = vpop.permute.xlu0 %2761 }
 0x501   : > { %v2839_v31 = vsel %vm2807_vm10, %v2583_v17, %v4122_v28  ;;  %v2582_v30 = vsel %vm2518_vm9, %v2376_v4, %v2550_v7  ;;  %v2386_v12 = vadd.f32 %v5599_v54, %v2385_v9  ;;  %vm2815_vm10 = vcmp.eq.s32.totalorder %v5612_v36, 1  ;;  %v4131_v17 = vld [vmem:[%s5186_s30 + $0x60] sm:$0xff]  ;;  %v5674_v28 = vpop.permute.xlu1 %2770 }
 0x502   : > { %2871 = vst [vmem:[%s5212_s16 + $0x28] sm:$0xff] %v2839_v31  ;;  %v2838_v5 = vsel %vm2806_vm11, %v2582_v30, %v4123_v32  ;;  %vm2521_vm12 = vcmp.ge.f32.partialorder %v2391_v29, 0.0  ;;  %v2553_v33 = vmul.f32 0.2, %v2391_v29  ;;  %vm2814_vm11 = vcmp.eq.s32.totalorder %v5615_v2, 1 }
 0x503   : > { %2870 = vst [vmem:[%s5212_s16 + $0x20] sm:$0xff] %v2838_v5  ;;  %vm2520_vm13 = vcmp.ge.f32.partialorder %v2386_v12, 0.0  ;;  %v2552_v34 = vmul.f32 0.2, %v2386_v12  ;;  %v3693_v18 = vpop.f32.mrb[24].mxu0  ;;  %v4132_v5 = vld [vmem:[%s5186_s30 + $0x78] sm:$0xff] }
 0x504   : > { %v2585_v37 = vsel %vm2521_vm12, %v2391_v29, %v2553_v33  ;;  %v2401_v39 = vadd.f32 %v3693_v18, %v5599_v54  ;;  %v2395_v11 = vpop.f32.mrb[25].mxu0  ;;  %v5678_v2 = vpop.permute.xlu0 %2767 }
 0x505   : > { %v2841_v41 = vsel %vm2809_vm14, %v2585_v37, %v4124_v40  ;;  %v2584_v19 = vsel %vm2520_vm13, %v2386_v12, %v2552_v34  ;;  %v2396_v35 = vadd.f32 %v5599_v54, %v2395_v11  ;;  %vm2817_vm14 = vcmp.eq.s32.totalorder %v5626_v26, 1  ;;  %v4133_v37 = vld [vmem:[%s5186_s30 + $0x70] sm:$0xff] }
 0x506   : > { %2873 = vst [vmem:[%s5212_s16 + $0x38] sm:$0xff] %v2841_v41  ;;  %v2840_v43 = vsel %vm2808_vm15, %v2584_v19, %v4125_v42  ;;  %vm2523_vm0 = vcmp.ge.f32.partialorder %v2401_v39, 0.0  ;;  %v2555_v48 = vmul.f32 0.2, %v2401_v39  ;;  %vm2816_vm15 = vcmp.eq.s32.totalorder %v5630_v52, 1  ;;  %v4134_v42 = vld [vmem:[%s5186_s30 + $0x88] sm:$0xff] }
 0x507   : > { %2872 = vst [vmem:[%s5212_s16 + $0x30] sm:$0xff] %v2840_v43  ;;  %vm2522_vm1 = vcmp.ge.f32.partialorder %v2396_v35, 0.0  ;;  %v2554_v49 = vmul.f32 0.2, %v2396_v35  ;;  %v3696_v38 = vpop.f32.mrb[26].mxu0 }
 0x508   : > { %v2587_v47 = vsel %vm2523_vm0, %v2401_v39, %v2555_v48  ;;  %v2411_v45 = vadd.f32 %v3696_v38, %v5599_v54  ;;  %v2405_v57 = vpop.f32.mrb[27].mxu0  ;;  %v5692_v38 = vpop.permute.xlu0 %2773 }
 0x509   : > { %v2843_v20 = vsel %vm2811_vm2, %v2587_v47, %v4126_v50  ;;  %v2586_v58 = vsel %vm2522_vm1, %v2396_v35, %v2554_v49  ;;  %v2406_v60 = vadd.f32 %v5599_v54, %v2405_v57  ;;  %vm2819_vm2 = vcmp.eq.s32.totalorder %v5642_v16, 1  ;;  %v2777_v35 = vpop.permute.xlu1 %2776  ;;  %v4135_v47 = vld [vmem:[%s5186_s30 + $0x80] sm:$0xff] }
 0x50a   : > { %2875 = vst [vmem:[%s5212_s16 + $0x48] sm:$0xff] %v2843_v20  ;;  %v2842_v62 = vsel %vm2810_vm3, %v2586_v58, %v4127_v10  ;;  %vm2525_vm4 = vcmp.ge.f32.partialorder %v2411_v45, 0.0  ;;  %v2557_v15 = vmul.f32 0.2, %v2411_v45  ;;  %vm2818_vm3 = vcmp.eq.s32.totalorder %v5646_v53, 1 }
 0x50b   : > { %2874 = vst [vmem:[%s5212_s16 + $0x40] sm:$0xff] %v2842_v62  ;;  %vm2524_vm5 = vcmp.ge.f32.partialorder %v2406_v60, 0.0  ;;  %v2556_v21 = vmul.f32 0.2, %v2406_v60  ;;  %v3699_v23 = vpop.f32.mrb[28].mxu0 }
 0x50c   : > { %v2589_v13 = vsel %vm2525_vm4, %v2411_v45, %v2557_v15  ;;  %v2421_v59 = vadd.f32 %v3699_v23, %v5599_v54  ;;  %v2415_v22 = vpop.f32.mrb[29].mxu0 }
 0x50d   : > { %v2845_v44 = vsel %vm2813_vm6, %v2589_v13, %v4128_v0  ;;  %v2588_v1 = vsel %vm2524_vm5, %v2406_v60, %v2556_v21  ;;  %v2416_v25 = vadd.f32 %v5599_v54, %v2415_v22  ;;  %vm2821_vm6 = vcmp.eq.s32.totalorder %v5658_v63, 1  ;;  %v4136_v60 = vld [vmem:[%s5186_s30 + $0x98] sm:$0xff]  ;;  %v4137_v21 = vld [vmem:[%s5186_s30 + $0x90] sm:$0xff]  ;;  %v2780_v0 = vpop.permute.xlu0 %2779 }
 0x50e   : > { %2877 = vst [vmem:[%s5212_s16 + $0x58] sm:$0xff] %v2845_v44  ;;  %v2844_v8 = vsel %vm2812_vm7, %v2588_v1, %v4129_v61  ;;  %vm2527_vm8 = vcmp.ge.f32.partialorder %v2421_v59, 0.0  ;;  %v2559_v3 = vmul.f32 0.2, %v2421_v59  ;;  %vm2820_vm7 = vcmp.eq.s32.totalorder %v5662_v56, 1  ;;  %v4138_v56 = vld [vmem:[%s5186_s30 + $0xa8] sm:$0xff] }
 0x50f   : > { %2876 = vst [vmem:[%s5212_s16 + $0x50] sm:$0xff] %v2844_v8  ;;  %vm2526_vm9 = vcmp.ge.f32.partialorder %v2416_v25, 0.0  ;;  %v2558_v55 = vmul.f32 0.2, %v2416_v25  ;;  %v3702_v51 = vpop.f32.mrb[30].mxu0 }
 0x510   : > { %v2591_v46 = vsel %vm2527_vm8, %v2421_v59, %v2559_v3  ;;  %v2431_v4 = vadd.f32 %v3702_v51, %v5599_v54  ;;  %v2425_v14 = vpop.f32.mrb[31].mxu0  ;;  %v2783_v59 = vpop.permute.xlu1 %2782 }
 0x511   : > { %v2847_v27 = vsel %vm2815_vm10, %v2591_v46, %v4130_v6  ;;  %v2590_v7 = vsel %vm2526_vm9, %v2416_v25, %v2558_v55  ;;  %v2426_v24 = vadd.f32 %v5599_v54, %v2425_v14  ;;  %vm2823_vm10 = vcmp.eq.s32.totalorder %v5674_v28, 1  ;;  %v4139_v55 = vld [vmem:[%s5186_s30 + $0xa0] sm:$0xff] }
 0x512   : > { %2879 = vst [vmem:[%s5212_s16 + $0x68] sm:$0xff] %v2847_v27  ;;  %v2846_v29 = vsel %vm2814_vm11, %v2590_v7, %v4131_v17  ;;  %vm2529_vm12 = vcmp.ge.f32.partialorder %v2431_v4, 0.0  ;;  %v2561_v9 = vmul.f32 0.2, %v2431_v4  ;;  %vm2822_vm11 = vcmp.eq.s32.totalorder %v5678_v2, 1  ;;  %v4140_v17 = vld [vmem:[%s5186_s30 + $0xb8] sm:$0xff] }
 0x513   : > { %2878 = vst [vmem:[%s5212_s16 + $0x60] sm:$0xff] %v2846_v29  ;;  %vm2528_vm13 = vcmp.ge.f32.partialorder %v2426_v24, 0.0  ;;  %v2560_v36 = vmul.f32 0.2, %v2426_v24  ;;  %v3705_v31 = vpop.f32.mrb[32].mxu0 }
 0x514   : > { %v2593_v30 = vsel %vm2529_vm12, %v2431_v4, %v2561_v9  ;;  %v2441_v12 = vadd.f32 %v3705_v31, %v5599_v54  ;;  %v2435_v32 = vpop.f32.mrb[33].mxu0  ;;  %v4141_v31 = vld [vmem:[%s5186_s30 + $0xb0] sm:$0xff] }
 0x515   : > { %v2849_v33 = vsel %vm2817_vm14, %v2593_v30, %v4132_v5  ;;  %v2592_v34 = vsel %vm2528_vm13, %v2426_v24, %v2560_v36  ;;  %v2436_v18 = vadd.f32 %v5599_v54, %v2435_v32  ;;  %vm2825_vm14 = vcmp.eq.s32.totalorder %v2777_v35, 1  ;;  %v2789_v24 = vpop.permute.xlu1 %2788  ;;  %v2786_v36 = vpop.permute.xlu0 %2785 }
 0x516   : > { %2881 = vst [vmem:[%s5212_s16 + $0x78] sm:$0xff] %v2849_v33  ;;  %v2848_v39 = vsel %vm2816_vm15, %v2592_v34, %v4133_v37  ;;  %vm2531_vm0 = vcmp.ge.f32.partialorder %v2441_v12, 0.0  ;;  %v2563_v11 = vmul.f32 0.2, %v2441_v12  ;;  %vm2824_vm15 = vcmp.eq.s32.totalorder %v5692_v38, 1  ;;  %v4144_v38 = vld [vmem:[%s5186_s30 + $0xd8] sm:$0xff] }
 0x517   : > { %2880 = vst [vmem:[%s5212_s16 + $0x70] sm:$0xff] %v2848_v39  ;;  %vm2530_vm1 = vcmp.ge.f32.partialorder %v2436_v18, 0.0  ;;  %v2562_v26 = vmul.f32 0.2, %v2436_v18  ;;  %v3708_v40 = vpop.f32.mrb[34].mxu0 }
 0x518   : > { %v2595_v52 = vsel %vm2531_vm0, %v2441_v12, %v2563_v11  ;;  %v2451_v41 = vadd.f32 %v3708_v40, %v5599_v54  ;;  %v2445_v19 = vpop.f32.mrb[35].mxu0 }
 0x519   : > { %v2851_v43 = vsel %vm2819_vm2, %v2595_v52, %v4134_v42  ;;  %v2594_v48 = vsel %vm2530_vm1, %v2436_v18, %v2562_v26  ;;  %v2446_v49 = vadd.f32 %v5599_v54, %v2445_v19  ;;  %vm2827_vm2 = vcmp.eq.s32.totalorder %v2783_v59, 1  ;;  %v4142_v18 = vld [vmem:[%s5186_s30 + $0xc8] sm:$0xff]  ;;  %v4143_v26 = vld [vmem:[%s5186_s30 + $0xc0] sm:$0xff]  ;;  %v2792_v42 = vpop.permute.xlu0 %2791 }
 0x51a   : > { %2883 = vst [vmem:[%s5212_s16 + $0x88] sm:$0xff] %v2851_v43  ;;  %v2850_v45 = vsel %vm2818_vm3, %v2594_v48, %v4135_v47  ;;  %vm2533_vm4 = vcmp.ge.f32.partialorder %v2451_v41, 0.0  ;;  %v2565_v16 = vmul.f32 0.2, %v2451_v41  ;;  %vm2826_vm3 = vcmp.eq.s32.totalorder %v2780_v0, 1 }
 0x51b   : > { %2882 = vst [vmem:[%s5212_s16 + $0x80] sm:$0xff] %v2850_v45  ;;  %vm2532_vm5 = vcmp.ge.f32.partialorder %v2446_v49, 0.0  ;;  %v2564_v57 = vmul.f32 0.2, %v2446_v49  ;;  %v3711_v53 = vpop.f32.mrb[36].mxu0 }
 0x51c   : > { %v2597_v50 = vsel %vm2533_vm4, %v2451_v41, %v2565_v16  ;;  %v2461_v20 = vadd.f32 %v3711_v53, %v5599_v54  ;;  %v2455_v58 = vpop.f32.mrb[37].mxu0  ;;  %v2795_v41 = vpop.permute.xlu1 %2794 }
 0x51d   : > { %v2853_v10 = vsel %vm2821_vm6, %v2597_v50, %v4136_v60  ;;  %v2596_v62 = vsel %vm2532_vm5, %v2446_v49, %v2564_v57  ;;  %v2456_v15 = vadd.f32 %v5599_v54, %v2455_v58  ;;  %vm2829_vm6 = vcmp.eq.s32.totalorder %v2789_v24, 1  ;;  %v4145_v57 = vld [vmem:[%s5186_s30 + $0xd0] sm:$0xff] }
 0x51e   : > { %2885 = vst [vmem:[%s5212_s16 + $0x98] sm:$0xff] %v2853_v10  ;;  %v2852_v23 = vsel %vm2820_vm7, %v2596_v62, %v4137_v21  ;;  %vm2535_vm8 = vcmp.ge.f32.partialorder %v2461_v20, 0.0  ;;  %v2567_v13 = vmul.f32 0.2, %v2461_v20  ;;  %vm2828_vm7 = vcmp.eq.s32.totalorder %v2786_v36, 1  ;;  %v4146_v21 = vld [vmem:[%s5186_s30 + $0xe8] sm:$0xff] }
 0x51f   : > { %2884 = vst [vmem:[%s5212_s16 + $0x90] sm:$0xff] %v2852_v23  ;;  %vm2534_vm9 = vcmp.ge.f32.partialorder %v2456_v15, 0.0  ;;  %v2566_v22 = vmul.f32 0.2, %v2456_v15  ;;  %v3714_v63 = vpop.f32.mrb[38].mxu0 }
 0x520   : > { %v2599_v44 = vsel %vm2535_vm8, %v2461_v20, %v2567_v13  ;;  %v2471_v1 = vadd.f32 %v3714_v63, %v5599_v54  ;;  %v2465_v25 = vpop.f32.mrb[39].mxu0  ;;  %v4147_v63 = vld [vmem:[%s5186_s30 + $0xe0] sm:$0xff] }
 0x521   : > { %v2855_v61 = vsel %vm2823_vm10, %v2599_v44, %v4138_v56  ;;  %v2598_v8 = vsel %vm2534_vm9, %v2456_v15, %v2566_v22  ;;  %v2466_v3 = vadd.f32 %v5599_v54, %v2465_v25  ;;  %vm2831_vm10 = vcmp.eq.s32.totalorder %v2795_v41, 1  ;;  %v2801_v15 = vpop.permute.xlu1 %2800  ;;  %v2798_v22 = vpop.permute.xlu0 %2797  ;;  %v4148_v56 = vld [vmem:[%s5186_s30 + $0xf8] sm:$0xff] }
 0x522   : > { %2887 = vst [vmem:[%s5212_s16 + $0xa8] sm:$0xff] %v2855_v61  ;;  %v2854_v51 = vsel %vm2822_vm11, %v2598_v8, %v4139_v55  ;;  %vm2537_vm12 = vcmp.ge.f32.partialorder %v2471_v1, 0.0  ;;  %v2569_v46 = vmul.f32 0.2, %v2471_v1  ;;  %vm2830_vm11 = vcmp.eq.s32.totalorder %v2792_v42, 1 }
 0x523   : > { %2886 = vst [vmem:[%s5212_s16 + $0xa0] sm:$0xff] %v2854_v51  ;;  %vm2536_vm13 = vcmp.ge.f32.partialorder %v2466_v3, 0.0  ;;  %v2568_v4 = vmul.f32 0.2, %v2466_v3  ;;  %v3717_v14 = vpop.f32.mrb[40].mxu0 }
 0x524   : > { %v2601_v6 = vsel %vm2537_vm12, %v2471_v1, %v2569_v46  ;;  %v2481_v27 = vadd.f32 %v3717_v14, %v5599_v54  ;;  %v2475_v7 = vpop.f32.mrb[41].mxu0 }
 0x525   : > { %v2857_v29 = vsel %vm2825_vm14, %v2601_v6, %v4140_v17  ;;  %v2600_v9 = vsel %vm2536_vm13, %v2466_v3, %v2568_v4  ;;  %v2476_v28 = vadd.f32 %v5599_v54, %v2475_v7  ;;  %vm2833_vm14 = vcmp.eq.s32.totalorder %v2801_v15, 1 }
 0x526   : > { %2889 = vst [vmem:[%s5212_s16 + $0xb8] sm:$0xff] %v2857_v29  ;;  %v2856_v2 = vsel %vm2824_vm15, %v2600_v9, %v4141_v31  ;;  %vm2539_vm0 = vcmp.ge.f32.partialorder %v2481_v27, 0.0  ;;  %v2571_v30 = vmul.f32 0.2, %v2481_v27  ;;  %vm2832_vm15 = vcmp.eq.s32.totalorder %v2798_v22, 1 }
 0x527   : > { %2888 = vst [vmem:[%s5212_s16 + $0xb0] sm:$0xff] %v2856_v2  ;;  %vm2538_vm1 = vcmp.ge.f32.partialorder %v2476_v28, 0.0  ;;  %v2570_v12 = vmul.f32 0.2, %v2476_v28  ;;  %v3720_v32 = vpop.f32.mrb[42].mxu0 }
 0x528   : > { %v2603_v5 = vsel %vm2539_vm0, %v2481_v27, %v2571_v30  ;;  %v2491_v33 = vadd.f32 %v3720_v32, %v5599_v54  ;;  %v2485_v34 = vpop.f32.mrb[43].mxu0 }
 0x529   : > { %v2859_v37 = vsel %vm2827_vm2, %v2603_v5, %v4142_v18  ;;  %v2602_v39 = vsel %vm2538_vm1, %v2476_v28, %v2570_v12  ;;  %v2486_v11 = vadd.f32 %v5599_v54, %v2485_v34 }
 0x52a   : > { %2891 = vst [vmem:[%s5212_s16 + $0xc8] sm:$0xff] %v2859_v37  ;;  %v2858_v40 = vsel %vm2826_vm3, %v2602_v39, %v4143_v26  ;;  %vm2541_vm4 = vcmp.ge.f32.partialorder %v2491_v33, 0.0  ;;  %v2573_v52 = vmul.f32 0.2, %v2491_v33 }
 0x52b   : > { %2890 = vst [vmem:[%s5212_s16 + $0xc0] sm:$0xff] %v2858_v40  ;;  %vm2540_vm5 = vcmp.ge.f32.partialorder %v2486_v11, 0.0  ;;  %v2572_v19 = vmul.f32 0.2, %v2486_v11  ;;  %v3723_v35 = vpop.f32.mrb[44].mxu0 }
 0x52c   : > { %v2605_v43 = vsel %vm2541_vm4, %v2491_v33, %v2573_v52  ;;  %v2501_v48 = vadd.f32 %v3723_v35, %v5599_v54  ;;  %v2495_v49 = vpop.f32.mrb[45].mxu0 }
 0x52d   : > { %v2861_v47 = vsel %vm2829_vm6, %v2605_v43, %v4144_v38  ;;  %v2604_v45 = vsel %vm2540_vm5, %v2486_v11, %v2572_v19  ;;  %v2496_v16 = vadd.f32 %v5599_v54, %v2495_v49 }
 0x52e   : > { %2893 = vst [vmem:[%s5212_s16 + $0xd8] sm:$0xff] %v2861_v47  ;;  %v2860_v53 = vsel %vm2828_vm7, %v2604_v45, %v4145_v57  ;;  %vm2543_vm8 = vcmp.ge.f32.partialorder %v2501_v48, 0.0  ;;  %v2575_v50 = vmul.f32 0.2, %v2501_v48 }
 0x52f   : > { %2892 = vst [vmem:[%s5212_s16 + $0xd0] sm:$0xff] %v2860_v53  ;;  %vm2542_vm9 = vcmp.ge.f32.partialorder %v2496_v16, 0.0  ;;  %v2574_v20 = vmul.f32 0.2, %v2496_v16  ;;  %v3726_v58 = vpop.f32.mrb[46].mxu0 }
 0x530   : > { %v2607_v60 = vsel %vm2543_vm8, %v2501_v48, %v2575_v50  ;;  %v2511_v10 = vadd.f32 %v3726_v58, %v5599_v54  ;;  %v2505_v62 = vpop.f32.mrb[47].mxu0 }
 0x531   : > { %v2863_v23 = vsel %vm2831_vm10, %v2607_v60, %v4146_v21  ;;  %v2606_v13 = vsel %vm2542_vm9, %v2496_v16, %v2574_v20  ;;  %v2506_v59 = vadd.f32 %v5599_v54, %v2505_v62  ;;  %v4149_v54 = vld [vmem:[%s5186_s30 + $0xf0] sm:$0xff] }
 0x532   : > { %2895 = vst [vmem:[%s5212_s16 + $0xe8] sm:$0xff] %v2863_v23  ;;  %v2862_v0 = vsel %vm2830_vm11, %v2606_v13, %v4147_v63  ;;  %vm2545_vm12 = vcmp.ge.f32.partialorder %v2511_v10, 0.0  ;;  %v2577_v44 = vmul.f32 0.2, %v2511_v10 }
 0x533   : > { %2894 = vst [vmem:[%s5212_s16 + $0xe0] sm:$0xff] %v2862_v0  ;;  %vm2544_vm13 = vcmp.ge.f32.partialorder %v2506_v59, 0.0  ;;  %v2576_v1 = vmul.f32 0.2, %v2506_v59 }
 0x534   : > { %v2609_v25 = vsel %vm2545_vm12, %v2511_v10, %v2577_v44 }
 0x535   : > { %v2865_v61 = vsel %vm2833_vm14, %v2609_v25, %v4148_v56  ;;  %v2608_v8 = vsel %vm2544_vm13, %v2506_v59, %v2576_v1 }
 0x536   : > { %2897 = vst [vmem:[%s5212_s16 + $0xf8] sm:$0xff] %v2865_v61  ;;  %v2864_v3 = vsel %vm2832_vm15, %v2608_v8, %v4149_v54 }
 0x537   : > { %2896 = vst [vmem:[%s5212_s16 + $0xf0] sm:$0xff] %v2864_v3 }
 0x538 PF: > { %s5940_s18 = sld [smem:[#allocation35_spill]]  ;;  %s5942_s11 = sld [smem:[#allocation45_spill]] }
 0x539   : > { %s5943_s22 = sld [smem:[#allocation52_spill]]  ;;  %s2912_s9 = sshll.u32 %s5212_s16, 4  ;;  %s5749_s9 = int_to_ptr.vmem [resolvable:$true] %s2912_s9 }
 0x53a   : > { %s5753_s26 = scalar_lea.sflag [#allocation5], %s531_s0  ;;  %s4466_s30 = scalar_lea.vmem %s5749_s9, 4096 }
 0x53b   : > { %p4467_p2 = scmp.ne.s32.totalorder %s5749_s9, %s4466_s30  ;;  %s4632_s25 = smov [#allocation20]  }
 0x53c   : > { %s4470_s23 = sshll.u32 %s4632_s25, 4  ;;  %s4471_s23 = int_to_ptr.vmem [resolvable:$false] %s4470_s23 }
 0x53d   : > { %s4472_s17 = scalar_lea.vmem %s4471_s23, 8192  ;;  %p4473_p1 = scmp.lt.s32.totalorder %s5749_s9, %s4471_s23 }
 0x53e   : > { %s3230_s20 = sshll.u32 %s5940_s18, 12  ;;  %p5945_p9 = scmp.ne.s32.totalorder %s5942_s11, 0 }
 0x53f   : > { %s5944_s4 = smov %s5943_s22  ;;  %s5746_s27 = scalar_lea.hbm %s5943_s22, %s3230_s20 }
 0x540   : > { %p4468_p8 = pnand %p4467_p2, %p5945_p9  ;;  %p4474_p3 = scmp.lt.s32.totalorder %s4472_s17, %s4466_s30 }
 0x542   : > { %p4469_p10 = pneg %p4468_p8  ;;  %p4475_p13 = por %p4474_p3, %p4473_p1 }
 0x544   : > { %p4476_p0 = pnand %p4475_p13, %p4469_p10 }
 0x546   : > { %4479 = shalt.err (!%p4476_p0)
}
 0x547   : > { %s4480_s0 = scalar_lea.hbm %s5746_s27, 4096  ;;  %s4484_s21 = scalar_lea.hbm %s5944_s4, 8192 }
 0x548   : > { %p4481_p12 = scmp.ne.s32.totalorder %s5746_s27, %s4480_s0  ;;  %p4485_p11 = scmp.lt.u32.totalorder %s5746_s27, %s5944_s4 }
 0x549   : > { %p4486_p5 = scmp.lt.u32.totalorder %s4484_s21, %s4480_s0  ;;  %p4488_p2 = scmp.lt.u32.totalorder %s4480_s0, %s5746_s27 }
 0x54a   : > { %p4482_p4 = pnand %p4481_p12, %p5945_p9 }
 0x54b   : > { %p4487_p6 = por %p4486_p5, %p4485_p11 }
 0x54c   : > { %p4483_p7 = pneg %p4482_p4 }
 0x54d   : > { %p4489_p8 = por %p4488_p2, %p4487_p6 }
 0x54f   : > { %p4490_p10 = pnand %p4489_p8, %p4483_p7 }
 0x551   : > { %4493 = shalt.err (!%p4490_p10)
}
 0x552   : > { %s4633_s24 = smov 128   ;;  %s4634_s18 = smov 8  }
 0x553   : > { %3891 = dma.vmem_to_hbm [thread:$0]  (%p5945_p9), %s5749_s9, 4096, %s5746_s27, %s5753_s26, %s4633_s24, %s4633_s24, %s4634_s18  }
 0x554 PF: > { %s5946_s10 = sld [smem:[#allocation38_spill]]  ;;  %s5947_s20 = sld [smem:[#allocation29_spill]] }
 0x555   : > { %s5948_s19 = sld [smem:[#allocation46_spill]] }
 0x55a   : > { %p3947_p1 = scmp.ge.s32.totalorder %s5946_s10, 2  ;;  %s2927_s2 = sand.u32 1, %s5947_s20  }
 0x55b   : > { %p5949_p3 = scmp.ne.s32.totalorder %s5948_s19, 0  ;;  %s2928_s22 = scalar_lea.sflag [#allocation5], %s2927_s2 }
 0x55d   : > { %p3929_p13 = pnand %p3947_p1, %p5949_p3 }
 0x55f   : > { %4567 = dma.done.wait (!%p3929_p13), %s2928_s22, 4096  }
 0x560   : > { %4569 = vsyncadd (!%p3929_p13), %s2928_s22, 4294963200  ;;  %s31_s27 = sadd.s32 1, %s5946_s10   ;;  %s5950_s17 = sld [smem:[#allocation30_spill]] }
 0x561   : > { %p28_p0 = scmp.ge.s32.totalorder %s31_s27, 6   ;;  %s5951_s18 = sld [smem:[#allocation31_spill]] }
 0x562   : > { %s5952_s19 = sld [smem:[#allocation43_spill]]  ;;  %s5953_s20 = sld [smem:[#allocation32_spill]] }
 0x563   : > { %s5954_s21 = sld [smem:[#allocation33_spill]]  ;;  %s5955_s22 = sld [smem:[#allocation42_spill]] }
 0x564   : > { %s5956_s23 = sld [smem:[#allocation36_spill]]  ;;  %s5957_s24 = sld [smem:[#allocation37_spill]] }
 0x565   : > { %s5958_s25 = sld [smem:[#allocation39_spill]]  ;;  %s5959_s26 = sld [smem:[#allocation40_spill]] }
 0x566   :  { %30 = sbr.rel (!%p28_p0) target bundleno = 20 (0x14), region = 179 }
 0x56d   :  { %2933 = vsyncpa [#allocation4], 1 }
 0x56e   :  { %2935 = vsyncpa [#allocation4 + $0x1], 1 }
 0x56f   :  { %2936 = vsyncpa [#allocation7], 1 }
 0x570   :  { %2937 = vsyncpa [#allocation13], 1 }
 0x571   :  { %2938 = vsyncpa [#allocation16], 1 }
 0x572   :  { %2939 = vsyncpa [#allocation19], 1 }
 0x573   :  { %2940 = vsyncpa [#allocation5], 1 }
 0x574   :  { %2942 = vsyncpa [#allocation5 + $0x1], 1 }

</bundles_post_ra>
